<compile_context>
chip_gen: v7x
topology: tpu7x:2x2x1
jax: 0.10.0
libtpu: 0.0.40
codegen_flags: <defaults>
</compile_context>

<pallas_src>
import functools

import jax
import jax.numpy as jnp
from jax import lax
from jax.experimental import pallas as pl
from jax.experimental.pallas import tpu as pltpu


# -----------------------------------------------------------------------------
# Packed-small-parameter layout (one f32 buffer, statically sliced in-kernel)
# -----------------------------------------------------------------------------
def _pack_layout(mol_hidden, embedding_dim, shared_dim, fnn_hidden, heads, gnn_out):
    items = (
        ("emb_b1", 1, mol_hidden),
        ("emb_b2", 1, embedding_dim),
        ("shb", 1, shared_dim),
        ("fpb", 1, shared_dim),
        ("hb1", 1, 2 * fnn_hidden),
        ("hb2", 1, 2),
        ("attn1_src", heads, embedding_dim),   # folded: C_src[h] = W_h @ a_src_h
        ("attn1_dst", heads, embedding_dim),   # folded: C_dst[h] = W_h @ a_dst_h
        ("attn2_src", 1, gnn_out),
        ("attn2_dst", 1, gnn_out),
        ("shwf", 2, shared_dim),               # shared-layer weight for the 2 polymer feats
        ("hw2T", 2, 2 * fnn_hidden),           # output head, transposed (block-diagonal)
    )
    layout, row, width = {}, 0, 0
    for name, nr, nc in items:
        layout[name] = (row, nr, nc)
        row += nr
        width = max(width, nc)
    rows = ((row + 7) // 8) * 8
    width = ((width + 127) // 128) * 128
    return layout, rows, width


# -----------------------------------------------------------------------------
# Fused forward kernel (single invocation, grid=(), all operands VMEM-resident)
# -----------------------------------------------------------------------------
def _fused_forward_kernel(
    x_ref,            # [N, in_pad]  f32   concat(mpnn | rdkit), lane-padded
    mask_ref,         # [N, N]       f32   adjacency (+ self loops)
    bias_ref,         # [heads+1, N, N] f32 per-head edge bias (last = GAT-2)
    pool_ref,         # [P, N]       f32   normalized mean-pool matrix
    pfeat_ref,        # [P, 2]       f32   polymer features
    fps_ref,          # [P, n_bits]  bf16  Morgan fingerprints (0/1, exact)
    ew1_ref,          # [in_pad, mol_hidden]        bf16
    ew2_ref,          # [mol_hidden, emb]           bf16
    g1w_ref,          # [emb, heads*hidden]         bf16
    g2w_ref,          # [heads*hidden, out_dim]     bf16
    shwp_ref,         # [out_dim, shared]           bf16
    fpw_ref,          # [n_bits, shared]            bf16
    hw1s_ref,         # [shared, 2*fnn_hidden]      bf16
    hw1f_ref,         # [shared, 2*fnn_hidden]      bf16
    pack_ref,         # [rows, width]               f32  packed small params
    o_ref,            # [P, 2]                      f32
    *, heads, hidden, out_dim, neg_slope, layout,
):
    f32 = jnp.float32
    bf16 = jnp.bfloat16

    def take(name):
        r0, nr, nc = layout[name]
        return pack_ref[r0:r0 + nr, 0:nc]

    def relu(v):
        return jnp.maximum(v, 0.0)

    def elu(v):
        # clamp the exponent so the untaken (positive) branch never overflows
        return jnp.where(v > 0.0, v, jnp.exp(jnp.minimum(v, 0.0)) - 1.0)

    # ---- 1) molecule embedding MLP (bf16 MXU operands, f32 accumulation) ----
    x = x_ref[...]
    h = relu(jnp.dot(x.astype(bf16), ew1_ref[...], preferred_element_type=f32)
             + take("emb_b1"))
    mol = (jnp.dot(h.astype(bf16), ew2_ref[...], preferred_element_type=f32)
           + take("emb_b2"))                                            # [N, emb] f32

    mask = mask_ref[...]
    valid = mask > 0.0

    def softmax_attend(e, wh):
        e = jnp.where(e > 0.0, e, neg_slope * e)                        # LeakyReLU(0.2)
        e = jnp.where(valid, e, -1e30)
        e = e - jnp.max(e, axis=-1, keepdims=True)
        p = jnp.where(valid, jnp.exp(e), 0.0)
        denom = jnp.sum(p, axis=-1, keepdims=True)
        alpha = p * pl.reciprocal(denom, approx=True)                   # EUP slot
        return jnp.dot(alpha, wh, preferred_element_type=f32)           # [N, F]

    # ---- 2a) GAT layer 1: stacked projection + folded attention scores ------
    mol_bf = mol.astype(bf16)
    wh1 = jnp.dot(mol_bf, g1w_ref[...], preferred_element_type=f32)     # [N, heads*hidden]
    a1_src = take("attn1_src")                                          # [heads, emb]
    a1_dst = take("attn1_dst")
    src1_t = lax.dot_general(a1_src, mol, (((1,), (1,)), ((), ())),
                             preferred_element_type=f32)                # [heads, N]
    dst1 = lax.dot_general(mol, a1_dst, (((1,), (1,)), ((), ())),
                           preferred_element_type=f32)                  # [N, heads]

    # ELU(concat(heads)) @ W2 == sum_h ELU(head_h) @ W2[h-block] -> no concat
    n = wh1.shape[0]
    wh2 = jnp.zeros((n, out_dim), f32)
    for hd in range(heads):
        whh = wh1[:, hd * hidden:(hd + 1) * hidden]                     # [N, hidden]
        e = dst1[:, hd:hd + 1] + src1_t[hd:hd + 1, :] + bias_ref[hd]    # [N, N]
        out_h = elu(softmax_attend(e, whh))                             # ELU after conv1
        w2_blk = g2w_ref[hd * hidden:(hd + 1) * hidden, :]              # static slice
        wh2 = wh2 + jnp.dot(out_h.astype(bf16), w2_blk,
                            preferred_element_type=f32)

    # ---- 2b) GAT layer 2 (single head) + per-polymer mean pooling -----------
    a2_src = take("attn2_src")                                          # [1, out_dim]
    a2_dst = take("attn2_dst")
    src2_t = lax.dot_general(a2_src, wh2, (((1,), (1,)), ((), ())),
                             preferred_element_type=f32)                # [1, N]
    dst2 = lax.dot_general(wh2, a2_dst, (((1,), (1,)), ((), ())),
                           preferred_element_type=f32)                  # [N, 1]
    g2 = softmax_attend(dst2 + src2_t + bias_ref[heads], wh2)           # [N, out_dim]
    poly = jnp.dot(pool_ref[...], g2, preferred_element_type=f32)       # [P, out_dim]

    # ---- 3) multitask FNN (dropout = inference no-op) ------------------------
    shared = relu(jnp.dot(poly.astype(bf16), shwp_ref[...], preferred_element_type=f32)
                  + jnp.dot(pfeat_ref[...], take("shwf"), preferred_element_type=f32)
                  + take("shb"))
    fp = relu(jnp.dot(fps_ref[...], fpw_ref[...], preferred_element_type=f32)
              + take("fpb"))
    hid = relu(jnp.dot(shared.astype(bf16), hw1s_ref[...], preferred_element_type=f32)
               + jnp.dot(fp.astype(bf16), hw1f_ref[...], preferred_element_type=f32)
               + take("hb1"))
    out = lax.dot_general(hid, take("hw2T"), (((1,), (1,)), ((), ())),
                          preferred_element_type=f32) + take("hb2")
    o_ref[...] = out.astype(o_ref.dtype)                                # [P, 2]


# -----------------------------------------------------------------------------
# Parameter construction (fused layout, equivalent to the per-module weights)
# -----------------------------------------------------------------------------
def _glorot(key, shape):
    fan_in, fan_out = shape[0], shape[-1]
    scale = jnp.sqrt(2.0 / (fan_in + fan_out)).astype(jnp.float32)
    return scale * jax.random.normal(key, shape, dtype=jnp.float32)


def init_params(key, *, mpnn_output_dim=64, n_rdkit=7, mol_hidden=512,
                embedding_dim=256, gnn_hidden=256, gnn_out=128, gnn_heads=4,
                edge_dim=3, shared_dim=128, fnn_hidden=128, n_bits=2048):
    f32, bf16 = jnp.float32, jnp.bfloat16
    ks = iter(jax.random.split(key, 64))

    # molecule embedding: Linear([mpnn | rdkit] -> mol_hidden) with lane-padded rows
    in_dim = mpnn_output_dim + n_rdkit
    in_pad = ((in_dim + 127) // 128) * 128
    w1 = _glorot(next(ks), (in_dim, mol_hidden))
    emb_w1 = jnp.zeros((in_pad, mol_hidden), f32).at[:in_dim].set(w1)
    emb_w2 = _glorot(next(ks), (mol_hidden, embedding_dim))

    # GAT layer 1 (heads, concat=True): per-head W stacked along the lane axis
    gat1_w = _glorot(next(ks), (embedding_dim, gnn_heads * gnn_hidden))
    a1_src = _glorot(next(ks), (gnn_heads, gnn_hidden))
    a1_dst = _glorot(next(ks), (gnn_heads, gnn_hidden))
    gat1_w_edge = _glorot(next(ks), (edge_dim, gnn_heads))
    # fold the attention vectors into the projection (scores are linear in W x)
    w3 = gat1_w.reshape(embedding_dim, gnn_heads, gnn_hidden)
    c1_src = jnp.einsum("ehf,hf->he", w3, a1_src)                       # [heads, emb]
    c1_dst = jnp.einsum("ehf,hf->he", w3, a1_dst)

    # GAT layer 2 (single head)
    gat2_w = _glorot(next(ks), (gnn_heads * gnn_hidden, gnn_out))
    a2_src = _glorot(next(ks), (1, gnn_out))
    a2_dst = _glorot(next(ks), (1, gnn_out))
    gat2_w_edge = _glorot(next(ks), (edge_dim, 1))

    # multitask FNN: shared Linear([poly_emb | polymer_feats] -> shared) split
    shwp = _glorot(next(ks), (gnn_out, shared_dim))
    shwf = _glorot(next(ks), (2, shared_dim))
    fpw = _glorot(next(ks), (n_bits, shared_dim))
    iv_w1 = _glorot(next(ks), (2 * shared_dim, fnn_hidden))
    rg_w1 = _glorot(next(ks), (2 * shared_dim, fnn_hidden))
    hw1s = jnp.concatenate([iv_w1[:shared_dim], rg_w1[:shared_dim]], axis=1)
    hw1f = jnp.concatenate([iv_w1[shared_dim:], rg_w1[shared_dim:]], axis=1)
    iv_w2 = _glorot(next(ks), (fnn_hidden, 1))
    rg_w2 = _glorot(next(ks), (fnn_hidden, 1))
    hw2 = (jnp.zeros((2 * fnn_hidden, 2), f32)
           .at[:fnn_hidden, 0:1].set(iv_w2)
           .at[fnn_hidden:, 1:2].set(rg_w2))

    # packed small f32 buffer (biases are zero -> already zero in the pack)
    layout, rows, width = _pack_layout(mol_hidden, embedding_dim, shared_dim,
                                       fnn_hidden, gnn_heads, gnn_out)
    pack = jnp.zeros((rows, width), f32)

    def put(buf, name, val):
        r0, nr, nc = layout[name]
        return buf.at[r0:r0 + nr, 0:nc].set(val.reshape(nr, nc))

    pack = put(pack, "attn1_src", c1_src)
    pack = put(pack, "attn1_dst", c1_dst)
    pack = put(pack, "attn2_src", a2_src)
    pack = put(pack, "attn2_dst", a2_dst)
    pack = put(pack, "shwf", shwf)
    pack = put(pack, "hw2T", hw2.T)

    return {
        # big weights -> bf16 (halves the HBM weight-DMA floor on all gens)
        "emb_w1": emb_w1.astype(bf16),
        "emb_w2": emb_w2.astype(bf16),
        "gat1_w": gat1_w.astype(bf16),
        "gat2_w": gat2_w.astype(bf16),
        "shwp": shwp.astype(bf16),
        "fpw": fpw.astype(bf16),
        "hw1s": hw1s.astype(bf16),
        "hw1f": hw1f.astype(bf16),
        # small / host-side pieces stay f32
        "gat1_w_edge": gat1_w_edge,
        "gat2_w_edge": gat2_w_edge,
        "pack": pack,
    }


# -----------------------------------------------------------------------------
# Forward wrapper: graph preprocessing (padding, dense mask/bias/pool) + kernel
# -----------------------------------------------------------------------------
def _round_up(x, m):
    return ((x + m - 1) // m) * m


def polymer_gnn_forward(params, mpnn_out, full_rdkit_tensor, polymer_feats,
                        fingerprints, edge_index, edge_attr, polymer_mapping,
                        num_polymers):
    f32, bf16 = jnp.float32, jnp.bfloat16

    n_mol = mpnn_out.shape[0]
    n_poly = num_polymers
    nm = max(16, _round_up(n_mol, 16))        # 16-row pad: bf16 sublane tile
    npad = max(16, _round_up(n_poly, 16))

    # static dims from parameter shapes
    heads = params["gat1_w_edge"].shape[1]
    emb = params["gat1_w"].shape[0]
    hidden = params["gat1_w"].shape[1] // heads
    gnn_out = params["gat2_w"].shape[1]
    mol_hidden = params["emb_w2"].shape[0]
    shared = params["shwp"].shape[1]
    fnn_hidden = params["hw1s"].shape[1] // 2
    in_pad = params["emb_w1"].shape[0]
    layout, _, _ = _pack_layout(mol_hidden, emb, shared, fnn_hidden, heads, gnn_out)

    # molecule input: concat(mpnn | rdkit), lane-padded to the weight's row count
    x_cat = jnp.concatenate([mpnn_out, full_rdkit_tensor], axis=1).astype(f32)
    x_cat = jnp.pad(x_cat, ((0, nm - n_mol), (0, in_pad - x_cat.shape[1])))

    src, dst = edge_index[0], edge_index[1]

    # dense adjacency (messages src -> dst) with self loops (>=1 valid entry/row)
    mask = jnp.zeros((nm, nm), f32).at[dst, src].set(1.0)
    mask = jnp.maximum(mask, jnp.eye(nm, dtype=f32))
    # TODO(synk): PyG GATConv fills self-loop edge_attr with the mean edge attr;
    # here the self-loop edge bias is 0 (small systematic deviation).
    # TODO(synk): duplicate edges collapse in the scatter (last write wins);
    # assumes the graph has no multi-edges.

    # per-head edge bias for BOTH GAT layers: one matmul + one scatter
    w_edge = jnp.concatenate([params["gat1_w_edge"], params["gat2_w_edge"]], axis=1)
    logits = edge_attr.astype(f32) @ w_edge                              # [E, heads+1]
    bias_all = jnp.zeros((heads + 1, nm, nm), f32).at[:, dst, src].set(logits.T)

    # normalized mean-pool matrix [P_pad, N_pad]
    pool = jax.nn.one_hot(polymer_mapping, n_poly, dtype=f32).T          # [P, N]
    pool = pool / jnp.maximum(jnp.sum(pool, axis=1, keepdims=True), 1.0)
    pool = jnp.pad(pool, ((0, npad - n_poly), (0, nm - n_mol)))

    pfeat = jnp.pad(polymer_feats.astype(f32), ((0, npad - n_poly), (0, 0)))
    fps = jnp.pad(fingerprints, ((0, npad - n_poly), (0, 0))).astype(bf16)  # 0/1 exact

    kernel = functools.partial(_fused_forward_kernel, heads=heads, hidden=hidden,
                               out_dim=gnn_out, neg_slope=0.2, layout=layout)

    out = pl.pallas_call(
        kernel,
        out_shape=jax.ShapeDtypeStruct((npad, 2), f32),
        compiler_params=pltpu.CompilerParams(
            # ~2 MiB of operands at demo scale; budget grows O((heads+1)*N^2)
            # with graph size -> tile over destination rows before approaching
            # v7x's 64 MiB physical VMEM.
            vmem_limit_bytes=32 * 1024 * 1024),
    )(x_cat, mask, bias_all, pool, pfeat, fps,
      params["emb_w1"], params["emb_w2"], params["gat1_w"], params["gat2_w"],
      params["shwp"], params["fpw"], params["hw1s"], params["hw1f"],
      params["pack"])
    # TODO(synk): original forward also executes print('forward pass happened')
    # (host-side side effect, intentionally omitted).
    return out[:n_poly]                                                  # [P, 2] = [IV, Rg]


# -----------------------------------------------------------------------------
if __name__ == "__main__":
    MPNN_DIM, N_RDKIT, N_MOL, N_POLY, N_BITS, EDGE_DIM = 64, 7, 6, 2, 2048, 3

    params = init_params(jax.random.PRNGKey(42), mpnn_output_dim=MPNN_DIM,
                         n_rdkit=N_RDKIT, n_bits=N_BITS, edge_dim=EDGE_DIM)

    key = jax.random.PRNGKey(0)
    k1, k2, k3, k4, k5 = jax.random.split(key, 5)
    mpnn_out = jax.random.normal(k1, (N_MOL, MPNN_DIM), dtype=jnp.float32)
    full_rdkit_tensor = jnp.abs(jax.random.normal(k2, (N_MOL, N_RDKIT), dtype=jnp.float32)) * 5.0
    polymer_feats = jax.random.normal(k3, (N_POLY, 2), dtype=jnp.float32)
    fingerprints = jax.random.bernoulli(k4, 0.1, (N_POLY, N_BITS)).astype(jnp.float32)

    # two polymers: molecules {0,1,2} (fully connected) and {3,4,5} (chain)
    src = jnp.array([0, 1, 0, 2, 1, 2, 3, 4, 4, 5], dtype=jnp.int32)
    dst = jnp.array([1, 0, 2, 0, 2, 1, 4, 3, 5, 4], dtype=jnp.int32)
    edge_index = jnp.stack([src, dst], axis=0)                           # [2, E]
    edge_attr = jax.random.normal(k5, (src.shape[0], EDGE_DIM), dtype=jnp.float32)
    polymer_mapping = jnp.array([0, 0, 0, 1, 1, 1], dtype=jnp.int32)

    fwd = jax.jit(functools.partial(polymer_gnn_forward, num_polymers=N_POLY))
    preds = fwd(params, mpnn_out, full_rdkit_tensor, polymer_feats,
                fingerprints, edge_index, edge_attr, polymer_mapping)
    preds = jax.block_until_ready(preds)
    assert preds.shape == (N_POLY, 2) and bool(jnp.all(jnp.isfinite(preds)))
    print("KERNEL_OK")
</pallas_src>

<mosaic_0001>
module attributes {stable_mosaic.version = 11 : i64} {
  func.func @_fused_forward_kernel(%arg0: memref<16x128xf32, #tpu.memory_space<vmem>>, %arg1: memref<16x16xf32, #tpu.memory_space<vmem>>, %arg2: memref<5x16x16xf32, #tpu.memory_space<vmem>>, %arg3: memref<16x16xf32, #tpu.memory_space<vmem>>, %arg4: memref<16x2xf32, #tpu.memory_space<vmem>>, %arg5: memref<16x2048xbf16, #tpu.memory_space<vmem>>, %arg6: memref<128x512xbf16, #tpu.memory_space<vmem>>, %arg7: memref<512x256xbf16, #tpu.memory_space<vmem>>, %arg8: memref<256x1024xbf16, #tpu.memory_space<vmem>>, %arg9: memref<1024x128xbf16, #tpu.memory_space<vmem>>, %arg10: memref<128x128xbf16, #tpu.memory_space<vmem>>, %arg11: memref<2048x128xbf16, #tpu.memory_space<vmem>>, %arg12: memref<128x256xbf16, #tpu.memory_space<vmem>>, %arg13: memref<128x256xbf16, #tpu.memory_space<vmem>>, %arg14: memref<24x512xf32, #tpu.memory_space<vmem>>, %arg15: memref<16x2xf32, #tpu.memory_space<vmem>>) attributes {dimension_semantics = [], scalar_prefetch = 0 : i64, scratch_operands = 0 : i64, tpu.core_type = #tpu.core_type<tc>} {
    %c0 = arith.constant 0 : index
    %c0_0 = arith.constant 0 : index
    %0 = vector.load %arg0[%c0, %c0_0] : memref<16x128xf32, #tpu.memory_space<vmem>>, vector<16x128xf32>
    %1 = arith.truncf %0 : vector<16x128xf32> to vector<16x128xbf16>
    %c0_1 = arith.constant 0 : index
    %c0_2 = arith.constant 0 : index
    %2 = vector.load %arg6[%c0_1, %c0_2] : memref<128x512xbf16, #tpu.memory_space<vmem>>, vector<128x512xbf16>
    %cst = arith.constant dense<0.000000e+00> : vector<16x512xf32>
    %3 = tpu.matmul %1, %2, %cst {dimension_numbers = #tpu.dot_dimension_numbers<[1], [0], [0], [1], [0, 0, 1, 1], [], []>} : vector<16x128xbf16>, vector<128x512xbf16>, vector<16x512xf32> -> vector<16x512xf32>
    %c0_3 = arith.constant 0 : index
    %c0_4 = arith.constant 0 : index
    %4 = vector.load %arg14[%c0_3, %c0_4] : memref<24x512xf32, #tpu.memory_space<vmem>>, vector<1x512xf32>
    %5 = vector.broadcast %4 : vector<1x512xf32> to vector<16x512xf32>
    %6 = arith.addf %3, %5 : vector<16x512xf32>
    %cst_5 = arith.constant 0.000000e+00 : f32
    %7 = vector.broadcast %cst_5 : f32 to vector<16x512xf32>
    %8 = arith.maximumf %6, %7 : vector<16x512xf32>
    %9 = arith.truncf %8 : vector<16x512xf32> to vector<16x512xbf16>
    %c0_6 = arith.constant 0 : index
    %c0_7 = arith.constant 0 : index
    %10 = vector.load %arg7[%c0_6, %c0_7] : memref<512x256xbf16, #tpu.memory_space<vmem>>, vector<512x256xbf16>
    %cst_8 = arith.constant dense<0.000000e+00> : vector<16x256xf32>
    %11 = tpu.matmul %9, %10, %cst_8 {dimension_numbers = #tpu.dot_dimension_numbers<[1], [0], [0], [1], [0, 0, 1, 1], [], []>} : vector<16x512xbf16>, vector<512x256xbf16>, vector<16x256xf32> -> vector<16x256xf32>
    %c1 = arith.constant 1 : index
    %c0_9 = arith.constant 0 : index
    %12 = vector.load %arg14[%c1, %c0_9] : memref<24x512xf32, #tpu.memory_space<vmem>>, vector<1x256xf32>
    %13 = vector.broadcast %12 : vector<1x256xf32> to vector<16x256xf32>
    %14 = arith.addf %11, %13 : vector<16x256xf32>
    %c0_10 = arith.constant 0 : index
    %c0_11 = arith.constant 0 : index
    %15 = vector.load %arg1[%c0_10, %c0_11] : memref<16x16xf32, #tpu.memory_space<vmem>>, vector<16x16xf32>
    %cst_12 = arith.constant 0.000000e+00 : f32
    %16 = vector.broadcast %cst_12 : f32 to vector<16x16xf32>
    %17 = arith.cmpf ogt, %15, %16 : vector<16x16xf32>
    %18 = arith.truncf %14 : vector<16x256xf32> to vector<16x256xbf16>
    %c0_13 = arith.constant 0 : index
    %c0_14 = arith.constant 0 : index
    %19 = vector.load %arg8[%c0_13, %c0_14] : memref<256x1024xbf16, #tpu.memory_space<vmem>>, vector<256x1024xbf16>
    %cst_15 = arith.constant dense<0.000000e+00> : vector<16x1024xf32>
    %20 = tpu.matmul %18, %19, %cst_15 {dimension_numbers = #tpu.dot_dimension_numbers<[1], [0], [0], [1], [0, 0, 1, 1], [], []>} : vector<16x256xbf16>, vector<256x1024xbf16>, vector<16x1024xf32> -> vector<16x1024xf32>
    %c6 = arith.constant 6 : index
    %c0_16 = arith.constant 0 : index
    %21 = vector.load %arg14[%c6, %c0_16] : memref<24x512xf32, #tpu.memory_space<vmem>>, vector<4x256xf32>
    %c10 = arith.constant 10 : index
    %c0_17 = arith.constant 0 : index
    %22 = vector.load %arg14[%c10, %c0_17] : memref<24x512xf32, #tpu.memory_space<vmem>>, vector<4x256xf32>
    %cst_18 = arith.constant dense<0.000000e+00> : vector<4x16xf32>
    %23 = tpu.matmul %21, %14, %cst_18 {dimension_numbers = #tpu.dot_dimension_numbers<[1], [1], [0], [0], [0, 0, 1, 0], [], []>} : vector<4x256xf32>, vector<16x256xf32>, vector<4x16xf32> -> vector<4x16xf32>
    %cst_19 = arith.constant dense<0.000000e+00> : vector<16x4xf32>
    %24 = tpu.matmul %14, %22, %cst_19 {dimension_numbers = #tpu.dot_dimension_numbers<[1], [1], [0], [0], [0, 0, 1, 0], [], []>} : vector<16x256xf32>, vector<4x256xf32>, vector<16x4xf32> -> vector<16x4xf32>
    %cst_20 = arith.constant 0.000000e+00 : f32
    %25 = vector.broadcast %cst_20 : f32 to vector<16x128xf32>
    %26 = vector.extract_strided_slice %20 {offsets = [0, 0], sizes = [16, 256], strides = [1, 1]} : vector<16x1024xf32> to vector<16x256xf32>
    %27 = vector.extract_strided_slice %24 {offsets = [0, 0], sizes = [16, 1], strides = [1, 1]} : vector<16x4xf32> to vector<16x1xf32>
    %28 = vector.extract_strided_slice %23 {offsets = [0, 0], sizes = [1, 16], strides = [1, 1]} : vector<4x16xf32> to vector<1x16xf32>
    %29 = vector.broadcast %27 : vector<16x1xf32> to vector<16x16xf32>
    %30 = vector.broadcast %28 : vector<1x16xf32> to vector<16x16xf32>
    %31 = arith.addf %29, %30 : vector<16x16xf32>
    %c0_21 = arith.constant 0 : index
    %c0_22 = arith.constant 0 : index
    %c0_23 = arith.constant 0 : index
    %32 = vector.load %arg2[%c0_21, %c0_22, %c0_23] : memref<5x16x16xf32, #tpu.memory_space<vmem>>, vector<1x16x16xf32>
    %33 = vector.shape_cast %32 : vector<1x16x16xf32> to vector<16x16xf32>
    %34 = arith.addf %31, %33 : vector<16x16xf32>
    %cst_24 = arith.constant 0.000000e+00 : f32
    %35 = vector.broadcast %cst_24 : f32 to vector<16x16xf32>
    %36 = arith.cmpf ogt, %34, %35 : vector<16x16xf32>
    %cst_25 = arith.constant 2.000000e-01 : f32
    %37 = vector.broadcast %cst_25 : f32 to vector<16x16xf32>
    %38 = arith.mulf %37, %34 : vector<16x16xf32>
    %39 = arith.select %36, %34, %38 : vector<16x16xi1>, vector<16x16xf32>
    %cst_26 = arith.constant -1.000000e+30 : f32
    %40 = vector.broadcast %cst_26 : f32 to vector<16x16xf32>
    %41 = arith.select %17, %39, %40 : vector<16x16xi1>, vector<16x16xf32>
    %cst_27 = arith.constant dense<0xFF800000> : vector<16xf32>
    %42 = vector.multi_reduction <maximumf>, %41, %cst_27 [1] : vector<16x16xf32> to vector<16xf32>
    %43 = vector.shape_cast %42 : vector<16xf32> to vector<16x1xf32>
    %44 = vector.broadcast %43 : vector<16x1xf32> to vector<16x16xf32>
    %45 = arith.subf %41, %44 : vector<16x16xf32>
    %46 = math.exp %45 : vector<16x16xf32>
    %cst_28 = arith.constant 0.000000e+00 : f32
    %47 = vector.broadcast %cst_28 : f32 to vector<16x16xf32>
    %48 = arith.select %17, %46, %47 : vector<16x16xi1>, vector<16x16xf32>
    %cst_29 = arith.constant dense<0.000000e+00> : vector<16xf32>
    %49 = vector.multi_reduction <add>, %48, %cst_29 [1] : vector<16x16xf32> to vector<16xf32>
    %50 = vector.shape_cast %49 : vector<16xf32> to vector<16x1xf32>
    %51 = tpu.reciprocal %50 {approx = true} : vector<16x1xf32> -> vector<16x1xf32>
    %52 = vector.broadcast %51 : vector<16x1xf32> to vector<16x16xf32>
    %53 = arith.mulf %48, %52 : vector<16x16xf32>
    %cst_30 = arith.constant dense<0.000000e+00> : vector<16x256xf32>
    %54 = tpu.matmul %53, %26, %cst_30 {dimension_numbers = #tpu.dot_dimension_numbers<[1], [0], [0], [1], [0, 0, 1, 1], [], []>} : vector<16x16xf32>, vector<16x256xf32>, vector<16x256xf32> -> vector<16x256xf32>
    %cst_31 = arith.constant 0.000000e+00 : f32
    %55 = vector.broadcast %cst_31 : f32 to vector<16x256xf32>
    %56 = arith.cmpf ogt, %54, %55 : vector<16x256xf32>
    %cst_32 = arith.constant 0.000000e+00 : f32
    %57 = vector.broadcast %cst_32 : f32 to vector<16x256xf32>
    %58 = arith.minimumf %54, %57 : vector<16x256xf32>
    %59 = math.exp %58 : vector<16x256xf32>
    %cst_33 = arith.constant 1.000000e+00 : f32
    %60 = vector.broadcast %cst_33 : f32 to vector<16x256xf32>
    %61 = arith.subf %59, %60 : vector<16x256xf32>
    %62 = arith.select %56, %54, %61 : vector<16x256xi1>, vector<16x256xf32>
    %c0_34 = arith.constant 0 : index
    %c0_35 = arith.constant 0 : index
    %63 = vector.load %arg9[%c0_34, %c0_35] : memref<1024x128xbf16, #tpu.memory_space<vmem>>, vector<256x128xbf16>
    %64 = arith.truncf %62 : vector<16x256xf32> to vector<16x256xbf16>
    %cst_36 = arith.constant dense<0.000000e+00> : vector<16x128xf32>
    %65 = tpu.matmul %64, %63, %cst_36 {dimension_numbers = #tpu.dot_dimension_numbers<[1], [0], [0], [1], [0, 0, 1, 1], [], []>} : vector<16x256xbf16>, vector<256x128xbf16>, vector<16x128xf32> -> vector<16x128xf32>
    %66 = arith.addf %25, %65 : vector<16x128xf32>
    %67 = vector.extract_strided_slice %20 {offsets = [0, 256], sizes = [16, 256], strides = [1, 1]} : vector<16x1024xf32> to vector<16x256xf32>
    %68 = vector.extract_strided_slice %24 {offsets = [0, 1], sizes = [16, 1], strides = [1, 1]} : vector<16x4xf32> to vector<16x1xf32>
    %69 = vector.extract_strided_slice %23 {offsets = [1, 0], sizes = [1, 16], strides = [1, 1]} : vector<4x16xf32> to vector<1x16xf32>
    %70 = vector.broadcast %68 : vector<16x1xf32> to vector<16x16xf32>
    %71 = vector.broadcast %69 : vector<1x16xf32> to vector<16x16xf32>
    %72 = arith.addf %70, %71 : vector<16x16xf32>
    %c1_37 = arith.constant 1 : index
    %c0_38 = arith.constant 0 : index
    %c0_39 = arith.constant 0 : index
    %73 = vector.load %arg2[%c1_37, %c0_38, %c0_39] : memref<5x16x16xf32, #tpu.memory_space<vmem>>, vector<1x16x16xf32>
    %74 = vector.shape_cast %73 : vector<1x16x16xf32> to vector<16x16xf32>
    %75 = arith.addf %72, %74 : vector<16x16xf32>
    %cst_40 = arith.constant 0.000000e+00 : f32
    %76 = vector.broadcast %cst_40 : f32 to vector<16x16xf32>
    %77 = arith.cmpf ogt, %75, %76 : vector<16x16xf32>
    %cst_41 = arith.constant 2.000000e-01 : f32
    %78 = vector.broadcast %cst_41 : f32 to vector<16x16xf32>
    %79 = arith.mulf %78, %75 : vector<16x16xf32>
    %80 = arith.select %77, %75, %79 : vector<16x16xi1>, vector<16x16xf32>
    %cst_42 = arith.constant -1.000000e+30 : f32
    %81 = vector.broadcast %cst_42 : f32 to vector<16x16xf32>
    %82 = arith.select %17, %80, %81 : vector<16x16xi1>, vector<16x16xf32>
    %cst_43 = arith.constant dense<0xFF800000> : vector<16xf32>
    %83 = vector.multi_reduction <maximumf>, %82, %cst_43 [1] : vector<16x16xf32> to vector<16xf32>
    %84 = vector.shape_cast %83 : vector<16xf32> to vector<16x1xf32>
    %85 = vector.broadcast %84 : vector<16x1xf32> to vector<16x16xf32>
    %86 = arith.subf %82, %85 : vector<16x16xf32>
    %87 = math.exp %86 : vector<16x16xf32>
    %cst_44 = arith.constant 0.000000e+00 : f32
    %88 = vector.broadcast %cst_44 : f32 to vector<16x16xf32>
    %89 = arith.select %17, %87, %88 : vector<16x16xi1>, vector<16x16xf32>
    %cst_45 = arith.constant dense<0.000000e+00> : vector<16xf32>
    %90 = vector.multi_reduction <add>, %89, %cst_45 [1] : vector<16x16xf32> to vector<16xf32>
    %91 = vector.shape_cast %90 : vector<16xf32> to vector<16x1xf32>
    %92 = tpu.reciprocal %91 {approx = true} : vector<16x1xf32> -> vector<16x1xf32>
    %93 = vector.broadcast %92 : vector<16x1xf32> to vector<16x16xf32>
    %94 = arith.mulf %89, %93 : vector<16x16xf32>
    %cst_46 = arith.constant dense<0.000000e+00> : vector<16x256xf32>
    %95 = tpu.matmul %94, %67, %cst_46 {dimension_numbers = #tpu.dot_dimension_numbers<[1], [0], [0], [1], [0, 0, 1, 1], [], []>} : vector<16x16xf32>, vector<16x256xf32>, vector<16x256xf32> -> vector<16x256xf32>
    %cst_47 = arith.constant 0.000000e+00 : f32
    %96 = vector.broadcast %cst_47 : f32 to vector<16x256xf32>
    %97 = arith.cmpf ogt, %95, %96 : vector<16x256xf32>
    %cst_48 = arith.constant 0.000000e+00 : f32
    %98 = vector.broadcast %cst_48 : f32 to vector<16x256xf32>
    %99 = arith.minimumf %95, %98 : vector<16x256xf32>
    %100 = math.exp %99 : vector<16x256xf32>
    %cst_49 = arith.constant 1.000000e+00 : f32
    %101 = vector.broadcast %cst_49 : f32 to vector<16x256xf32>
    %102 = arith.subf %100, %101 : vector<16x256xf32>
    %103 = arith.select %97, %95, %102 : vector<16x256xi1>, vector<16x256xf32>
    %c256 = arith.constant 256 : index
    %c0_50 = arith.constant 0 : index
    %104 = vector.load %arg9[%c256, %c0_50] : memref<1024x128xbf16, #tpu.memory_space<vmem>>, vector<256x128xbf16>
    %105 = arith.truncf %103 : vector<16x256xf32> to vector<16x256xbf16>
    %cst_51 = arith.constant dense<0.000000e+00> : vector<16x128xf32>
    %106 = tpu.matmul %105, %104, %cst_51 {dimension_numbers = #tpu.dot_dimension_numbers<[1], [0], [0], [1], [0, 0, 1, 1], [], []>} : vector<16x256xbf16>, vector<256x128xbf16>, vector<16x128xf32> -> vector<16x128xf32>
    %107 = arith.addf %66, %106 : vector<16x128xf32>
    %108 = vector.extract_strided_slice %20 {offsets = [0, 512], sizes = [16, 256], strides = [1, 1]} : vector<16x1024xf32> to vector<16x256xf32>
    %109 = vector.extract_strided_slice %24 {offsets = [0, 2], sizes = [16, 1], strides = [1, 1]} : vector<16x4xf32> to vector<16x1xf32>
    %110 = vector.extract_strided_slice %23 {offsets = [2, 0], sizes = [1, 16], strides = [1, 1]} : vector<4x16xf32> to vector<1x16xf32>
    %111 = vector.broadcast %109 : vector<16x1xf32> to vector<16x16xf32>
    %112 = vector.broadcast %110 : vector<1x16xf32> to vector<16x16xf32>
    %113 = arith.addf %111, %112 : vector<16x16xf32>
    %c2 = arith.constant 2 : index
    %c0_52 = arith.constant 0 : index
    %c0_53 = arith.constant 0 : index
    %114 = vector.load %arg2[%c2, %c0_52, %c0_53] : memref<5x16x16xf32, #tpu.memory_space<vmem>>, vector<1x16x16xf32>
    %115 = vector.shape_cast %114 : vector<1x16x16xf32> to vector<16x16xf32>
    %116 = arith.addf %113, %115 : vector<16x16xf32>
    %cst_54 = arith.constant 0.000000e+00 : f32
    %117 = vector.broadcast %cst_54 : f32 to vector<16x16xf32>
    %118 = arith.cmpf ogt, %116, %117 : vector<16x16xf32>
    %cst_55 = arith.constant 2.000000e-01 : f32
    %119 = vector.broadcast %cst_55 : f32 to vector<16x16xf32>
    %120 = arith.mulf %119, %116 : vector<16x16xf32>
    %121 = arith.select %118, %116, %120 : vector<16x16xi1>, vector<16x16xf32>
    %cst_56 = arith.constant -1.000000e+30 : f32
    %122 = vector.broadcast %cst_56 : f32 to vector<16x16xf32>
    %123 = arith.select %17, %121, %122 : vector<16x16xi1>, vector<16x16xf32>
    %cst_57 = arith.constant dense<0xFF800000> : vector<16xf32>
    %124 = vector.multi_reduction <maximumf>, %123, %cst_57 [1] : vector<16x16xf32> to vector<16xf32>
    %125 = vector.shape_cast %124 : vector<16xf32> to vector<16x1xf32>
    %126 = vector.broadcast %125 : vector<16x1xf32> to vector<16x16xf32>
    %127 = arith.subf %123, %126 : vector<16x16xf32>
    %128 = math.exp %127 : vector<16x16xf32>
    %cst_58 = arith.constant 0.000000e+00 : f32
    %129 = vector.broadcast %cst_58 : f32 to vector<16x16xf32>
    %130 = arith.select %17, %128, %129 : vector<16x16xi1>, vector<16x16xf32>
    %cst_59 = arith.constant dense<0.000000e+00> : vector<16xf32>
    %131 = vector.multi_reduction <add>, %130, %cst_59 [1] : vector<16x16xf32> to vector<16xf32>
    %132 = vector.shape_cast %131 : vector<16xf32> to vector<16x1xf32>
    %133 = tpu.reciprocal %132 {approx = true} : vector<16x1xf32> -> vector<16x1xf32>
    %134 = vector.broadcast %133 : vector<16x1xf32> to vector<16x16xf32>
    %135 = arith.mulf %130, %134 : vector<16x16xf32>
    %cst_60 = arith.constant dense<0.000000e+00> : vector<16x256xf32>
    %136 = tpu.matmul %135, %108, %cst_60 {dimension_numbers = #tpu.dot_dimension_numbers<[1], [0], [0], [1], [0, 0, 1, 1], [], []>} : vector<16x16xf32>, vector<16x256xf32>, vector<16x256xf32> -> vector<16x256xf32>
    %cst_61 = arith.constant 0.000000e+00 : f32
    %137 = vector.broadcast %cst_61 : f32 to vector<16x256xf32>
    %138 = arith.cmpf ogt, %136, %137 : vector<16x256xf32>
    %cst_62 = arith.constant 0.000000e+00 : f32
    %139 = vector.broadcast %cst_62 : f32 to vector<16x256xf32>
    %140 = arith.minimumf %136, %139 : vector<16x256xf32>
    %141 = math.exp %140 : vector<16x256xf32>
    %cst_63 = arith.constant 1.000000e+00 : f32
    %142 = vector.broadcast %cst_63 : f32 to vector<16x256xf32>
    %143 = arith.subf %141, %142 : vector<16x256xf32>
    %144 = arith.select %138, %136, %143 : vector<16x256xi1>, vector<16x256xf32>
    %c512 = arith.constant 512 : index
    %c0_64 = arith.constant 0 : index
    %145 = vector.load %arg9[%c512, %c0_64] : memref<1024x128xbf16, #tpu.memory_space<vmem>>, vector<256x128xbf16>
    %146 = arith.truncf %144 : vector<16x256xf32> to vector<16x256xbf16>
    %cst_65 = arith.constant dense<0.000000e+00> : vector<16x128xf32>
    %147 = tpu.matmul %146, %145, %cst_65 {dimension_numbers = #tpu.dot_dimension_numbers<[1], [0], [0], [1], [0, 0, 1, 1], [], []>} : vector<16x256xbf16>, vector<256x128xbf16>, vector<16x128xf32> -> vector<16x128xf32>
    %148 = arith.addf %107, %147 : vector<16x128xf32>
    %149 = vector.extract_strided_slice %20 {offsets = [0, 768], sizes = [16, 256], strides = [1, 1]} : vector<16x1024xf32> to vector<16x256xf32>
    %150 = vector.extract_strided_slice %24 {offsets = [0, 3], sizes = [16, 1], strides = [1, 1]} : vector<16x4xf32> to vector<16x1xf32>
    %151 = vector.extract_strided_slice %23 {offsets = [3, 0], sizes = [1, 16], strides = [1, 1]} : vector<4x16xf32> to vector<1x16xf32>
    %152 = vector.broadcast %150 : vector<16x1xf32> to vector<16x16xf32>
    %153 = vector.broadcast %151 : vector<1x16xf32> to vector<16x16xf32>
    %154 = arith.addf %152, %153 : vector<16x16xf32>
    %c3 = arith.constant 3 : index
    %c0_66 = arith.constant 0 : index
    %c0_67 = arith.constant 0 : index
    %155 = vector.load %arg2[%c3, %c0_66, %c0_67] : memref<5x16x16xf32, #tpu.memory_space<vmem>>, vector<1x16x16xf32>
    %156 = vector.shape_cast %155 : vector<1x16x16xf32> to vector<16x16xf32>
    %157 = arith.addf %154, %156 : vector<16x16xf32>
    %cst_68 = arith.constant 0.000000e+00 : f32
    %158 = vector.broadcast %cst_68 : f32 to vector<16x16xf32>
    %159 = arith.cmpf ogt, %157, %158 : vector<16x16xf32>
    %cst_69 = arith.constant 2.000000e-01 : f32
    %160 = vector.broadcast %cst_69 : f32 to vector<16x16xf32>
    %161 = arith.mulf %160, %157 : vector<16x16xf32>
    %162 = arith.select %159, %157, %161 : vector<16x16xi1>, vector<16x16xf32>
    %cst_70 = arith.constant -1.000000e+30 : f32
    %163 = vector.broadcast %cst_70 : f32 to vector<16x16xf32>
    %164 = arith.select %17, %162, %163 : vector<16x16xi1>, vector<16x16xf32>
    %cst_71 = arith.constant dense<0xFF800000> : vector<16xf32>
    %165 = vector.multi_reduction <maximumf>, %164, %cst_71 [1] : vector<16x16xf32> to vector<16xf32>
    %166 = vector.shape_cast %165 : vector<16xf32> to vector<16x1xf32>
    %167 = vector.broadcast %166 : vector<16x1xf32> to vector<16x16xf32>
    %168 = arith.subf %164, %167 : vector<16x16xf32>
    %169 = math.exp %168 : vector<16x16xf32>
    %cst_72 = arith.constant 0.000000e+00 : f32
    %170 = vector.broadcast %cst_72 : f32 to vector<16x16xf32>
    %171 = arith.select %17, %169, %170 : vector<16x16xi1>, vector<16x16xf32>
    %cst_73 = arith.constant dense<0.000000e+00> : vector<16xf32>
    %172 = vector.multi_reduction <add>, %171, %cst_73 [1] : vector<16x16xf32> to vector<16xf32>
    %173 = vector.shape_cast %172 : vector<16xf32> to vector<16x1xf32>
    %174 = tpu.reciprocal %173 {approx = true} : vector<16x1xf32> -> vector<16x1xf32>
    %175 = vector.broadcast %174 : vector<16x1xf32> to vector<16x16xf32>
    %176 = arith.mulf %171, %175 : vector<16x16xf32>
    %cst_74 = arith.constant dense<0.000000e+00> : vector<16x256xf32>
    %177 = tpu.matmul %176, %149, %cst_74 {dimension_numbers = #tpu.dot_dimension_numbers<[1], [0], [0], [1], [0, 0, 1, 1], [], []>} : vector<16x16xf32>, vector<16x256xf32>, vector<16x256xf32> -> vector<16x256xf32>
    %cst_75 = arith.constant 0.000000e+00 : f32
    %178 = vector.broadcast %cst_75 : f32 to vector<16x256xf32>
    %179 = arith.cmpf ogt, %177, %178 : vector<16x256xf32>
    %cst_76 = arith.constant 0.000000e+00 : f32
    %180 = vector.broadcast %cst_76 : f32 to vector<16x256xf32>
    %181 = arith.minimumf %177, %180 : vector<16x256xf32>
    %182 = math.exp %181 : vector<16x256xf32>
    %cst_77 = arith.constant 1.000000e+00 : f32
    %183 = vector.broadcast %cst_77 : f32 to vector<16x256xf32>
    %184 = arith.subf %182, %183 : vector<16x256xf32>
    %185 = arith.select %179, %177, %184 : vector<16x256xi1>, vector<16x256xf32>
    %c768 = arith.constant 768 : index
    %c0_78 = arith.constant 0 : index
    %186 = vector.load %arg9[%c768, %c0_78] : memref<1024x128xbf16, #tpu.memory_space<vmem>>, vector<256x128xbf16>
    %187 = arith.truncf %185 : vector<16x256xf32> to vector<16x256xbf16>
    %cst_79 = arith.constant dense<0.000000e+00> : vector<16x128xf32>
    %188 = tpu.matmul %187, %186, %cst_79 {dimension_numbers = #tpu.dot_dimension_numbers<[1], [0], [0], [1], [0, 0, 1, 1], [], []>} : vector<16x256xbf16>, vector<256x128xbf16>, vector<16x128xf32> -> vector<16x128xf32>
    %189 = arith.addf %148, %188 : vector<16x128xf32>
    %c14 = arith.constant 14 : index
    %c0_80 = arith.constant 0 : index
    %190 = vector.load %arg14[%c14, %c0_80] : memref<24x512xf32, #tpu.memory_space<vmem>>, vector<1x128xf32>
    %c15 = arith.constant 15 : index
    %c0_81 = arith.constant 0 : index
    %191 = vector.load %arg14[%c15, %c0_81] : memref<24x512xf32, #tpu.memory_space<vmem>>, vector<1x128xf32>
    %cst_82 = arith.constant dense<0.000000e+00> : vector<1x16xf32>
    %192 = tpu.matmul %190, %189, %cst_82 {dimension_numbers = #tpu.dot_dimension_numbers<[1], [1], [0], [0], [0, 0, 1, 0], [], []>} : vector<1x128xf32>, vector<16x128xf32>, vector<1x16xf32> -> vector<1x16xf32>
    %cst_83 = arith.constant dense<0.000000e+00> : vector<16x1xf32>
    %193 = tpu.matmul %189, %191, %cst_83 {dimension_numbers = #tpu.dot_dimension_numbers<[1], [1], [0], [0], [0, 0, 1, 0], [], []>} : vector<16x128xf32>, vector<1x128xf32>, vector<16x1xf32> -> vector<16x1xf32>
    %194 = vector.broadcast %193 : vector<16x1xf32> to vector<16x16xf32>
    %195 = vector.broadcast %192 : vector<1x16xf32> to vector<16x16xf32>
    %196 = arith.addf %194, %195 : vector<16x16xf32>
    %c4 = arith.constant 4 : index
    %c0_84 = arith.constant 0 : index
    %c0_85 = arith.constant 0 : index
    %197 = vector.load %arg2[%c4, %c0_84, %c0_85] : memref<5x16x16xf32, #tpu.memory_space<vmem>>, vector<1x16x16xf32>
    %198 = vector.shape_cast %197 : vector<1x16x16xf32> to vector<16x16xf32>
    %199 = arith.addf %196, %198 : vector<16x16xf32>
    %cst_86 = arith.constant 0.000000e+00 : f32
    %200 = vector.broadcast %cst_86 : f32 to vector<16x16xf32>
    %201 = arith.cmpf ogt, %199, %200 : vector<16x16xf32>
    %cst_87 = arith.constant 2.000000e-01 : f32
    %202 = vector.broadcast %cst_87 : f32 to vector<16x16xf32>
    %203 = arith.mulf %202, %199 : vector<16x16xf32>
    %204 = arith.select %201, %199, %203 : vector<16x16xi1>, vector<16x16xf32>
    %cst_88 = arith.constant -1.000000e+30 : f32
    %205 = vector.broadcast %cst_88 : f32 to vector<16x16xf32>
    %206 = arith.select %17, %204, %205 : vector<16x16xi1>, vector<16x16xf32>
    %cst_89 = arith.constant dense<0xFF800000> : vector<16xf32>
    %207 = vector.multi_reduction <maximumf>, %206, %cst_89 [1] : vector<16x16xf32> to vector<16xf32>
    %208 = vector.shape_cast %207 : vector<16xf32> to vector<16x1xf32>
    %209 = vector.broadcast %208 : vector<16x1xf32> to vector<16x16xf32>
    %210 = arith.subf %206, %209 : vector<16x16xf32>
    %211 = math.exp %210 : vector<16x16xf32>
    %cst_90 = arith.constant 0.000000e+00 : f32
    %212 = vector.broadcast %cst_90 : f32 to vector<16x16xf32>
    %213 = arith.select %17, %211, %212 : vector<16x16xi1>, vector<16x16xf32>
    %cst_91 = arith.constant dense<0.000000e+00> : vector<16xf32>
    %214 = vector.multi_reduction <add>, %213, %cst_91 [1] : vector<16x16xf32> to vector<16xf32>
    %215 = vector.shape_cast %214 : vector<16xf32> to vector<16x1xf32>
    %216 = tpu.reciprocal %215 {approx = true} : vector<16x1xf32> -> vector<16x1xf32>
    %217 = vector.broadcast %216 : vector<16x1xf32> to vector<16x16xf32>
    %218 = arith.mulf %213, %217 : vector<16x16xf32>
    %cst_92 = arith.constant dense<0.000000e+00> : vector<16x128xf32>
    %219 = tpu.matmul %218, %189, %cst_92 {dimension_numbers = #tpu.dot_dimension_numbers<[1], [0], [0], [1], [0, 0, 1, 1], [], []>} : vector<16x16xf32>, vector<16x128xf32>, vector<16x128xf32> -> vector<16x128xf32>
    %c0_93 = arith.constant 0 : index
    %c0_94 = arith.constant 0 : index
    %220 = vector.load %arg3[%c0_93, %c0_94] : memref<16x16xf32, #tpu.memory_space<vmem>>, vector<16x16xf32>
    %cst_95 = arith.constant dense<0.000000e+00> : vector<16x128xf32>
    %221 = tpu.matmul %220, %219, %cst_95 {dimension_numbers = #tpu.dot_dimension_numbers<[1], [0], [0], [1], [0, 0, 1, 1], [], []>} : vector<16x16xf32>, vector<16x128xf32>, vector<16x128xf32> -> vector<16x128xf32>
    %222 = arith.truncf %221 : vector<16x128xf32> to vector<16x128xbf16>
    %c0_96 = arith.constant 0 : index
    %c0_97 = arith.constant 0 : index
    %223 = vector.load %arg10[%c0_96, %c0_97] : memref<128x128xbf16, #tpu.memory_space<vmem>>, vector<128x128xbf16>
    %cst_98 = arith.constant dense<0.000000e+00> : vector<16x128xf32>
    %224 = tpu.matmul %222, %223, %cst_98 {dimension_numbers = #tpu.dot_dimension_numbers<[1], [0], [0], [1], [0, 0, 1, 1], [], []>} : vector<16x128xbf16>, vector<128x128xbf16>, vector<16x128xf32> -> vector<16x128xf32>
    %c0_99 = arith.constant 0 : index
    %c0_100 = arith.constant 0 : index
    %225 = vector.load %arg4[%c0_99, %c0_100] : memref<16x2xf32, #tpu.memory_space<vmem>>, vector<16x2xf32>
    %c16 = arith.constant 16 : index
    %c0_101 = arith.constant 0 : index
    %226 = vector.load %arg14[%c16, %c0_101] : memref<24x512xf32, #tpu.memory_space<vmem>>, vector<2x128xf32>
    %cst_102 = arith.constant dense<0.000000e+00> : vector<16x128xf32>
    %227 = tpu.matmul %225, %226, %cst_102 {dimension_numbers = #tpu.dot_dimension_numbers<[1], [0], [0], [1], [0, 0, 1, 1], [], []>} : vector<16x2xf32>, vector<2x128xf32>, vector<16x128xf32> -> vector<16x128xf32>
    %228 = arith.addf %224, %227 : vector<16x128xf32>
    %c2_103 = arith.constant 2 : index
    %c0_104 = arith.constant 0 : index
    %229 = vector.load %arg14[%c2_103, %c0_104] : memref<24x512xf32, #tpu.memory_space<vmem>>, vector<1x128xf32>
    %230 = vector.broadcast %229 : vector<1x128xf32> to vector<16x128xf32>
    %231 = arith.addf %228, %230 : vector<16x128xf32>
    %cst_105 = arith.constant 0.000000e+00 : f32
    %232 = vector.broadcast %cst_105 : f32 to vector<16x128xf32>
    %233 = arith.maximumf %231, %232 : vector<16x128xf32>
    %c0_106 = arith.constant 0 : index
    %c0_107 = arith.constant 0 : index
    %234 = vector.load %arg5[%c0_106, %c0_107] : memref<16x2048xbf16, #tpu.memory_space<vmem>>, vector<16x2048xbf16>
    %c0_108 = arith.constant 0 : index
    %c0_109 = arith.constant 0 : index
    %235 = vector.load %arg11[%c0_108, %c0_109] : memref<2048x128xbf16, #tpu.memory_space<vmem>>, vector<2048x128xbf16>
    %cst_110 = arith.constant dense<0.000000e+00> : vector<16x128xf32>
    %236 = tpu.matmul %234, %235, %cst_110 {dimension_numbers = #tpu.dot_dimension_numbers<[1], [0], [0], [1], [0, 0, 1, 1], [], []>} : vector<16x2048xbf16>, vector<2048x128xbf16>, vector<16x128xf32> -> vector<16x128xf32>
    %c3_111 = arith.constant 3 : index
    %c0_112 = arith.constant 0 : index
    %237 = vector.load %arg14[%c3_111, %c0_112] : memref<24x512xf32, #tpu.memory_space<vmem>>, vector<1x128xf32>
    %238 = vector.broadcast %237 : vector<1x128xf32> to vector<16x128xf32>
    %239 = arith.addf %236, %238 : vector<16x128xf32>
    %cst_113 = arith.constant 0.000000e+00 : f32
    %240 = vector.broadcast %cst_113 : f32 to vector<16x128xf32>
    %241 = arith.maximumf %239, %240 : vector<16x128xf32>
    %242 = arith.truncf %233 : vector<16x128xf32> to vector<16x128xbf16>
    %c0_114 = arith.constant 0 : index
    %c0_115 = arith.constant 0 : index
    %243 = vector.load %arg12[%c0_114, %c0_115] : memref<128x256xbf16, #tpu.memory_space<vmem>>, vector<128x256xbf16>
    %cst_116 = arith.constant dense<0.000000e+00> : vector<16x256xf32>
    %244 = tpu.matmul %242, %243, %cst_116 {dimension_numbers = #tpu.dot_dimension_numbers<[1], [0], [0], [1], [0, 0, 1, 1], [], []>} : vector<16x128xbf16>, vector<128x256xbf16>, vector<16x256xf32> -> vector<16x256xf32>
    %245 = arith.truncf %241 : vector<16x128xf32> to vector<16x128xbf16>
    %c0_117 = arith.constant 0 : index
    %c0_118 = arith.constant 0 : index
    %246 = vector.load %arg13[%c0_117, %c0_118] : memref<128x256xbf16, #tpu.memory_space<vmem>>, vector<128x256xbf16>
    %cst_119 = arith.constant dense<0.000000e+00> : vector<16x256xf32>
    %247 = tpu.matmul %245, %246, %cst_119 {dimension_numbers = #tpu.dot_dimension_numbers<[1], [0], [0], [1], [0, 0, 1, 1], [], []>} : vector<16x128xbf16>, vector<128x256xbf16>, vector<16x256xf32> -> vector<16x256xf32>
    %248 = arith.addf %244, %247 : vector<16x256xf32>
    %c4_120 = arith.constant 4 : index
    %c0_121 = arith.constant 0 : index
    %249 = vector.load %arg14[%c4_120, %c0_121] : memref<24x512xf32, #tpu.memory_space<vmem>>, vector<1x256xf32>
    %250 = vector.broadcast %249 : vector<1x256xf32> to vector<16x256xf32>
    %251 = arith.addf %248, %250 : vector<16x256xf32>
    %cst_122 = arith.constant 0.000000e+00 : f32
    %252 = vector.broadcast %cst_122 : f32 to vector<16x256xf32>
    %253 = arith.maximumf %251, %252 : vector<16x256xf32>
    %c18 = arith.constant 18 : index
    %c0_123 = arith.constant 0 : index
    %254 = vector.load %arg14[%c18, %c0_123] : memref<24x512xf32, #tpu.memory_space<vmem>>, vector<2x256xf32>
    %cst_124 = arith.constant dense<0.000000e+00> : vector<16x2xf32>
    %255 = tpu.matmul %253, %254, %cst_124 {dimension_numbers = #tpu.dot_dimension_numbers<[1], [1], [0], [0], [0, 0, 1, 0], [], []>} : vector<16x256xf32>, vector<2x256xf32>, vector<16x2xf32> -> vector<16x2xf32>
    %c5 = arith.constant 5 : index
    %c0_125 = arith.constant 0 : index
    %256 = vector.load %arg14[%c5, %c0_125] : memref<24x512xf32, #tpu.memory_space<vmem>>, vector<1x2xf32>
    %257 = vector.broadcast %256 : vector<1x2xf32> to vector<16x2xf32>
    %258 = arith.addf %255, %257 : vector<16x2xf32>
    %c0_126 = arith.constant 0 : index
    %c0_127 = arith.constant 0 : index
    %259 = vector.load %arg15[%c0_126, %c0_127] : memref<16x2xf32, #tpu.memory_space<vmem>>, vector<16x2xf32>
    tpu.vector_store %arg15[%c0_126, %c0_127], %258 {strides = array<i32>} : memref<16x2xf32, #tpu.memory_space<vmem>>, vector<16x2xf32>,
    return
  }
}

</mosaic_0001>

<bundles_post_ra>
// kernel: polymer_gnn_forward.1
= control target key start
LH: loop header
LB: loop body
LE: loop exit
PB: predicated region body
PF: predicated region fallthrough
CT: control target
= control target key end

     0   :  { %20 = vsyncpa [#allocation3], 0  ;;  %s8895_s0 = inlined_call_operand.vmem [shape: f32[16,128], index: 0, kind: input, shape index: {}]   ;;  %s8896_s1 = inlined_call_operand.vmem [shape: f32[16,16], index: 1, kind: input, shape index: {}]   ;;  %s8897_s2 = inlined_call_operand.vmem [shape: f32[5,16,16], index: 2, kind: input, shape index: {}]   ;;  %s8898_s3 = inlined_call_operand.vmem [shape: f32[16,16], index: 3, kind: input, shape index: {}]   ;;  %s8899_s4 = inlined_call_operand.vmem [shape: f32[16,2], index: 4, kind: input, shape index: {}]   ;;  %s8900_s5 = inlined_call_operand.vmem [shape: bf16[16,2048], index: 5, kind: input, shape index: {}]   ;;  %s8901_s6 = inlined_call_operand.hbm [shape: bf16[128,512], index: 6, kind: input, shape index: {}]   ;;  %s8902_s7 = inlined_call_operand.vmem [shape: bf16[512,256], index: 7, kind: input, shape index: {}]   ;;  %s8903_s8 = inlined_call_operand.vmem [shape: bf16[256,1024], index: 8, kind: input, shape index: {}]   ;;  %s8904_s9 = inlined_call_operand.vmem [shape: bf16[1024,128], index: 9, kind: input, shape index: {}]   ;;  %s8905_s10 = inlined_call_operand.hbm [shape: bf16[128,128], index: 10, kind: input, shape index: {}]   ;;  %s8906_s11 = inlined_call_operand.vmem [shape: bf16[2048,128], index: 11, kind: input, shape index: {}]   ;;  %s8907_s12 = inlined_call_operand.hbm [shape: bf16[128,256], index: 12, kind: input, shape index: {}]   ;;  %s8908_s13 = inlined_call_operand.hbm [shape: bf16[128,256], index: 13, kind: input, shape index: {}]   ;;  %s8909_s14 = inlined_call_operand.vmem [shape: f32[24,512], index: 14, kind: input, shape index: {}]   ;;  %s8910_s15 = inlined_call_operand.vmem [shape: f32[16,2], index: 15, kind: output, shape index: {}]  }
   0x1   :  { %21 = vsyncpa [#allocation5], 0 }
   0x2   :  { %22 = vsyncpa [#allocation8], 0  ;;  %s7144_s18 = smov [#allocation4]   ;;  %s7050_s22 = scalar_lea.hbm %s8905_s10, 1024 }
   0x3   :  { %s58_s19 = sshll.u32 %s7144_s18, 4  ;;  %p7051_p0 = scmp.ne.s32.totalorder %s8905_s10, %s7050_s22  ;;  %s59_s19 = int_to_ptr.vmem [resolvable:$true] %s58_s19 }
   0x4   :  { %p7054_p1 = scmp.lt.u32.totalorder %s7050_s22, %s8905_s10 }
   0x6   :  { %p7056_p2 = pnand %p7054_p1, %p7051_p0 }
   0x8   :  { %7059 = shalt.err (!%p7056_p2)
}
   0x9   :  { %s7060_s27 = scalar_lea.vmem %s59_s19, 1024  ;;  %p7065_p4 = scmp.lt.s32.totalorder %s59_s19, %s59_s19 }
   0xa   :  { %p7061_p3 = scmp.ne.s32.totalorder %s59_s19, %s7060_s27  ;;  %p7066_p5 = scmp.lt.s32.totalorder %s7060_s27, %s7060_s27 }
   0xc   :  { %p7067_p6 = por %p7066_p5, %p7065_p4 }
   0xe   :  { %p7068_p7 = pnand %p7067_p6, %p7061_p3 }
  0x10   :  { %7071 = shalt.err (!%p7068_p7)
}
  0x11   :  { %s7145_s28 = smov 64   ;;  %s7146_s29 = smov 4  }
  0x12   :  { %64 = dma.hbm_to_vmem [thread:$0]  %s8905_s10, 1024, %s59_s19, [#allocation5], %s7145_s28, %s7145_s28, %s7146_s29  }
  0x13   :  { %s7147_s17 = smov [#allocation2]   ;;  %s7072_s22 = scalar_lea.hbm %s8901_s6, 4096 }
  0x14   :  { %s40_s18 = sshll.u32 %s7147_s17, 4  ;;  %p7073_p8 = scmp.ne.s32.totalorder %s8901_s6, %s7072_s22  ;;  %s41_s18 = int_to_ptr.vmem [resolvable:$true] %s40_s18 }
  0x15   :  { %p7076_p9 = scmp.lt.u32.totalorder %s7072_s22, %s8901_s6 }
  0x17   :  { %p7078_p10 = pnand %p7076_p9, %p7073_p8 }
  0x19   :  { %7081 = shalt.err (!%p7078_p10)
}
  0x1a   :  { %s7082_s27 = scalar_lea.vmem %s41_s18, 4096  ;;  %p7087_p12 = scmp.lt.s32.totalorder %s41_s18, %s41_s18 }
  0x1b   :  { %p7083_p11 = scmp.ne.s32.totalorder %s41_s18, %s7082_s27  ;;  %p7088_p13 = scmp.lt.s32.totalorder %s7082_s27, %s7082_s27 }
  0x1d   :  { %p7089_p0 = por %p7088_p13, %p7087_p12 }
  0x1f   :  { %p7090_p1 = pnand %p7089_p0, %p7083_p11 }
  0x21   :  { %7093 = shalt.err (!%p7090_p1)
}
  0x22   :  { %s7148_s10 = smov 256   ;;  %s7149_s19 = smov 16  }
  0x23   :  { %46 = dma.hbm_to_vmem [thread:$0]  %s8901_s6, 4096, %s41_s18, [#allocation3], %s7148_s10, %s7148_s10, %s7149_s19  }
  0x24   :  { %s7150_s30 = smov [#allocation6]   ;;  %s7094_s21 = scalar_lea.hbm %s8907_s12, 2048 }
  0x25   :  { %s72_s16 = sshll.u32 %s7150_s30, 4  ;;  %p7095_p2 = scmp.ne.s32.totalorder %s8907_s12, %s7094_s21  ;;  %s73_s16 = int_to_ptr.vmem [resolvable:$true] %s72_s16 }
  0x26   :  { %p7098_p3 = scmp.lt.u32.totalorder %s7094_s21, %s8907_s12 }
  0x28   :  { %p7100_p4 = pnand %p7098_p3, %p7095_p2 }
  0x2a   :  { %7103 = shalt.err (!%p7100_p4)
}
  0x2b   :  { %s7104_s26 = scalar_lea.vmem %s73_s16, 2048  ;;  %p7109_p6 = scmp.lt.s32.totalorder %s73_s16, %s73_s16 }
  0x2c   :  { %p7105_p5 = scmp.ne.s32.totalorder %s73_s16, %s7104_s26  ;;  %p7110_p7 = scmp.lt.s32.totalorder %s7104_s26, %s7104_s26 }
  0x2e   :  { %p7111_p8 = por %p7110_p7, %p7109_p6 }
  0x30   :  { %p7112_p9 = pnand %p7111_p8, %p7105_p5 }
  0x32   :  { %7115 = shalt.err (!%p7112_p9)
}
  0x33   :  { %s7151_s6 = smov 128   ;;  %s7152_s18 = smov 8  }
  0x34   :  { %78 = dma.hbm_to_vmem [thread:$0]  %s8907_s12, 2048, %s73_s16, [#allocation5], %s7151_s6, %s7151_s6, %s7152_s18  }
  0x35   :  { %s7153_s19 = smov [#allocation7]   ;;  %s7116_s17 = scalar_lea.hbm %s8908_s13, 2048 }
  0x36   :  { %s84_s28 = sshll.u32 %s7153_s19, 4  ;;  %p7117_p10 = scmp.ne.s32.totalorder %s8908_s13, %s7116_s17  ;;  %s85_s28 = int_to_ptr.vmem [resolvable:$true] %s84_s28 }
  0x37   :  { %p7120_p11 = scmp.lt.u32.totalorder %s7116_s17, %s8908_s13 }
  0x39   :  { %p7122_p12 = pnand %p7120_p11, %p7117_p10 }
  0x3b   :  { %7125 = shalt.err (!%p7122_p12)
}
  0x3c   :  { %s7126_s24 = scalar_lea.vmem %s85_s28, 2048  ;;  %p7131_p0 = scmp.lt.s32.totalorder %s85_s28, %s85_s28 }
  0x3d   :  { %p7127_p13 = scmp.ne.s32.totalorder %s85_s28, %s7126_s24  ;;  %p7132_p1 = scmp.lt.s32.totalorder %s7126_s24, %s7126_s24 }
  0x3f   :  { %p7133_p2 = por %p7132_p1, %p7131_p0 }
  0x41   :  { %p7134_p3 = pnand %p7133_p2, %p7127_p13 }
  0x43   :  { %7137 = shalt.err (!%p7134_p3)
}
  0x44   :  { %90 = dma.hbm_to_vmem [thread:$0]  %s8908_s13, 2048, %s85_s28, [#allocation8], %s7151_s6, %s7151_s6, %s7152_s18  }
  0x45   :  { %7138 = dma.done.wait [#allocation3], 4096  }
  0x46   :  { %7139 = vsyncadd [#allocation3], 4294963200 }
  0x47   :  { %7140 = dma.done.wait [#allocation5], 3072  }
  0x48   :  { %7141 = vsyncadd [#allocation5], 4294964224 }
  0x49   :  { %7142 = dma.done.wait [#allocation8], 2048  }
  0x4a   :  { %7143 = vsyncadd [#allocation8], 4294965248  ;;  %v7154_v0 = vmov 0   ;;  %v6586_v1 = vld [vmem:[#allocation2 + $0x4] ss:$16 sps:$4 sm:$0xff]   ;;  %v107_v27 = vld [vmem:[%s8895_s0 + $0x8] sm:$0xff] }
  0x4b   :  { %355 = vmatprep.mubr.bf16.mxu0 %v7154_v0  ;;  %398 = vmatprep.mubr.bf16.mxu1 %v7154_v0  ;;  %v6588_v2 = vld [vmem:[#allocation2] ss:$16 sps:$4 sm:$0xff]   ;;  %v6589_v3 = vld [vmem:[#allocation2 + $0x24] ss:$16 sps:$4 sm:$0xff]   ;;  %v6610_v10 = vld [vmem:[#allocation2 + $0xc] ss:$16 sps:$4 sm:$0xff]  }
  0x4c   :  { %6577 = vset.pattern.permute.xlu0 %v7154_v0  ;;  %6579 = vset.pattern.permute.xlu1 %v7154_v0  ;;  %v6591_v4 = vld [vmem:[#allocation2 + $0x20] ss:$16 sps:$4 sm:$0xff]   ;;  %v6592_v5 = vld [vmem:[#allocation2 + $0x44] ss:$16 sps:$4 sm:$0xff]   ;;  %v6612_v11 = vld [vmem:[#allocation2 + $0x8] ss:$16 sps:$4 sm:$0xff]  }
  0x4d   :  { %323 = vmatprep.subr.bf16.mxu0 %v6586_v1  ;;  %v6594_v6 = vld [vmem:[#allocation2 + $0x40] ss:$16 sps:$4 sm:$0xff]   ;;  %v6595_v7 = vld [vmem:[#allocation2 + $0x64] ss:$16 sps:$4 sm:$0xff]   ;;  %v6613_v12 = vld [vmem:[#allocation2 + $0x2c] ss:$16 sps:$4 sm:$0xff]   ;;  %366 = vmatprep.subr.bf16.mxu1 %v6610_v10 }
  0x4e   :  { %324 = vmatpush1.bf16.msra.mxu0 %v6588_v2  ;;  %v6597_v8 = vld [vmem:[#allocation2 + $0x60] ss:$16 sps:$4 sm:$0xff]   ;;  %v6598_v9 = vld [vmem:[#allocation2 + $0x84] ss:$16 sps:$4 sm:$0xff]   ;;  %367 = vmatpush1.bf16.msra.mxu1 %v6612_v11  ;;  %v6615_v14 = vld [vmem:[#allocation2 + $0x28] ss:$16 sps:$4 sm:$0xff]  }
  0x4f   :  { %325 = vmatprep.subr.bf16.mxu0 %v6589_v3  ;;  %v6600_v13 = vld [vmem:[#allocation2 + $0x80] ss:$16 sps:$4 sm:$0xff]   ;;  %v6601_v15 = vld [vmem:[#allocation2 + $0xa4] ss:$16 sps:$4 sm:$0xff]   ;;  %368 = vmatprep.subr.bf16.mxu1 %v6613_v12  ;;  %v6616_v16 = vld [vmem:[#allocation2 + $0x4c] ss:$16 sps:$4 sm:$0xff]  }
  0x50   :  { %v6603_v17 = vld [vmem:[#allocation2 + $0xa0] ss:$16 sps:$4 sm:$0xff]   ;;  %v6618_v18 = vld [vmem:[#allocation2 + $0x48] ss:$16 sps:$4 sm:$0xff]   ;;  %v6604_v19 = vld [vmem:[#allocation2 + $0xc4] ss:$16 sps:$4 sm:$0xff]  }
  0x51   :  { %v6619_v20 = vld [vmem:[#allocation2 + $0x6c] ss:$16 sps:$4 sm:$0xff]   ;;  %v6606_v21 = vld [vmem:[#allocation2 + $0xc0] ss:$16 sps:$4 sm:$0xff]   ;;  %v6621_v22 = vld [vmem:[#allocation2 + $0x68] ss:$16 sps:$4 sm:$0xff]  }
  0x52   :  { %326 = vmatpush1.bf16.msra.mxu0 %v6591_v4  ;;  %369 = vmatpush1.bf16.msra.mxu1 %v6615_v14  ;;  %v6607_v23 = vld [vmem:[#allocation2 + $0xe4] ss:$16 sps:$4 sm:$0xff]   ;;  %v6622_v24 = vld [vmem:[#allocation2 + $0x8c] ss:$16 sps:$4 sm:$0xff]   ;;  %v6609_v25 = vld [vmem:[#allocation2 + $0xe0] ss:$16 sps:$4 sm:$0xff]  }
  0x53   :  { %327 = vmatprep.subr.bf16.mxu0 %v6592_v5  ;;  %370 = vmatprep.subr.bf16.mxu1 %v6616_v16  ;;  %v106_v26 = vld [vmem:[%s8895_s0] sm:$0xff]  ;;  %v6624_v28 = vld [vmem:[#allocation2 + $0x88] ss:$16 sps:$4 sm:$0xff]   ;;  %v6625_v29 = vld [vmem:[#allocation2 + $0xac] ss:$16 sps:$4 sm:$0xff]   ;;  %vm1860_vm0 = vcmask 1041408  }
  0x54   :  { %v6636_v30 = vld [vmem:[%s8902_s7 + $0x4] ss:$8 sps:$4 sm:$0xff]   ;;  %v108_v31 = vpack.c.bf16 %v107_v27, %v106_v26  ;;  %v6627_v32 = vld [vmem:[#allocation2 + $0xa8] ss:$16 sps:$4 sm:$0xff]   ;;  %v6639_v35 = vld [vmem:[%s8902_s7 + $0x14] ss:$8 sps:$4 sm:$0xff]  }
  0x55   :  { %v6634_v33 = vld [vmem:[%s8902_s7] ss:$8 sps:$4 sm:$0xff]   ;;  %v6628_v34 = vld [vmem:[#allocation2 + $0xcc] ss:$16 sps:$4 sm:$0xff]   ;;  %v6637_v37 = vld [vmem:[%s8902_s7 + $0x10] ss:$8 sps:$4 sm:$0xff]  }
  0x56   :  { %328 = vmatpush1.bf16.msra.mxu0 %v6594_v6  ;;  %371 = vmatpush1.bf16.msra.mxu1 %v6618_v18  ;;  %v6630_v36 = vld [vmem:[#allocation2 + $0xc8] ss:$16 sps:$4 sm:$0xff]   ;;  %v6631_v38 = vld [vmem:[#allocation2 + $0xec] ss:$16 sps:$4 sm:$0xff]   ;;  %v910_v6 = vld [vmem:[%s8903_s8] sm:$0xff]  ;;  %vm2048_vm3 = vcmask 130048  }
  0x57   :  { %329 = vmatprep.subr.bf16.mxu0 %v6595_v7  ;;  %372 = vmatprep.subr.bf16.mxu1 %v6619_v20  ;;  %v6642_v39 = vld [vmem:[%s8902_s7 + $0x24] ss:$8 sps:$4 sm:$0xff]   ;;  %v6633_v40 = vld [vmem:[#allocation2 + $0xe8] ss:$16 sps:$4 sm:$0xff]   ;;  %v6645_v42 = vld [vmem:[%s8902_s7 + $0x34] ss:$8 sps:$4 sm:$0xff]  }
  0x58   :  { %v6640_v41 = vld [vmem:[%s8902_s7 + $0x20] ss:$8 sps:$4 sm:$0xff]   ;;  %v6643_v43 = vld [vmem:[%s8902_s7 + $0x30] ss:$8 sps:$4 sm:$0xff]   ;;  %v6648_v44 = vld [vmem:[%s8902_s7 + $0x44] ss:$8 sps:$4 sm:$0xff]  }
  0x59   :  { %v6646_v45 = vld [vmem:[%s8902_s7 + $0x40] ss:$8 sps:$4 sm:$0xff]   ;;  %v6651_v46 = vld [vmem:[%s8902_s7 + $0x54] ss:$8 sps:$4 sm:$0xff]   ;;  %v6649_v47 = vld [vmem:[%s8902_s7 + $0x50] ss:$8 sps:$4 sm:$0xff]  }
  0x5a   :  { %330 = vmatpush1.bf16.msra.mxu0 %v6597_v8  ;;  %373 = vmatpush1.bf16.msra.mxu1 %v6621_v22  ;;  %v6654_v48 = vld [vmem:[%s8902_s7 + $0x64] ss:$8 sps:$4 sm:$0xff]   ;;  %v6652_v49 = vld [vmem:[%s8902_s7 + $0x60] ss:$8 sps:$4 sm:$0xff]   ;;  %v6657_v50 = vld [vmem:[%s8902_s7 + $0x74] ss:$8 sps:$4 sm:$0xff]  }
  0x5b   :  { %331 = vmatprep.subr.bf16.mxu0 %v6598_v9  ;;  %374 = vmatprep.subr.bf16.mxu1 %v6622_v24  ;;  %v6655_v51 = vld [vmem:[%s8902_s7 + $0x70] ss:$8 sps:$4 sm:$0xff]   ;;  %v6660_v52 = vld [vmem:[%s8902_s7 + $0x84] ss:$8 sps:$4 sm:$0xff]   ;;  %v6658_v53 = vld [vmem:[%s8902_s7 + $0x80] ss:$8 sps:$4 sm:$0xff]  }
  0x5c   :  { %v6663_v54 = vld [vmem:[%s8902_s7 + $0x94] ss:$8 sps:$4 sm:$0xff]   ;;  %v6661_v55 = vld [vmem:[%s8902_s7 + $0x90] ss:$8 sps:$4 sm:$0xff]   ;;  %v6666_v56 = vld [vmem:[%s8902_s7 + $0xa4] ss:$8 sps:$4 sm:$0xff]  }
  0x5d   :  { %v6664_v57 = vld [vmem:[%s8902_s7 + $0xa0] ss:$8 sps:$4 sm:$0xff]   ;;  %v6669_v58 = vld [vmem:[%s8902_s7 + $0xb4] ss:$8 sps:$4 sm:$0xff]   ;;  %v6667_v59 = vld [vmem:[%s8902_s7 + $0xb0] ss:$8 sps:$4 sm:$0xff]  }
  0x5e   :  { %332 = vmatpush1.bf16.msra.mxu0 %v6600_v13  ;;  %375 = vmatpush1.bf16.msra.mxu1 %v6624_v28  ;;  %v6672_v60 = vld [vmem:[%s8902_s7 + $0xc4] ss:$8 sps:$4 sm:$0xff]   ;;  %v6670_v61 = vld [vmem:[%s8902_s7 + $0xc0] ss:$8 sps:$4 sm:$0xff]   ;;  %v6675_v62 = vld [vmem:[%s8902_s7 + $0xd4] ss:$8 sps:$4 sm:$0xff]  }
  0x5f   :  { %333 = vmatprep.subr.bf16.mxu0 %v6601_v15  ;;  %376 = vmatprep.subr.bf16.mxu1 %v6625_v29  ;;  %v6673_v63 = vld [vmem:[%s8902_s7 + $0xd0] ss:$8 sps:$4 sm:$0xff]   ;;  %v6678_v1 = vld [vmem:[%s8902_s7 + $0xe4] ss:$8 sps:$4 sm:$0xff]   ;;  %v6676_v2 = vld [vmem:[%s8902_s7 + $0xe0] ss:$8 sps:$4 sm:$0xff]  }
  0x60   :  { %v6681_v3 = vld [vmem:[%s8902_s7 + $0xf4] ss:$8 sps:$4 sm:$0xff]   ;;  %v6679_v4 = vld [vmem:[%s8902_s7 + $0xf0] ss:$8 sps:$4 sm:$0xff]   ;;  %v6684_v5 = vld [vmem:[%s8902_s7 + $0x104] ss:$8 sps:$4 sm:$0xff]  }
  0x61   :  { %v914_v7 = vld [vmem:[%s8903_s8 + $0x20] sm:$0xff] }
  0x62   :  { %334 = vmatpush1.bf16.msra.mxu0 %v6603_v17  ;;  %377 = vmatpush1.bf16.msra.mxu1 %v6627_v32  ;;  %v5768_v8 = vcombine.low %v910_v6, %v914_v7  ;;  %v5769_v9 = vcombine.high %v910_v6, %v914_v7  ;;  %v918_v10 = vld [vmem:[%s8903_s8 + $0x40] sm:$0xff] }
  0x63   :  { %335 = vmatprep.subr.bf16.mxu0 %v6604_v19  ;;  %378 = vmatprep.subr.bf16.mxu1 %v6628_v34  ;;  %v922_v11 = vld [vmem:[%s8903_s8 + $0x60] sm:$0xff] }
  0x64   :  { %v5776_v12 = vcombine.low %v918_v10, %v922_v11  ;;  %v5777_v13 = vcombine.high %v918_v10, %v922_v11  ;;  %v926_v14 = vld [vmem:[%s8903_s8 + $0x80] sm:$0xff] }
  0x65   :  { %v930_v15 = vld [vmem:[%s8903_s8 + $0xa0] sm:$0xff] }
  0x66   :  { %336 = vmatpush1.bf16.msra.mxu0 %v6606_v21  ;;  %379 = vmatpush1.bf16.msra.mxu1 %v6630_v36  ;;  %v5784_v16 = vcombine.low %v926_v14, %v930_v15  ;;  %v5785_v17 = vcombine.high %v926_v14, %v930_v15  ;;  %v934_v18 = vld [vmem:[%s8903_s8 + $0xc0] sm:$0xff] }
  0x67   :  { %337 = vmatprep.subr.bf16.mxu0 %v6607_v23  ;;  %380 = vmatprep.subr.bf16.mxu1 %v6631_v38  ;;  %v938_v19 = vld [vmem:[%s8903_s8 + $0xe0] sm:$0xff] }
  0x68   :  { %v5792_v20 = vcombine.low %v934_v18, %v938_v19  ;;  %v5793_v21 = vcombine.high %v934_v18, %v938_v19  ;;  %v942_v22 = vld [vmem:[%s8903_s8 + $0x100] sm:$0xff] }
  0x69   :  { %v946_v23 = vld [vmem:[%s8903_s8 + $0x120] sm:$0xff] }
  0x6a   :  { %338 = vmatpush1.bf16.msra.mxu0 %v6609_v25  ;;  %381 = vmatpush1.bf16.msra.mxu1 %v6633_v40  ;;  %v5800_v24 = vcombine.low %v942_v22, %v946_v23  ;;  %v5801_v25 = vcombine.high %v942_v22, %v946_v23  ;;  %v950_v26 = vld [vmem:[%s8903_s8 + $0x140] sm:$0xff]  ;;  %v6687_v23 = vld [vmem:[%s8902_s7 + $0x114] ss:$8 sps:$4 sm:$0xff]  }
  0x6b   :  { %818 = vmatprep.subr.bf16.mxu0 %v6636_v30  ;;  %1678 = vmatprep.subr.bf16.mxu1 %v5769_v9  ;;  %v954_v27 = vld [vmem:[%s8903_s8 + $0x160] sm:$0xff] }
  0x6c   :  { %v5808_v28 = vcombine.low %v950_v26, %v954_v27  ;;  %v5809_v29 = vcombine.high %v950_v26, %v954_v27  ;;  %v958_v30 = vld [vmem:[%s8903_s8 + $0x180] sm:$0xff]  ;;  %v6685_v26 = vld [vmem:[%s8902_s7 + $0x110] ss:$8 sps:$4 sm:$0xff]  }
  0x6d   :  { %356 = vmatmul.mubr.bf16.vlgmr.msra.gmra.mrb[0].mxu0 %v108_v31  ;;  %399 = vmatmul.mubr.bf16.vlgmr.msra.gmra.mrb[0].mxu1 %v108_v31  ;;  %v962_v31 = vld [vmem:[%s8903_s8 + $0x1a0] sm:$0xff] }
  0x6e   :  { %819 = vmatpush1.bf16.msra.mxu0 %v6634_v33  ;;  %1679 = vmatpush1.bf16.msra.mxu1 %v5768_v8  ;;  %v5816_v32 = vcombine.low %v958_v30, %v962_v31  ;;  %v5817_v33 = vcombine.high %v958_v30, %v962_v31  ;;  %v966_v34 = vld [vmem:[%s8903_s8 + $0x1c0] sm:$0xff] }
  0x6f   :  { %820 = vmatprep.subr.bf16.mxu0 %v6639_v35  ;;  %1680 = vmatprep.subr.bf16.mxu1 %v5777_v13  ;;  %v970_v35 = vld [vmem:[%s8903_s8 + $0x1e0] sm:$0xff] }
  0x70   :  { %v5824_v36 = vcombine.low %v966_v34, %v970_v35  ;;  %v974_v38 = vld [vmem:[%s8903_s8 + $0x200] sm:$0xff] }
  0x71   :  { %v1018_v6 = vld [vmem:[%s8903_s8 + $0x360] sm:$0xff] }
  0x72   :  { %821 = vmatpush1.bf16.msra.mxu0 %v6637_v37  ;;  %1681 = vmatpush1.bf16.msra.mxu1 %v5776_v12  ;;  %v5825_v37 = vcombine.high %v966_v34, %v970_v35  ;;  %v6682_v22 = vld [vmem:[%s8902_s7 + $0x100] ss:$8 sps:$4 sm:$0xff]  }
  0x73   :  { %822 = vmatprep.subr.bf16.mxu0 %v6642_v39  ;;  %1682 = vmatprep.subr.bf16.mxu1 %v5785_v17  ;;  %v978_v39 = vld [vmem:[%s8903_s8 + $0x220] sm:$0xff] }
  0x74   :  { %v5832_v40 = vcombine.low %v974_v38, %v978_v39 }
  0x76   :  { %823 = vmatpush1.bf16.msra.mxu0 %v6640_v41  ;;  %1683 = vmatpush1.bf16.msra.mxu1 %v5784_v16  ;;  %v5833_v41 = vcombine.high %v974_v38, %v978_v39  ;;  %v6693_v39 = vld [vmem:[%s8902_s7 + $0x134] ss:$8 sps:$4 sm:$0xff]  }
  0x77   :  { %824 = vmatprep.subr.bf16.mxu0 %v6645_v42  ;;  %1684 = vmatprep.subr.bf16.mxu1 %v5793_v21  ;;  %v143_v42 = vlaneseq }
  0x7a   :  { %825 = vmatpush1.bf16.msra.mxu0 %v6643_v43  ;;  %1685 = vmatpush1.bf16.msra.mxu1 %v5792_v20  ;;  %v982_v43 = vld [vmem:[%s8903_s8 + $0x240] sm:$0xff] }
  0x7b   :  { %826 = vmatprep.subr.bf16.mxu0 %v6648_v44  ;;  %1686 = vmatprep.subr.bf16.mxu1 %v5801_v25  ;;  %v986_v44 = vld [vmem:[%s8903_s8 + $0x260] sm:$0xff] }
  0x7e   :  { %827 = vmatpush1.bf16.msra.mxu0 %v6646_v45  ;;  %1687 = vmatpush1.bf16.msra.mxu1 %v5800_v24  ;;  %v5840_v45 = vcombine.low %v982_v43, %v986_v44 }
  0x7f   :  { %828 = vmatprep.subr.bf16.mxu0 %v6651_v46  ;;  %1688 = vmatprep.subr.bf16.mxu1 %v5809_v29  ;;  %v5841_v46 = vcombine.high %v982_v43, %v986_v44  ;;  %v6691_v43 = vld [vmem:[%s8902_s7 + $0x130] ss:$8 sps:$4 sm:$0xff]  }
  0x82   :  { %829 = vmatpush1.bf16.msra.mxu0 %v6649_v47  ;;  %1689 = vmatpush1.bf16.msra.mxu1 %v5808_v28  ;;  %v7458_v47 = vshrl.u32 %v143_v42, 7  ;;  %v6690_v28 = vld [vmem:[%s8902_s7 + $0x124] ss:$8 sps:$4 sm:$0xff]  }
  0x83   :  { %830 = vmatprep.subr.bf16.mxu0 %v6654_v48  ;;  %1690 = vmatprep.subr.bf16.mxu1 %v5817_v33  ;;  %v990_v48 = vld [vmem:[%s8903_s8 + $0x280] sm:$0xff] }
  0x84   :  { %v153_v16 = vsub.s32 2, %v7458_v47  ;;  %v157_v19 = vsub.s32 3, %v7458_v47 }
  0x86   :  { %831 = vmatpush1.bf16.msra.mxu0 %v6652_v49  ;;  %1691 = vmatpush1.bf16.msra.mxu1 %v5816_v32  ;;  %v994_v49 = vld [vmem:[%s8903_s8 + $0x2a0] sm:$0xff] }
  0x87   :  { %832 = vmatprep.subr.bf16.mxu0 %v6657_v50  ;;  %1692 = vmatprep.subr.bf16.mxu1 %v5825_v37  ;;  %v5848_v50 = vcombine.low %v990_v48, %v994_v49 }
  0x8a   :  { %833 = vmatpush1.bf16.msra.mxu0 %v6655_v51  ;;  %1693 = vmatpush1.bf16.msra.mxu1 %v5824_v36  ;;  %v5849_v51 = vcombine.high %v990_v48, %v994_v49  ;;  %v6688_v36 = vld [vmem:[%s8902_s7 + $0x120] ss:$8 sps:$4 sm:$0xff]   ;;  %v6699_v48 = vld [vmem:[%s8902_s7 + $0x154] ss:$8 sps:$4 sm:$0xff]   ;;  %v6697_v49 = vld [vmem:[%s8902_s7 + $0x150] ss:$8 sps:$4 sm:$0xff]  }
  0x8b   :  { %834 = vmatprep.subr.bf16.mxu0 %v6660_v52  ;;  %1694 = vmatprep.subr.bf16.mxu1 %v5833_v41  ;;  %v7467_v52 = vsub.s32 0, %v7458_v47 }
  0x8e   :  { %835 = vmatpush1.bf16.msra.mxu0 %v6658_v53  ;;  %1695 = vmatpush1.bf16.msra.mxu1 %v5832_v40  ;;  %v998_v53 = vld [vmem:[%s8903_s8 + $0x2c0] sm:$0xff] }
  0x8f   :  { %836 = vmatprep.subr.bf16.mxu0 %v6663_v54  ;;  %1696 = vmatprep.subr.bf16.mxu1 %v5841_v46  ;;  %v1002_v54 = vld [vmem:[%s8903_s8 + $0x2e0] sm:$0xff] }
  0x90   :  { %v6694_v46 = vld [vmem:[%s8902_s7 + $0x140] ss:$8 sps:$4 sm:$0xff]  }
  0x92   :  { %837 = vmatpush1.bf16.msra.mxu0 %v6661_v55  ;;  %1697 = vmatpush1.bf16.msra.mxu1 %v5840_v45  ;;  %v141_v55 = vld [vmem:[%s8909_s14] ss:$8 sm:$0xf]  ;;  %v6696_v45 = vld [vmem:[%s8902_s7 + $0x144] ss:$8 sps:$4 sm:$0xff]  }
  0x93   :  { %838 = vmatprep.subr.bf16.mxu0 %v6666_v56  ;;  %1698 = vmatprep.subr.bf16.mxu1 %v5849_v51  ;;  %v7479_v56 = vsub.s32 1, %v7458_v47  ;;  %v154_v24 = vrot.slane %v141_v55, %v153_v16  ;;  %v158_v25 = vrot.slane %v141_v55, %v157_v19  ;;  %v6700_v51 = vld [vmem:[%s8902_s7 + $0x160] ss:$8 sps:$4 sm:$0xff]  }
  0x94   :  { %v6738_v47 = vld [vmem:[%s8904_s9 + $0x48] sm:$0xff]  }
  0x96   :  { %839 = vmatpush1.bf16.msra.mxu0 %v6664_v57  ;;  %1699 = vmatpush1.bf16.msra.mxu1 %v5848_v50  ;;  %v5856_v57 = vcombine.low %v998_v53, %v1002_v54  ;;  %v6702_v50 = vld [vmem:[%s8902_s7 + $0x164] ss:$8 sps:$4 sm:$0xff]  }
  0x97   :  { %840 = vmatprep.subr.bf16.mxu0 %v6669_v58  ;;  %v5857_v58 = vcombine.high %v998_v53, %v1002_v54  ;;  %v6705_v53 = vld [vmem:[%s8902_s7 + $0x174] ss:$8 sps:$4 sm:$0xff]   ;;  %v6703_v54 = vld [vmem:[%s8902_s7 + $0x170] ss:$8 sps:$4 sm:$0xff]  }
  0x99   :  { %1700 = vmatprep.subr.bf16.mxu1 %v5857_v58  ;;  %v6711_v58 = vld [vmem:[%s8902_s7 + $0x194] ss:$8 sps:$4 sm:$0xff]  }
  0x9a   :  { %841 = vmatpush1.bf16.msra.mxu0 %v6667_v59  ;;  %v146_v59 = vrot.slane %v141_v55, %v7467_v52  ;;  %1701 = vmatpush1.bf16.msra.mxu1 %v5856_v57  ;;  %v6706_v57 = vld [vmem:[%s8902_s7 + $0x180] ss:$8 sps:$4 sm:$0xff]  }
  0x9b   :  { %842 = vmatprep.subr.bf16.mxu0 %v6672_v60  ;;  %v1006_v60 = vld [vmem:[%s8903_s8 + $0x300] sm:$0xff] }
  0x9e   :  { %843 = vmatpush1.bf16.msra.mxu0 %v6670_v61  ;;  %v1010_v61 = vld [vmem:[%s8903_s8 + $0x320] sm:$0xff] }
  0x9f   :  { %844 = vmatprep.subr.bf16.mxu0 %v6675_v62  ;;  %v150_v62 = vrot.slane %v141_v55, %v7479_v56  ;;  %v6708_v55 = vld [vmem:[%s8902_s7 + $0x184] ss:$8 sps:$4 sm:$0xff]  }
  0xa2   :  { %845 = vmatpush1.bf16.msra.mxu0 %v6673_v63  ;;  %v5864_v63 = vcombine.low %v1006_v60, %v1010_v61 }
  0xa3   :  { %846 = vmatprep.subr.bf16.mxu0 %v6678_v1  ;;  %v5865_v1 = vcombine.high %v1006_v60, %v1010_v61  ;;  %v6714_v60 = vld [vmem:[%s8902_s7 + $0x1a4] ss:$8 sps:$4 sm:$0xff]   ;;  %v6712_v61 = vld [vmem:[%s8902_s7 + $0x1a0] ss:$8 sps:$4 sm:$0xff]  }
  0xa5   :  { %1702 = vmatprep.subr.bf16.mxu1 %v5865_v1  ;;  %v6720_v1 = vld [vmem:[%s8902_s7 + $0x1c4] ss:$8 sps:$4 sm:$0xff]  }
  0xa6   :  { %847 = vmatpush1.bf16.msra.mxu0 %v6676_v2  ;;  %1703 = vmatpush1.bf16.msra.mxu1 %v5864_v63  ;;  %v6715_v63 = vld [vmem:[%s8902_s7 + $0x1b0] ss:$8 sps:$4 sm:$0xff]  }
  0xa7   :  { %848 = vmatprep.subr.bf16.mxu0 %v6681_v3 }
  0xaa   :  { %849 = vmatpush1.bf16.msra.mxu0 %v6679_v4 }
  0xab   :  { %861 = vmatprep.subr.bf16.mxu0 %v6684_v5  ;;  %v1014_v5 = vld [vmem:[%s8903_s8 + $0x340] sm:$0xff] }
  0xac   :  { %v5872_v9 = vcombine.low %v1014_v5, %v1018_v6  ;;  %v5873_v10 = vcombine.high %v1014_v5, %v1018_v6  ;;  %v6726_v5 = vld [vmem:[%s8902_s7 + $0x1e4] ss:$8 sps:$4 sm:$0xff]   ;;  %v6724_v6 = vld [vmem:[%s8902_s7 + $0x1e0] ss:$8 sps:$4 sm:$0xff]  }
  0xae   :  { %1704 = vmatprep.subr.bf16.mxu1 %v5873_v10  ;;  %v6727_v10 = vld [vmem:[%s8902_s7 + $0x1f0] ss:$8 sps:$4 sm:$0xff]  }
  0xaf   :  { %1705 = vmatpush1.bf16.msra.mxu1 %v5872_v9  ;;  %v916_v9 = vld [vmem:[%s8903_s8 + $0x30] sm:$0xff] }
 0x140   :  { %v357_v2 = vpop.f32.mrb[0].mxu0  ;;  %v400_v27 = vpop.f32.mrb[0].mxu1 }
 0x141   :  { %v358_v3 = vadd.f32 %v357_v2, %v146_v59  ;;  %v359_v4 = vpop.f32.mrb[1].mxu0  ;;  %v401_v29 = vadd.f32 %v400_v27, %v154_v24  ;;  %v402_v30 = vpop.f32.mrb[1].mxu1  ;;  %v6718_v2 = vld [vmem:[%s8902_s7 + $0x1c0] ss:$8 sps:$4 sm:$0xff]   ;;  %v948_v27 = vld [vmem:[%s8903_s8 + $0x130] sm:$0xff] }
 0x142   :  { %v360_v7 = vadd.f32 %v359_v4, %v150_v62  ;;  %v361_v8 = vpop.f32.mrb[2].mxu0  ;;  %v403_v31 = vadd.f32 %v402_v30, %v158_v25  ;;  %v404_v32 = vpop.f32.mrb[2].mxu1  ;;  %v6721_v4 = vld [vmem:[%s8902_s7 + $0x1d0] ss:$8 sps:$4 sm:$0xff]  }
 0x143   :  { %v362_v11 = vadd.f32 %v361_v8, %v146_v59  ;;  %v363_v12 = vpop.f32.mrb[3].mxu0  ;;  %v409_v14 = vmax.f32 %v358_v3, 0.0  ;;  %v411_v33 = vmax.f32 %v401_v29, 0.0  ;;  %v405_v34 = vadd.f32 %v404_v32, %v154_v24  ;;  %v406_v35 = vpop.f32.mrb[3].mxu1  ;;  %v6709_v59 = vld [vmem:[%s8902_s7 + $0x190] ss:$8 sps:$4 sm:$0xff]  }
 0x144   :  { %v364_v13 = vadd.f32 %v363_v12, %v150_v62  ;;  %v410_v17 = vmax.f32 %v360_v7, 0.0  ;;  %v412_v37 = vmax.f32 %v403_v31, 0.0  ;;  %v407_v38 = vadd.f32 %v406_v35, %v158_v25  ;;  %v6717_v62 = vld [vmem:[%s8902_s7 + $0x1b4] ss:$8 sps:$4 sm:$0xff]  }
 0x145   :  { %v413_v15 = vmax.f32 %v362_v11, 0.0  ;;  %v415_v40 = vmax.f32 %v405_v34, 0.0  ;;  %v6723_v3 = vld [vmem:[%s8902_s7 + $0x1d4] ss:$8 sps:$4 sm:$0xff]  }
 0x146   :  { %v414_v18 = vmax.f32 %v364_v13, 0.0  ;;  %v416_v41 = vmax.f32 %v407_v38, 0.0  ;;  %v6729_v7 = vld [vmem:[%s8902_s7 + $0x1f4] ss:$8 sps:$4 sm:$0xff]  }
 0x147   :  { %v417_v20 = vpack.c.bf16 %v413_v15, %v409_v14  ;;  %v7519_v42 = vpack.c.bf16 %v415_v40, %v411_v33  ;;  %v912_v8 = vld [vmem:[%s8903_s8 + $0x10] sm:$0xff] }
 0x148   :  { %v418_v21 = vpack.c.bf16 %v414_v18, %v410_v17  ;;  %v420_v44 = vpack.c.bf16 %v416_v41, %v412_v37  ;;  %v5773_v11 = vcombine.high %v912_v8, %v916_v9  ;;  %v920_v12 = vld [vmem:[%s8903_s8 + $0x50] sm:$0xff]  ;;  %v5772_v14 = vcombine.low %v912_v8, %v916_v9 }
 0x149   :  { %v924_v13 = vld [vmem:[%s8903_s8 + $0x70] sm:$0xff] }
 0x14a   :  { %850 = vmatprep.mubr.bf16.mxu0 %v418_v21  ;;  %v5781_v15 = vcombine.high %v920_v12, %v924_v13  ;;  %v928_v17 = vld [vmem:[%s8903_s8 + $0x90] sm:$0xff] }
 0x14b   :  { %851 = vmatmul.mubr.bf16.vlgmr.msra.gmra.mrb[4].mxu0 %v417_v20  ;;  %v932_v18 = vld [vmem:[%s8903_s8 + $0xb0] sm:$0xff]  ;;  %v5780_v20 = vcombine.low %v920_v12, %v924_v13 }
 0x14c   :  { %862 = vmatpush1.bf16.msra.mxu0 %v6682_v22  ;;  %893 = vmatprep.mubr.bf16.mxu0 %v420_v44  ;;  %v5789_v21 = vcombine.high %v928_v17, %v932_v18  ;;  %v936_v22 = vld [vmem:[%s8903_s8 + $0xd0] sm:$0xff]  ;;  %v5788_v24 = vcombine.low %v928_v17, %v932_v18  ;;  %v1026_v17 = vld [vmem:[%s8903_s8 + $0x3a0] sm:$0xff] }
 0x14d   :  { %863 = vmatprep.subr.bf16.mxu0 %v6687_v23  ;;  %v940_v23 = vld [vmem:[%s8903_s8 + $0xf0] sm:$0xff] }
 0x14e   :  { %v5797_v25 = vcombine.high %v936_v22, %v940_v23  ;;  %v952_v30 = vld [vmem:[%s8903_s8 + $0x150] sm:$0xff] }
 0x14f   :  { %v956_v31 = vld [vmem:[%s8903_s8 + $0x170] sm:$0xff] }
 0x150   :  { %864 = vmatpush1.bf16.msra.mxu0 %v6685_v26  ;;  %v944_v26 = vld [vmem:[%s8903_s8 + $0x110] sm:$0xff]  ;;  %v5813_v33 = vcombine.high %v952_v30, %v956_v31 }
 0x151   :  { %865 = vmatprep.subr.bf16.mxu0 %v6690_v28  ;;  %v5796_v28 = vcombine.low %v936_v22, %v940_v23  ;;  %v5805_v29 = vcombine.high %v944_v26, %v948_v27  ;;  %v5804_v32 = vcombine.low %v944_v26, %v948_v27  ;;  %v960_v34 = vld [vmem:[%s8903_s8 + $0x190] sm:$0xff]  ;;  %v1034_v22 = vld [vmem:[%s8903_s8 + $0x3e0] sm:$0xff]  ;;  %v915_v26 = vld [vmem:[%s8903_s8 + $0x28] sm:$0xff] }
 0x152   :  { %v964_v35 = vld [vmem:[%s8903_s8 + $0x1b0] sm:$0xff] }
 0x153   :  { %v5821_v37 = vcombine.high %v960_v34, %v964_v35  ;;  %v968_v38 = vld [vmem:[%s8903_s8 + $0x1d0] sm:$0xff]  ;;  %v5820_v40 = vcombine.low %v960_v34, %v964_v35 }
 0x154   :  { %866 = vmatpush1.bf16.msra.mxu0 %v6688_v36  ;;  %v5812_v36 = vcombine.low %v952_v30, %v956_v31 }
 0x155   :  { %867 = vmatprep.subr.bf16.mxu0 %v6693_v39  ;;  %v972_v39 = vld [vmem:[%s8903_s8 + $0x1f0] sm:$0xff] }
 0x156   :  { %v5829_v41 = vcombine.high %v968_v38, %v972_v39  ;;  %v5828_v44 = vcombine.low %v968_v38, %v972_v39 }
 0x158   :  { %868 = vmatpush1.bf16.msra.mxu0 %v6691_v43  ;;  %v980_v43 = vld [vmem:[%s8903_s8 + $0x230] sm:$0xff] }
 0x159   :  { %869 = vmatprep.subr.bf16.mxu0 %v6696_v45 }
 0x15c   :  { %870 = vmatpush1.bf16.msra.mxu0 %v6694_v46  ;;  %v984_v46 = vld [vmem:[%s8903_s8 + $0x250] sm:$0xff] }
 0x15d   :  { %871 = vmatprep.subr.bf16.mxu0 %v6699_v48  ;;  %v988_v48 = vld [vmem:[%s8903_s8 + $0x270] sm:$0xff] }
 0x160   :  { %872 = vmatpush1.bf16.msra.mxu0 %v6697_v49 }
 0x161   :  { %873 = vmatprep.subr.bf16.mxu0 %v6702_v50  ;;  %v5845_v50 = vcombine.high %v984_v46, %v988_v48 }
 0x164   :  { %874 = vmatpush1.bf16.msra.mxu0 %v6700_v51  ;;  %v992_v51 = vld [vmem:[%s8903_s8 + $0x290] sm:$0xff] }
 0x165   :  { %875 = vmatprep.subr.bf16.mxu0 %v6705_v53  ;;  %v996_v53 = vld [vmem:[%s8903_s8 + $0x2b0] sm:$0xff] }
 0x168   :  { %876 = vmatpush1.bf16.msra.mxu0 %v6703_v54  ;;  %v5844_v54 = vcombine.low %v984_v46, %v988_v48  ;;  %v931_v46 = vld [vmem:[%s8903_s8 + $0xa8] sm:$0xff] }
 0x169   :  { %877 = vmatprep.subr.bf16.mxu0 %v6708_v55  ;;  %v5853_v55 = vcombine.high %v992_v51, %v996_v53 }
 0x16c   :  { %878 = vmatpush1.bf16.msra.mxu0 %v6706_v57  ;;  %v1000_v57 = vld [vmem:[%s8903_s8 + $0x2d0] sm:$0xff] }
 0x16d   :  { %879 = vmatprep.subr.bf16.mxu0 %v6711_v58  ;;  %v1004_v58 = vld [vmem:[%s8903_s8 + $0x2f0] sm:$0xff] }
 0x170   :  { %880 = vmatpush1.bf16.msra.mxu0 %v6709_v59  ;;  %v5852_v59 = vcombine.low %v992_v51, %v996_v53  ;;  %v939_v51 = vld [vmem:[%s8903_s8 + $0xe8] sm:$0xff] }
 0x171   :  { %881 = vmatprep.subr.bf16.mxu0 %v6714_v60  ;;  %v5861_v60 = vcombine.high %v1000_v57, %v1004_v58 }
 0x174   :  { %882 = vmatpush1.bf16.msra.mxu0 %v6712_v61  ;;  %v1008_v61 = vld [vmem:[%s8903_s8 + $0x310] sm:$0xff] }
 0x175   :  { %883 = vmatprep.subr.bf16.mxu0 %v6717_v62  ;;  %v1012_v62 = vld [vmem:[%s8903_s8 + $0x330] sm:$0xff] }
 0x178   :  { %884 = vmatpush1.bf16.msra.mxu0 %v6715_v63  ;;  %v5860_v63 = vcombine.low %v1000_v57, %v1004_v58  ;;  %v947_v57 = vld [vmem:[%s8903_s8 + $0x128] sm:$0xff] }
 0x179   :  { %885 = vmatprep.subr.bf16.mxu0 %v6720_v1  ;;  %v5869_v1 = vcombine.high %v1008_v61, %v1012_v62 }
 0x17c   :  { %886 = vmatpush1.bf16.msra.mxu0 %v6718_v2  ;;  %v1016_v2 = vld [vmem:[%s8903_s8 + $0x350] sm:$0xff] }
 0x17d   :  { %887 = vmatprep.subr.bf16.mxu0 %v6723_v3  ;;  %v1020_v3 = vld [vmem:[%s8903_s8 + $0x370] sm:$0xff] }
 0x17e   :  { %v5876_v8 = vcombine.low %v1016_v2, %v1020_v3 }
 0x180   :  { %888 = vmatpush1.bf16.msra.mxu0 %v6721_v4  ;;  %v5868_v4 = vcombine.low %v1008_v61, %v1012_v62  ;;  %v955_v61 = vld [vmem:[%s8903_s8 + $0x168] sm:$0xff] }
 0x181   :  { %889 = vmatprep.subr.bf16.mxu0 %v6726_v5  ;;  %v5877_v5 = vcombine.high %v1016_v2, %v1020_v3  ;;  %v963_v2 = vld [vmem:[%s8903_s8 + $0x1a8] sm:$0xff] }
 0x184   :  { %890 = vmatpush1.bf16.msra.mxu0 %v6724_v6  ;;  %v1024_v6 = vld [vmem:[%s8903_s8 + $0x390] sm:$0xff] }
 0x185   :  { %891 = vmatprep.subr.bf16.mxu0 %v6729_v7  ;;  %v1028_v7 = vld [vmem:[%s8903_s8 + $0x3b0] sm:$0xff] }
 0x186   :  { %v5885_v9 = vcombine.high %v1024_v6, %v1028_v7  ;;  %v5884_v12 = vcombine.low %v1024_v6, %v1028_v7  ;;  %v971_v6 = vld [vmem:[%s8903_s8 + $0x1e8] sm:$0xff] }
 0x188   :  { %892 = vmatpush1.bf16.msra.mxu0 %v6727_v10  ;;  %v1032_v10 = vld [vmem:[%s8903_s8 + $0x3d0] sm:$0xff] }
 0x189   :  { %1764 = vmatprep.subr.bf16.mxu0 %v5773_v11  ;;  %v1036_v11 = vld [vmem:[%s8903_s8 + $0x3f0] sm:$0xff] }
 0x18a   :  { %v5893_v13 = vcombine.high %v1032_v10, %v1036_v11 }
 0x18b   :  { %894 = vmatmul.mubr.bf16.vlgmr.msra.gmra.mrb[4].mxu0 %v7519_v42  ;;  %v976_v42 = vld [vmem:[%s8903_s8 + $0x210] sm:$0xff] }
 0x18c   :  { %1765 = vmatpush1.bf16.msra.mxu0 %v5772_v14  ;;  %v5837_v45 = vcombine.high %v976_v42, %v980_v43  ;;  %v5836_v49 = vcombine.low %v976_v42, %v980_v43  ;;  %v5892_v14 = vcombine.low %v1032_v10, %v1036_v11  ;;  %v979_v10 = vld [vmem:[%s8903_s8 + $0x228] sm:$0xff] }
 0x18d   :  { %1766 = vmatprep.subr.bf16.mxu0 %v5781_v15  ;;  %v1022_v15 = vld [vmem:[%s8903_s8 + $0x380] sm:$0xff] }
 0x18e   :  { %v5881_v18 = vcombine.high %v1022_v15, %v1026_v17 }
 0x190   :  { %1767 = vmatpush1.bf16.msra.mxu0 %v5780_v20  ;;  %v5880_v20 = vcombine.low %v1022_v15, %v1026_v17  ;;  %1706 = vmatprep.subr.bf16.mxu1 %v5881_v18  ;;  %v991_v18 = vld [vmem:[%s8903_s8 + $0x288] sm:$0xff] }
 0x191   :  { %1768 = vmatprep.subr.bf16.mxu0 %v5789_v21  ;;  %v1030_v21 = vld [vmem:[%s8903_s8 + $0x3c0] sm:$0xff] }
 0x192   :  { %1707 = vmatpush1.bf16.msra.mxu1 %v5880_v20  ;;  %v5889_v23 = vcombine.high %v1030_v21, %v1034_v22  ;;  %v995_v20 = vld [vmem:[%s8903_s8 + $0x2a8] sm:$0xff] }
 0x194   :  { %1769 = vmatpush1.bf16.msra.mxu0 %v5788_v24  ;;  %v5888_v24 = vcombine.low %v1030_v21, %v1034_v22  ;;  %1708 = vmatprep.subr.bf16.mxu1 %v5889_v23  ;;  %v5851_v22 = vcombine.high %v991_v18, %v995_v20  ;;  %v999_v23 = vld [vmem:[%s8903_s8 + $0x2c8] sm:$0xff] }
 0x195   :  { %1770 = vmatprep.subr.bf16.mxu0 %v5797_v25  ;;  %v911_v25 = vld [vmem:[%s8903_s8 + $0x8] sm:$0xff] }
 0x196   :  { %1709 = vmatpush1.bf16.msra.mxu1 %v5888_v24  ;;  %v5771_v27 = vcombine.high %v911_v25, %v915_v26  ;;  %v1003_v24 = vld [vmem:[%s8903_s8 + $0x2e8] sm:$0xff] }
 0x198   :  { %1771 = vmatpush1.bf16.msra.mxu0 %v5796_v28  ;;  %v5770_v28 = vcombine.low %v911_v25, %v915_v26  ;;  %1721 = vmatprep.subr.bf16.mxu1 %v5771_v27  ;;  %v5850_v25 = vcombine.low %v991_v18, %v995_v20  ;;  %v5859_v26 = vcombine.high %v999_v23, %v1003_v24  ;;  %v1007_v27 = vld [vmem:[%s8903_s8 + $0x308] sm:$0xff]  ;;  %v973_v18 = vld [vmem:[%s8903_s8 + $0x1f8] sm:$0xff] }
 0x199   :  { %1772 = vmatprep.subr.bf16.mxu0 %v5805_v29  ;;  %v5703_v29 = vld [vmem:[%s8909_s14 + $0x1] ss:$8 sm:$0x3] }
 0x19a   :  { %v495_v31 = vrot.slane %v5703_v29, %v7479_v56 }
 0x19c   :  { %1773 = vmatpush1.bf16.msra.mxu0 %v5804_v32  ;;  %v491_v32 = vrot.slane %v5703_v29, %v7467_v52  ;;  %v5858_v29 = vcombine.low %v999_v23, %v1003_v24  ;;  %v981_v23 = vld [vmem:[%s8903_s8 + $0x238] sm:$0xff]  ;;  %v1851_v24 = vld [vmem:[%s8909_s14 + $0x8] sm:$0xc0] }
 0x19d   :  { %1774 = vmatprep.subr.bf16.mxu0 %v5813_v33 }
 0x1a0   :  { %1775 = vmatpush1.bf16.msra.mxu0 %v5812_v36 }
 0x1a1   :  { %1776 = vmatprep.subr.bf16.mxu0 %v5821_v37 }
 0x1a4   :  { %1777 = vmatpush1.bf16.msra.mxu0 %v5820_v40  ;;  %v919_v40 = vld [vmem:[%s8903_s8 + $0x48] sm:$0xff] }
 0x1a5   :  { %1778 = vmatprep.subr.bf16.mxu0 %v5829_v41  ;;  %v923_v41 = vld [vmem:[%s8903_s8 + $0x68] sm:$0xff] }
 0x1a6   :  { %v5778_v48 = vcombine.low %v919_v40, %v923_v41 }
 0x1a8   :  { %1779 = vmatpush1.bf16.msra.mxu0 %v5828_v44  ;;  %v5779_v44 = vcombine.high %v919_v40, %v923_v41  ;;  %v1027_v40 = vld [vmem:[%s8903_s8 + $0x3a8] sm:$0xff] }
 0x1a9   :  { %1780 = vmatprep.subr.bf16.mxu0 %v5837_v45  ;;  %v927_v45 = vld [vmem:[%s8903_s8 + $0x88] sm:$0xff] }
 0x1aa   :  { %v5786_v53 = vcombine.low %v927_v45, %v931_v46 }
 0x1ac   :  { %1781 = vmatpush1.bf16.msra.mxu0 %v5836_v49  ;;  %v5787_v49 = vcombine.high %v927_v45, %v931_v46  ;;  %v1031_v45 = vld [vmem:[%s8903_s8 + $0x3c8] sm:$0xff] }
 0x1ad   :  { %1782 = vmatprep.subr.bf16.mxu0 %v5845_v50  ;;  %v935_v50 = vld [vmem:[%s8903_s8 + $0xc8] sm:$0xff] }
 0x1ae   :  { %v5794_v58 = vcombine.low %v935_v50, %v939_v51  ;;  %v1035_v46 = vld [vmem:[%s8903_s8 + $0x3e8] sm:$0xff] }
 0x1b0   :  { %1783 = vmatpush1.bf16.msra.mxu0 %v5844_v54  ;;  %v5795_v54 = vcombine.high %v935_v50, %v939_v51  ;;  %v913_v50 = vld [vmem:[%s8903_s8 + $0x18] sm:$0xff] }
 0x1b1   :  { %1784 = vmatprep.subr.bf16.mxu0 %v5853_v55  ;;  %v943_v55 = vld [vmem:[%s8903_s8 + $0x108] sm:$0xff]  ;;  %v917_v51 = vld [vmem:[%s8903_s8 + $0x38] sm:$0xff] }
 0x1b2   :  { %v5802_v62 = vcombine.low %v943_v55, %v947_v57 }
 0x1b4   :  { %1785 = vmatpush1.bf16.msra.mxu0 %v5852_v59  ;;  %v5803_v59 = vcombine.high %v943_v55, %v947_v57  ;;  %v921_v55 = vld [vmem:[%s8903_s8 + $0x58] sm:$0xff] }
 0x1b5   :  { %1786 = vmatprep.subr.bf16.mxu0 %v5861_v60  ;;  %v951_v60 = vld [vmem:[%s8903_s8 + $0x148] sm:$0xff]  ;;  %v925_v57 = vld [vmem:[%s8903_s8 + $0x78] sm:$0xff] }
 0x1b6   :  { %v5810_v3 = vcombine.low %v951_v60, %v955_v61 }
 0x1b8   :  { %1787 = vmatpush1.bf16.msra.mxu0 %v5860_v63  ;;  %v5811_v63 = vcombine.high %v951_v60, %v955_v61  ;;  %v929_v60 = vld [vmem:[%s8903_s8 + $0x98] sm:$0xff] }
 0x1b9   :  { %1788 = vmatprep.subr.bf16.mxu0 %v5869_v1  ;;  %v959_v1 = vld [vmem:[%s8903_s8 + $0x188] sm:$0xff]  ;;  %v933_v61 = vld [vmem:[%s8903_s8 + $0xb8] sm:$0xff] }
 0x1ba   :  { %v5818_v7 = vcombine.low %v959_v1, %v963_v2 }
 0x1bc   :  { %1789 = vmatpush1.bf16.msra.mxu0 %v5868_v4  ;;  %v5819_v4 = vcombine.high %v959_v1, %v963_v2  ;;  %v937_v1 = vld [vmem:[%s8903_s8 + $0xd8] sm:$0xff] }
 0x1bd   :  { %1790 = vmatprep.subr.bf16.mxu0 %v5877_v5  ;;  %v967_v5 = vld [vmem:[%s8903_s8 + $0x1c8] sm:$0xff]  ;;  %v941_v2 = vld [vmem:[%s8903_s8 + $0xf8] sm:$0xff] }
 0x1be   :  { %v5826_v11 = vcombine.low %v967_v5, %v971_v6 }
 0x1c0   :  { %1791 = vmatpush1.bf16.msra.mxu0 %v5876_v8  ;;  %v5827_v8 = vcombine.high %v967_v5, %v971_v6  ;;  %v945_v5 = vld [vmem:[%s8903_s8 + $0x118] sm:$0xff]  ;;  %v5798_v6 = vcombine.low %v937_v1, %v941_v2 }
 0x1c1   :  { %1792 = vmatprep.subr.bf16.mxu0 %v5885_v9  ;;  %v975_v9 = vld [vmem:[%s8903_s8 + $0x208] sm:$0xff] }
 0x1c2   :  { %v5834_v15 = vcombine.low %v975_v9, %v979_v10 }
 0x1c4   :  { %1793 = vmatpush1.bf16.msra.mxu0 %v5884_v12  ;;  %v5835_v12 = vcombine.high %v975_v9, %v979_v10  ;;  %v957_v9 = vld [vmem:[%s8903_s8 + $0x178] sm:$0xff] }
 0x1c5   :  { %1794 = vmatprep.subr.bf16.mxu0 %v5893_v13  ;;  %v983_v13 = vld [vmem:[%s8903_s8 + $0x248] sm:$0xff] }
 0x1c8   :  { %1795 = vmatpush1.bf16.msra.mxu0 %v5892_v14  ;;  %v987_v14 = vld [vmem:[%s8903_s8 + $0x268] sm:$0xff] }
 0x1c9   :  { %v5843_v17 = vcombine.high %v983_v13, %v987_v14  ;;  %v5842_v21 = vcombine.low %v983_v13, %v987_v14  ;;  %v965_v13 = vld [vmem:[%s8903_s8 + $0x1b8] sm:$0xff] }
 0x25e   :  { %v895_v30 = vpop.f32.mrb[4].mxu0 }
 0x25f   :  { %v897_v33 = vpop.f32.mrb[5].mxu0  ;;  %v7722_v39 = vadd.f32 %v895_v30, %v491_v32 }
 0x260   :  { %v899_v34 = vpop.f32.mrb[6].mxu0  ;;  %v7718_v37 = vadd.f32 %v897_v33, %v495_v31 }
 0x261   :  { %v7716_v35 = vadd.f32 %v899_v34, %v491_v32  ;;  %v901_v36 = vpop.f32.mrb[7].mxu0  ;;  %v1019_v32 = vld [vmem:[%s8903_s8 + $0x368] sm:$0xff] }
 0x262   :  { %v7720_v38 = vadd.f32 %v901_v36, %v495_v31  ;;  %v1015_v31 = vld [vmem:[%s8903_s8 + $0x348] sm:$0xff] }
 0x263   :  { %v7736_v43 = vpack.c.bf16 %v7716_v35, %v7722_v39  ;;  %v5875_v34 = vcombine.high %v1015_v31, %v1019_v32  ;;  %v1023_v36 = vld [vmem:[%s8903_s8 + $0x388] sm:$0xff]  ;;  %v5874_v41 = vcombine.low %v1015_v31, %v1019_v32 }
 0x264   :  { %v7732_v42 = vpack.c.bf16 %v7720_v38, %v7718_v37 }
 0x266   :  { %1710 = vmatprep.mubr.bf16.mxu1 %v7732_v42  ;;  %1796 = vmatprep.mubr.bf16.mxu0 %v7732_v42 }
 0x267   :  { %6518 = vmatprep.subr.bf16.mxu0 %v7732_v42  ;;  %1711 = vmatmul.mubr.bf16.vlgmr.msra.gmra.mrb[4].mxu1 %v7736_v43 }
 0x268   :  { %1722 = vmatpush1.bf16.msra.mxu1 %v5770_v28  ;;  %1797 = vmatmul.mubr.bf16.vlgmr.msra.gmra.mrb[8].mxu0 %v7736_v43  ;;  %v1011_v28 = vld [vmem:[%s8903_s8 + $0x328] sm:$0xff] }
 0x269   :  { %6520 = vmatpush1.bf16.xpose.msra.mxu0 %v7736_v43  ;;  %1753 = vmatprep.mubr.bf16.mxu1 %v7732_v42  ;;  %v5867_v30 = vcombine.high %v1007_v27, %v1011_v28  ;;  %v5866_v33 = vcombine.low %v1007_v27, %v1011_v28  ;;  %v1850_v28 = vld [vmem:[%s8909_s14] sm:$0xc0] }
 0x26a   :  { %1723 = vmatprep.subr.bf16.mxu1 %v5779_v44  ;;  %v5883_v44 = vcombine.high %v1023_v36, %v1027_v40  ;;  %v1861_v31 = vrot.slane %v1850_v28, 6 }
 0x26c   :  { %1724 = vmatpush1.bf16.msra.mxu1 %v5778_v48  ;;  %v5882_v48 = vcombine.low %v1023_v36, %v1027_v40  ;;  %v985_v36 = vld [vmem:[%s8903_s8 + $0x258] sm:$0xff] }
 0x26d   :  { %1725 = vmatprep.subr.bf16.mxu1 %v5787_v49  ;;  %v5891_v49 = vcombine.high %v1031_v45, %v1035_v46  ;;  %v989_v40 = vld [vmem:[%s8903_s8 + $0x278] sm:$0xff] }
 0x270   :  { %1726 = vmatpush1.bf16.msra.mxu1 %v5786_v53  ;;  %v5890_v53 = vcombine.low %v1031_v45, %v1035_v46  ;;  %v5847_v45 = vcombine.high %v985_v36, %v989_v40  ;;  %v993_v46 = vld [vmem:[%s8903_s8 + $0x298] sm:$0xff] }
 0x271   :  { %1727 = vmatprep.subr.bf16.mxu1 %v5795_v54  ;;  %v5775_v54 = vcombine.high %v913_v50, %v917_v51 }
 0x274   :  { %1728 = vmatpush1.bf16.msra.mxu1 %v5794_v58  ;;  %v5774_v58 = vcombine.low %v913_v50, %v917_v51  ;;  %v1001_v51 = vld [vmem:[%s8903_s8 + $0x2d8] sm:$0xff] }
 0x275   :  { %1729 = vmatprep.subr.bf16.mxu1 %v5803_v59  ;;  %v5783_v59 = vcombine.high %v921_v55, %v925_v57 }
 0x278   :  { %1730 = vmatpush1.bf16.msra.mxu1 %v5802_v62  ;;  %v5782_v62 = vcombine.low %v921_v55, %v925_v57  ;;  %v1009_v57 = vld [vmem:[%s8903_s8 + $0x318] sm:$0xff] }
 0x279   :  { %1731 = vmatprep.subr.bf16.mxu1 %v5811_v63  ;;  %v5791_v63 = vcombine.high %v929_v60, %v933_v61 }
 0x27c   :  { %1732 = vmatpush1.bf16.msra.mxu1 %v5810_v3  ;;  %v5790_v3 = vcombine.low %v929_v60, %v933_v61  ;;  %v1017_v61 = vld [vmem:[%s8903_s8 + $0x358] sm:$0xff] }
 0x27d   :  { %1733 = vmatprep.subr.bf16.mxu1 %v5819_v4  ;;  %v5799_v4 = vcombine.high %v937_v1, %v941_v2  ;;  %v1025_v2 = vld [vmem:[%s8903_s8 + $0x398] sm:$0xff] }
 0x280   :  { %1734 = vmatpush1.bf16.msra.mxu1 %v5818_v7 }
 0x281   :  { %1735 = vmatprep.subr.bf16.mxu1 %v5827_v8  ;;  %v953_v8 = vld [vmem:[%s8903_s8 + $0x158] sm:$0xff] }
 0x282   :  { %v5814_v14 = vcombine.low %v953_v8, %v957_v9 }
 0x284   :  { %1736 = vmatpush1.bf16.msra.mxu1 %v5826_v11  ;;  %v5815_v11 = vcombine.high %v953_v8, %v957_v9  ;;  %v1855_v9 = vld [vmem:[%s8909_s14 + $0x28] sm:$0x3c] }
 0x285   :  { %1737 = vmatprep.subr.bf16.mxu1 %v5835_v12  ;;  %v961_v12 = vld [vmem:[%s8903_s8 + $0x198] sm:$0xff] }
 0x286   :  { %v5822_v20 = vcombine.low %v961_v12, %v965_v13 }
 0x288   :  { %1738 = vmatpush1.bf16.msra.mxu1 %v5834_v15  ;;  %v5823_v15 = vcombine.high %v961_v12, %v965_v13  ;;  %v1854_v12 = vld [vmem:[%s8909_s14 + $0x20] sm:$0x3c] }
 0x289   :  { %1739 = vmatprep.subr.bf16.mxu1 %v5843_v17  ;;  %v969_v17 = vld [vmem:[%s8903_s8 + $0x1d8] sm:$0xff]  ;;  %v1941_v13 = vrot.slane %v1854_v12, 2 }
 0x28c   :  { %1740 = vmatpush1.bf16.msra.mxu1 %v5842_v21  ;;  %v5831_v21 = vcombine.high %v969_v17, %v973_v18 }
 0x28d   :  { %1741 = vmatprep.subr.bf16.mxu1 %v5851_v22  ;;  %v977_v22 = vld [vmem:[%s8903_s8 + $0x218] sm:$0xff] }
 0x28e   :  { %v5839_v32 = vcombine.high %v977_v22, %v981_v23 }
 0x290   :  { %1742 = vmatpush1.bf16.msra.mxu1 %v5850_v25  ;;  %v1853_v25 = vld [vmem:[%s8909_s14 + $0x28] sm:$0x3] }
 0x291   :  { %1743 = vmatprep.subr.bf16.mxu1 %v5859_v26  ;;  %v1864_v26 = vrot.slane %v1851_v24, 6  ;;  %v1865_v27 = vrot.slane %v1853_v25, 6 }
 0x294   :  { %1744 = vmatpush1.bf16.msra.mxu1 %v5858_v29  ;;  %v5830_v29 = vcombine.low %v969_v17, %v973_v18 }
 0x295   :  { %1745 = vmatprep.subr.bf16.mxu1 %v5867_v30  ;;  %v1852_v30 = vld [vmem:[%s8909_s14 + $0x20] sm:$0x3] }
 0x298   :  { %1746 = vmatpush1.bf16.msra.mxu1 %v5866_v33  ;;  %v1866_v33 = vsel %vm1860_vm0, %v1864_v26, %v1865_v27 }
 0x299   :  { %1747 = vmatprep.subr.bf16.mxu1 %v5875_v34  ;;  %v1862_v34 = vrot.slane %v1852_v30, 6  ;;  %1933 = vmatprep.mubr.f32.mxu0 %v1866_v33 }
 0x29c   :  { %1748 = vmatpush1.bf16.msra.mxu1 %v5874_v41  ;;  %v1863_v41 = vsel %vm1860_vm0, %v1861_v31, %v1862_v34 }
 0x29d   :  { %1749 = vmatprep.subr.bf16.mxu1 %v5883_v44  ;;  %v5838_v44 = vcombine.low %v977_v22, %v981_v23  ;;  %1934 = vmatmul.mubr.f32.vlgmr.msra.gmra.mrb[12].mxu0 %v1863_v41 }
 0x2a0   :  { %1750 = vmatpush1.bf16.msra.mxu1 %v5882_v48  ;;  %v997_v48 = vld [vmem:[%s8903_s8 + $0x2b8] sm:$0xff] }
 0x2a1   :  { %1751 = vmatprep.subr.bf16.mxu1 %v5891_v49  ;;  %v5846_v49 = vcombine.low %v985_v36, %v989_v40  ;;  %v5855_v50 = vcombine.high %v993_v46, %v997_v48 }
 0x2a4   :  { %1752 = vmatpush1.bf16.msra.mxu1 %v5890_v53  ;;  %v1005_v53 = vld [vmem:[%s8903_s8 + $0x2f8] sm:$0xff] }
 0x2a5   :  { %1807 = vmatprep.subr.bf16.mxu1 %v5775_v54  ;;  %v5854_v54 = vcombine.low %v993_v46, %v997_v48  ;;  %v5863_v55 = vcombine.high %v1001_v51, %v1005_v53  ;;  %v7155_v46 = vmov 1  }
 0x2a7   :  { %1754 = vmatmul.mubr.bf16.vlgmr.msra.gmra.mrb[8].mxu1 %v7736_v43 }
 0x2a8   :  { %1808 = vmatpush1.bf16.msra.mxu1 %v5774_v58  ;;  %1839 = vmatprep.mubr.bf16.mxu1 %v7732_v42  ;;  %v949_v42 = vld [vmem:[%s8903_s8 + $0x138] sm:$0xff] }
 0x2a9   :  { %1809 = vmatprep.subr.bf16.mxu1 %v5783_v59  ;;  %v5807_v7 = vcombine.high %v945_v5, %v949_v42  ;;  %v5806_v10 = vcombine.low %v945_v5, %v949_v42  ;;  %v1013_v58 = vld [vmem:[%s8903_s8 + $0x338] sm:$0xff]  ;;  %v5862_v59 = vcombine.low %v1001_v51, %v1005_v53 }
 0x2aa   :  { %v5871_v60 = vcombine.high %v1009_v57, %v1013_v58  ;;  %v1033_v42 = vld [vmem:[%s8903_s8 + $0x3d8] sm:$0xff] }
 0x2ac   :  { %1810 = vmatpush1.bf16.msra.mxu1 %v5782_v62  ;;  %v1021_v62 = vld [vmem:[%s8903_s8 + $0x378] sm:$0xff] }
 0x2ad   :  { %1811 = vmatprep.subr.bf16.mxu1 %v5791_v63  ;;  %v5870_v63 = vcombine.low %v1009_v57, %v1013_v58  ;;  %v5879_v1 = vcombine.high %v1017_v61, %v1021_v62  ;;  %v2037_v58 = vld [vmem:[%s8897_s2 + $0x8] sm:$0xff] }
 0x2b0   :  { %1812 = vmatpush1.bf16.msra.mxu1 %v5790_v3  ;;  %v1029_v3 = vld [vmem:[%s8903_s8 + $0x3b8] sm:$0xff] }
 0x2b1   :  { %1813 = vmatprep.subr.bf16.mxu1 %v5799_v4  ;;  %v5878_v4 = vcombine.low %v1017_v61, %v1021_v62  ;;  %v5887_v5 = vcombine.high %v1025_v2, %v1029_v3  ;;  %v5902_v61 = vld [vmem:[%s8897_s2 + $0x10] sm:$0xff] }
 0x2b4   :  { %1814 = vmatpush1.bf16.msra.mxu1 %v5798_v6  ;;  %v1037_v6 = vld [vmem:[%s8903_s8 + $0x3f8] sm:$0xff] }
 0x2b5   :  { %1815 = vmatprep.subr.bf16.mxu1 %v5807_v7  ;;  %v5886_v7 = vcombine.low %v1025_v2, %v1029_v3  ;;  %v5895_v8 = vcombine.high %v1033_v42, %v1037_v6 }
 0x2b8   :  { %1816 = vmatpush1.bf16.msra.mxu1 %v5806_v10  ;;  %v5894_v10 = vcombine.low %v1033_v42, %v1037_v6  ;;  %v5903_v42 = vld [vmem:[%s8897_s2 + $0x18] sm:$0xff] }
 0x2b9   :  { %1817 = vmatprep.subr.bf16.mxu1 %v5815_v11  ;;  %v1942_v11 = vrot.slane %v1855_v9, 2 }
 0x2bc   :  { %1818 = vmatpush1.bf16.msra.mxu1 %v5814_v14 }
 0x2bd   :  { %1819 = vmatprep.subr.bf16.mxu1 %v5823_v15 }
 0x2c0   :  { %1820 = vmatpush1.bf16.msra.mxu1 %v5822_v20 }
 0x2c1   :  { %1821 = vmatprep.subr.bf16.mxu1 %v5831_v21 }
 0x2c4   :  { %1822 = vmatpush1.bf16.msra.mxu1 %v5830_v29 }
 0x2c5   :  { %1823 = vmatprep.subr.bf16.mxu1 %v5839_v32 }
 0x2c8   :  { %1824 = vmatpush1.bf16.msra.mxu1 %v5838_v44 }
 0x2c9   :  { %1825 = vmatprep.subr.bf16.mxu1 %v5847_v45 }
 0x2cc   :  { %1826 = vmatpush1.bf16.msra.mxu1 %v5846_v49 }
 0x2cd   :  { %1827 = vmatprep.subr.bf16.mxu1 %v5855_v50  ;;  %v2036_v50 = vld [vmem:[%s8897_s2] sm:$0xff] }
 0x2d0   :  { %1828 = vmatpush1.bf16.msra.mxu1 %v5854_v54 }
 0x2d1   :  { %1829 = vmatprep.subr.bf16.mxu1 %v5863_v55  ;;  %v7996_v55 = vld [vmem:[%s8896_s1] sm:$0xff] }
 0x2d2   :  { %vm906_vm1 = vcmp.gt.f32.partialorder %v7996_v55, 0.0  ;;  %v3544_v55 = vld [vmem:[%s8898_s3] sm:$0xff] }
 0x2d4   :  { %1830 = vmatpush1.bf16.msra.mxu1 %v5862_v59 }
 0x2d5   :  { %1831 = vmatprep.subr.bf16.mxu1 %v5871_v60 }
 0x2d8   :  { %1832 = vmatpush1.bf16.msra.mxu1 %v5870_v63 }
 0x2d9   :  { %1833 = vmatprep.subr.bf16.mxu1 %v5879_v1 }
 0x2dc   :  { %1834 = vmatpush1.bf16.msra.mxu1 %v5878_v4 }
 0x2dd   :  { %1835 = vmatprep.subr.bf16.mxu1 %v5887_v5 }
 0x2e0   :  { %1836 = vmatpush1.bf16.msra.mxu1 %v5886_v7 }
 0x2e1   :  { %1837 = vmatprep.subr.bf16.mxu1 %v5895_v8  ;;  %v8014_v8 = vld [vmem:[%s8896_s1 + $0x8] sm:$0xff] }
 0x2e2   :  { %vm907_vm6 = vcmp.gt.f32.partialorder %v8014_v8, 0.0  ;;  %v6795_v8 = vld [vmem:[%s8906_s11 + $0x40] sm:$0xff]  }
 0x2e4   :  { %1838 = vmatpush1.bf16.msra.mxu1 %v5894_v10 }
 0x2e5   :  { %1945 = vmatprep.subr.mxu1 %v1942_v11 }
 0x2e7   :  { %1840 = vmatmul.mubr.bf16.vlgmr.msra.gmra.mrb[12].mxu1 %v7736_v43 }
 0x2e8   :  { %2009 = vmatprep.mubr.f32.mxu1 %v7718_v37 }
 0x2ed   :  { %1946 = vmatpush1.xpose.msra.mxu1 %v1941_v13 }
 0x2f0   :  { %2010 = vmatmul.mubr.f32.vlgmr.msra.gmra.mrb[16].mxu1 %v7722_v39 }
 0x2f1   :  { %2014 = vmatprep.mubr.f32.mxu1 %v7720_v38 }
 0x2f4   :  { %2015 = vmatmul.mubr.f32.gmra.mrb[18].mxu1 %v7716_v35 }
 0x33a   :  { %v1712_v14 = vpop.f32.mrb[4].mxu1 }
 0x33b   :  { %v7952_v15 = vpop.f32.mrb[8].mxu0  ;;  %v1714_v17 = vpop.f32.mrb[5].mxu1 }
 0x33c   :  { %v7954_v18 = vpop.f32.mrb[9].mxu0  ;;  %v1716_v20 = vpop.f32.mrb[6].mxu1 }
 0x33d   :  { %v6523_v21 = vpack.c.bf16 %v1716_v20, %v1712_v14  ;;  %v7956_v22 = vpop.f32.mrb[10].mxu0  ;;  %v1718_v43 = vpop.f32.mrb[7].mxu1 }
 0x33e   :  { %v6531_v37 = vpack.c.bf16 %v7956_v22, %v7952_v15  ;;  %v6521_v23 = vpack.c.bf16 %v1718_v43, %v1714_v17  ;;  %v7960_v39 = vpop.f32.mrb[11].mxu0 }
 0x33f   :  { %v6529_v35 = vpack.c.bf16 %v7960_v39, %v7954_v18 }
 0x340   :  { %6522 = vmatprep.subr.bf16.mxu0 %v6521_v23 }
 0x341   :  { %6524 = vmatpush1.bf16.msra.mxu0 %v6523_v21 }
 0x370   :  { %v7964_v29 = vpop.f32.mrb[12].mxu0 }
 0x371   :  { %v1937_v30 = vpop.f32.mrb[13].mxu0  ;;  %v2033_v49 = vrot.slane %v7964_v29, %v7467_v52  ;;  %v2225_v54 = vrot.slane %v7964_v29, %v7479_v56 }
 0x37a   :  { %v1755_v38 = vpop.f32.mrb[8].mxu1 }
 0x37b   :  { %v1757_v24 = vpop.f32.mrb[9].mxu1 }
 0x37c   :  { %v1759_v25 = vpop.f32.mrb[10].mxu1 }
 0x37d   :  { %v6527_v26 = vpack.c.bf16 %v1759_v25, %v1755_v38  ;;  %v1761_v27 = vpop.f32.mrb[11].mxu1 }
 0x37e   :  { %v6525_v28 = vpack.c.bf16 %v1761_v27, %v1757_v24  ;;  %v7157_v27 = vmov 2  }
 0x380   :  { %6526 = vmatprep.subr.bf16.mxu1 %v6525_v28 }
 0x381   :  { %6528 = vmatpush1.bf16.msra.mxu1 %v6527_v26  ;;  %v7156_v26 = vmov 3  }
 0x3ba   :  { %v7966_v31 = vpop.f32.mrb[12].mxu1 }
 0x3bb   :  { %v7968_v32 = vpop.f32.mrb[13].mxu1 }
 0x3bc   :  { %v7970_v33 = vpop.f32.mrb[14].mxu1 }
 0x3bd   :  { %v6535_v34 = vpack.c.bf16 %v7970_v33, %v7966_v31  ;;  %v7974_v36 = vpop.f32.mrb[15].mxu1 }
 0x3be   :  { %v6533_v40 = vpack.c.bf16 %v7974_v36, %v7968_v32 }
 0x3c3   :  { %v7978_v41 = vpop.f32.mrb[16].mxu1 }
 0x3c4   :  { %2022 = vperm.xlu0 %6577, %v7978_v41   ;;  %v2013_v44 = vpop.f32.mrb[17].mxu1 }
 0x3c7   :  { %v7981_v45 = vpop.f32.mrb[18].mxu1 }
 0x3c8   :  { %6578 = vset.pattern.permute.xlu0 %v7155_v46  ;;  %2027 = vperm.xlu1 %6579, %v7981_v45   ;;  %v2018_v48 = vpop.f32.mrb[19].mxu1 }
 0x3c9   :  { %2215 = vperm.xlu0 %6578, %v7978_v41  }
 0x3cc   :  { %6580 = vset.pattern.permute.xlu1 %v7155_v46 }
 0x3cd   :  { %2219 = vperm.xlu1 %6580, %v7981_v45   ;;  %6581 = vset.pattern.permute.xlu0 %v7157_v27 }
 0x3d1   :  { %6582 = vset.pattern.permute.xlu1 %v7156_v26 }
 0x443   :  { %v2023_v51 = vpop.permute.xlu0 %2022 }
 0x444   :  { %v2034_v53 = vadd.f32 %v2033_v49, %v2023_v51 }
 0x446   :  { %v2038_v57 = vadd.f32 %v2036_v50, %v2034_v53 }
 0x447   :  { %v2028_v59 = vpop.permute.xlu1 %2027 }
 0x448   :  { %v2035_v60 = vadd.f32 %v2033_v49, %v2028_v59  ;;  %v2216_v62 = vpop.permute.xlu0 %2215  ;;  %vm2040_vm2 = vcmp.gt.f32.partialorder %v2038_v57, 0.0  ;;  %v2042_v63 = vmul.f32 0.2, %v2038_v57 }
 0x449   :  { %v2226_v1 = vadd.f32 %v2225_v54, %v2216_v62 }
 0x44a   :  { %v2039_v2 = vadd.f32 %v2037_v58, %v2035_v60  ;;  %v2044_v3 = vsel %vm2040_vm2, %v2038_v57, %v2042_v63 }
 0x44b   :  { %v2231_v4 = vadd.f32 %v5902_v61, %v2226_v1  ;;  %v2046_v5 = vsel %vm906_vm1, %v2044_v3, -1e+30 }
 0x44c   :  { %v2220_v6 = vpop.permute.xlu1 %2219  ;;  %v2049_v7 = vsel %vm2048_vm3, %v2046_v5, -inf  ;;  %vm2041_vm4 = vcmp.gt.f32.partialorder %v2039_v2, 0.0  ;;  %v2043_v9 = vmul.f32 0.2, %v2039_v2 }
 0x44d   :  { %v2227_v10 = vadd.f32 %v2225_v54, %v2220_v6  ;;  %2050 = vmax.xlane.f32.xlu1 %v2049_v7  ;;  %vm2233_vm5 = vcmp.gt.f32.partialorder %v2231_v4, 0.0  ;;  %v2235_v11 = vmul.f32 0.2, %v2231_v4  ;;  %v6730_v7 = vld [vmem:[%s8904_s9 + $0xc0] sm:$0xff]  }
 0x44e   :  { %v2045_v14 = vsel %vm2041_vm4, %v2039_v2, %v2043_v9  ;;  %v7158_v9 = vmov 0.0   ;;  %6184 = vmatprep.subr.bf16.mxu0 %v6730_v7 }
 0x44f   :  { %v2232_v12 = vadd.f32 %v5903_v42, %v2227_v10  ;;  %v2237_v13 = vsel %vm2233_vm5, %v2231_v4, %v2235_v11  ;;  %v2047_v43 = vsel %vm907_vm6, %v2045_v14, -1e+30  ;;  %2143 = vmatprep.mubr.f32.mxu0 %v7158_v9  ;;  %2335 = vmatprep.mubr.f32.mxu1 %v7158_v9  ;;  %v6734_v10 = vld [vmem:[%s8904_s9 + $0x40] sm:$0xff]  }
 0x450   :  { %v2239_v17 = vsel %vm906_vm1, %v2237_v13, -1e+30  ;;  %v2052_v24 = vsel %vm2048_vm3, %v2047_v43, -inf  ;;  %6206 = vmatprep.subr.bf16.mxu1 %v6734_v10 }
 0x451   :  { %v2241_v20 = vsel %vm2048_vm3, %v2239_v17, -inf  ;;  %vm2234_vm7 = vcmp.gt.f32.partialorder %v2232_v12, 0.0  ;;  %v2236_v21 = vmul.f32 0.2, %v2232_v12 }
 0x452   :  { %2242 = vmax.xlane.f32.xlu0 %v2241_v20 }
 0x453   :  { %v2238_v23 = vsel %vm2234_vm7, %v2232_v12, %v2236_v21  ;;  %v6732_v21 = vld [vmem:[%s8904_s9 + $0xc8] sm:$0xff]  }
 0x454   :  { %v2240_v38 = vsel %vm907_vm6, %v2238_v23, -1e+30 }
 0x455   :  { %v2244_v25 = vsel %vm2048_vm3, %v2240_v38, -inf }
 0x456   :  { %2053 = vmax.xlane.f32.xlu0 %v2052_v24  ;;  %2245 = vmax.xlane.f32.xlu1 %v2244_v25  ;;  %v6733_v24 = vld [vmem:[%s8904_s9 + $0x88] sm:$0xff]  }
 0x4da   :  { %v2051_v28 = vpop.xlane.xlu1 %2050 }
 0x4db   :  { %v2055_v30 = vsub.f32 %v2046_v5, %v2051_v28 }
 0x4dd   :  { %v2057_v44 = vmul.f32 1.442695, %v2055_v30 }
 0x4df   :  { %6978 = vpow2.f32 %v2057_v44  ;;  %v2243_v46 = vpop.xlane.xlu0 %2242  ;;  %v5942_v44 = vld [vmem:[%s8897_s2 + $0x20] sm:$0xff] }
 0x4e0   :  { %v2247_v48 = vsub.f32 %v2239_v17, %v2243_v46 }
 0x4e2   :  { %v2249_v49 = vmul.f32 1.442695, %v2247_v48 }
 0x4e3   :  { %v2054_v50 = vpop.xlane.xlu0 %2053  ;;  %v2246_v51 = vpop.xlane.xlu1 %2245 }
 0x4e4   :  { %6980 = vpow2.f32 %v2249_v49  ;;  %v2056_v53 = vsub.f32 %v2047_v43, %v2054_v50  ;;  %v2248_v54 = vsub.f32 %v2240_v38, %v2246_v51  ;;  %v5966_v43 = vld [vmem:[%s8897_s2 + $0x30] sm:$0xff] }
 0x4e5   :  { %v6737_v50 = vld [vmem:[%s8904_s9 + $0x90] sm:$0xff]  }
 0x4e6   :  { %v2059_v57 = vmul.f32 1.442695, %v2056_v53  ;;  %v2251_v58 = vmul.f32 1.442695, %v2248_v54 }
 0x4e8   :  { %6982 = vpow2.f32 %v2059_v57 }
 0x4e9   :  { %v6979_v59 = vpop.eup %6978  ;;  %6984 = vpow2.f32 %v2251_v58 }
 0x4ea   :  { %v2061_v60 = vsel %vm906_vm1, %v6979_v59, 0.0 }
 0x4eb   :  { %v2063_v61 = vsel %vm2048_vm3, %v2061_v60, 0.0 }
 0x4ec   :  { %2064 = vadd.xlane.f32.xlu0 %v2063_v61 }
 0x4ee   :  { %v6981_v62 = vpop.eup %6980 }
 0x4ef   :  { %v2253_v63 = vsel %vm906_vm1, %v6981_v62, 0.0  ;;  %v6740_v62 = vld [vmem:[%s8904_s9 + $0xd8] sm:$0xff]  }
 0x4f0   :  { %v2255_v1 = vsel %vm2048_vm3, %v2253_v63, 0.0 }
 0x4f1   :  { %2256 = vadd.xlane.f32.xlu1 %v2255_v1 }
 0x4f2   :  { %v6983_v2 = vpop.eup %6982 }
 0x4f3   :  { %v6985_v3 = vpop.eup %6984  ;;  %v8034_v4 = vsel %vm907_vm6, %v6983_v2, 0.0  ;;  %v6742_v2 = vld [vmem:[%s8904_s9 + $0x50] sm:$0xff]  }
 0x4f4   :  { %v2066_v5 = vsel %vm2048_vm3, %v8034_v4, 0.0  ;;  %v8040_v42 = vsel %vm907_vm6, %v6985_v3, 0.0 }
 0x4f5   :  { %2067 = vadd.xlane.f32.xlu0 %v2066_v5  ;;  %v2258_v6 = vsel %vm2048_vm3, %v8040_v42, 0.0 }
 0x4f6   :  { %2259 = vadd.xlane.f32.xlu1 %v2258_v6 }
 0x507   :  { %3012 = vperm.xlu1 %6582, %v7978_v41  }
 0x50b   :  { %6583 = vset.pattern.permute.xlu1 %v7157_v27  ;;  %2681 = vperm.xlu0 %6581, %v7978_v41   ;;  %v6731_v41 = vld [vmem:[%s8904_s9 + $0x80] sm:$0xff]   ;;  %v6736_v27 = vld [vmem:[%s8904_s9 + $0xd0] sm:$0xff]  }
 0x50c   :  { %2685 = vperm.xlu1 %6583, %v7981_v45  }
 0x50f   :  { %6585 = vset.pattern.permute.xlu0 %v7156_v26 }
 0x510   :  { %6584 = vset.pattern.permute.xlu1 %v7156_v26  ;;  %v6735_v26 = vld [vmem:[%s8904_s9] sm:$0xff]  }
 0x511   :  { %3016 = vperm.xlu1 %6584, %v7981_v45   ;;  %v3022_v45 = vrot.slane %v7964_v29, %v157_v19  ;;  %v2691_v19 = vrot.slane %v7964_v29, %v153_v16  ;;  %v5943_v29 = vld [vmem:[%s8897_s2 + $0x28] sm:$0xff] }
 0x579   :  { %v2065_v11 = vpop.xlane.xlu0 %2064 }
 0x57a   :  { %6986 = vrcp.f32 %v2065_v11 }
 0x57e   :  { %v2257_v12 = vpop.xlane.xlu1 %2256 }
 0x57f   :  { %6988 = vrcp.f32 %v2257_v12  ;;  %v6744_v12 = vld [vmem:[%s8904_s9 + $0xe0] sm:$0xff]  }
 0x582   :  { %v2068_v13 = vpop.xlane.xlu0 %2067 }
 0x583   :  { %6990 = vrcp.f32 %v2068_v13  ;;  %v2260_v14 = vpop.xlane.xlu1 %2259 }
 0x584   :  { %v6987_v17 = vpop.eup %6986  ;;  %6992 = vrcp.f32 %v2260_v14  ;;  %v6743_v14 = vld [vmem:[%s8904_s9 + $0x10] sm:$0xff]  }
 0x585   :  { %v2071_v20 = vmul.f32 %v6987_v17, %v2061_v60  ;;  %v6739_v60 = vld [vmem:[%s8904_s9 + $0x8] sm:$0xff]  }
 0x587   :  { %v3013_v23 = vpop.permute.xlu1 %3012  ;;  %5896 = vmatmul.mubr.msk.f32.vlgmr.msra.gmra.mrb[14].mxu0 %vm2048_vm3, %v2071_v20 }
 0x588   :  { %v3023_v38 = vadd.f32 %v3022_v45, %v3013_v23  ;;  %6185 = vmatpush3.bf16.msra.mxu0 %v6731_v41  ;;  %2149 = vmatprep.mubr.f32.mxu0 %v7158_v9  ;;  %v6748_v23 = vld [vmem:[%s8904_s9 + $0xe8] sm:$0xff]  }
 0x589   :  { %v6989_v25 = vpop.eup %6988  ;;  %6186 = vmatprep.subr.bf16.mxu0 %v6732_v21  ;;  %v6746_v21 = vld [vmem:[%s8904_s9 + $0x58] sm:$0xff]  }
 0x58a   :  { %v2263_v28 = vmul.f32 %v6989_v25, %v2253_v63  ;;  %v3028_v30 = vadd.f32 %v5966_v43, %v3023_v38  ;;  %v2682_v46 = vpop.permute.xlu0 %2681 }
 0x58b   :  { %v2692_v16 = vadd.f32 %v2691_v19, %v2682_v46  ;;  %v2686_v48 = vpop.permute.xlu1 %2685 }
 0x58c   :  { %v2693_v49 = vadd.f32 %v2691_v19, %v2686_v48  ;;  %6187 = vmatpush3.bf16.msra.mxu0 %v6733_v24  ;;  %5904 = vmatmul.mubr.msk.f32.vlgmr.msra.gmra.mrb[20].mxu1 %vm2048_vm3, %v2263_v28  ;;  %vm3030_vm8 = vcmp.gt.f32.partialorder %v3028_v30, 0.0  ;;  %v3032_v51 = vmul.f32 0.2, %v3028_v30  ;;  %v6747_v24 = vld [vmem:[%s8904_s9 + $0x18] sm:$0xff]   ;;  %v6750_v19 = vld [vmem:[%s8904_s9 + $0x60] sm:$0xff]   ;;  %v6755_v48 = vld [vmem:[%s8904_s9 + $0x28] sm:$0xff]  }
 0x58d   :  { %v6991_v53 = vpop.eup %6990  ;;  %v2697_v54 = vadd.f32 %v5942_v44, %v2692_v16  ;;  %6207 = vmatpush3.bf16.msra.mxu1 %v6735_v26  ;;  %6188 = vmatprep.subr.bf16.mxu0 %v6736_v27  ;;  %v6749_v27 = vld [vmem:[%s8904_s9 + $0xa8] sm:$0xff]   ;;  %v6751_v44 = vld [vmem:[%s8904_s9 + $0x20] sm:$0xff]   ;;  %v6753_v16 = vld [vmem:[%s8904_s9 + $0xb0] sm:$0xff]  }
 0x58e   :  { %v6993_v57 = vpop.eup %6992  ;;  %v2698_v58 = vadd.f32 %v5943_v29, %v2693_v49  ;;  %2341 = vmatprep.mubr.f32.mxu1 %v7158_v9  ;;  %6208 = vmatprep.subr.bf16.mxu1 %v6738_v47  ;;  %v2072_v59 = vmul.f32 %v6991_v53, %v8034_v4  ;;  %v3034_v61 = vsel %vm3030_vm8, %v3028_v30, %v3032_v51  ;;  %v5967_v4 = vld [vmem:[%s8897_s2 + $0x38] sm:$0xff]  ;;  %v6752_v30 = vld [vmem:[%s8904_s9 + $0xf0] sm:$0xff]   ;;  %v6754_v47 = vld [vmem:[%s8904_s9 + $0x68] sm:$0xff]  }
 0x58f   :  { %v2264_v63 = vmul.f32 %v6993_v57, %v8040_v42  ;;  %v8106_v1 = vsel %vm906_vm1, %v3034_v61, -1e+30  ;;  %vm2699_vm9 = vcmp.gt.f32.partialorder %v2697_v54, 0.0  ;;  %v2701_v3 = vmul.f32 0.2, %v2697_v54  ;;  %v6741_v42 = vld [vmem:[%s8904_s9 + $0x98] sm:$0xff]  }
 0x590   :  { %6189 = vmatpush3.bf16.msra.mxu0 %v6737_v50  ;;  %v3017_v5 = vpop.permute.xlu1 %3016  ;;  %v3038_v6 = vsel %vm2048_vm3, %v8106_v1, -inf  ;;  %vm2700_vm10 = vcmp.gt.f32.partialorder %v2698_v58, 0.0  ;;  %v2702_v7 = vmul.f32 0.2, %v2698_v58  ;;  %v6756_v29 = vld [vmem:[%s8904_s9 + $0xf8] sm:$0xff]   ;;  %v6758_v49 = vld [vmem:[%s8904_s9 + $0x70] sm:$0xff]  }
 0x591   :  { %v3024_v10 = vadd.f32 %v3022_v45, %v3017_v5  ;;  %5897 = vmatmul.mubr.msk.f32.gmra.mrb[16].mxu0 %vm2048_vm3, %v2072_v59  ;;  %5905 = vmatmul.mubr.msk.f32.gmra.mrb[22].mxu1 %vm2048_vm3, %v2264_v63  ;;  %v2703_v11 = vsel %vm2699_vm9, %v2697_v54, %v2701_v3  ;;  %v6745_v45 = vld [vmem:[%s8904_s9 + $0xa0] sm:$0xff]   ;;  %v6757_v50 = vld [vmem:[%s8904_s9 + $0xb8] sm:$0xff]   ;;  %v6759_v51 = vld [vmem:[%s8904_s9 + $0x30] sm:$0xff]  }
 0x592   :  { %6209 = vmatpush3.bf16.msra.mxu1 %v6739_v60  ;;  %3039 = vmax.xlane.f32.xlu0 %v3038_v6  ;;  %v2705_v13 = vsel %vm906_vm1, %v2703_v11, -1e+30  ;;  %v2704_v17 = vsel %vm2700_vm10, %v2698_v58, %v2702_v7  ;;  %v6760_v53 = vld [vmem:[%s8904_s9 + $0x78] sm:$0xff]  }
 0x593   :  { %v3029_v41 = vadd.f32 %v5967_v4, %v3024_v10  ;;  %6190 = vmatprep.subr.bf16.mxu0 %v6740_v62  ;;  %6210 = vmatprep.subr.bf16.mxu1 %v6742_v2  ;;  %v2707_v20 = vsel %vm2048_vm3, %v2705_v13, -inf  ;;  %v2706_v43 = vsel %vm907_vm6, %v2704_v17, -1e+30  ;;  %v6761_v54 = vld [vmem:[%s8904_s9 + $0x38] sm:$0xff]  }
 0x594   :  { %6191 = vmatpush3.bf16.msra.mxu0 %v6741_v42  ;;  %2708 = vmax.xlane.f32.xlu1 %v2707_v20  ;;  %v2710_v25 = vsel %vm2048_vm3, %v2706_v43, -inf }
 0x595   :  { %6192 = vmatprep.subr.bf16.mxu0 %v6744_v12  ;;  %vm3031_vm11 = vcmp.gt.f32.partialorder %v3029_v41, 0.0  ;;  %v3033_v38 = vmul.f32 0.2, %v3029_v41 }
 0x596   :  { %6211 = vmatpush3.bf16.msra.mxu1 %v6743_v14 }
 0x597   :  { %6212 = vmatprep.subr.bf16.mxu1 %v6746_v21  ;;  %v3035_v26 = vsel %vm3031_vm11, %v3029_v41, %v3033_v38 }
 0x598   :  { %6193 = vmatpush3.bf16.msra.mxu0 %v6745_v45  ;;  %2711 = vmax.xlane.f32.xlu1 %v2710_v25  ;;  %v3037_v28 = vsel %vm907_vm6, %v3035_v26, -1e+30 }
 0x599   :  { %6194 = vmatprep.subr.bf16.mxu0 %v6748_v23  ;;  %v3041_v46 = vsel %vm2048_vm3, %v3037_v28, -inf }
 0x59a   :  { %6213 = vmatpush3.bf16.msra.mxu1 %v6747_v24 }
 0x59b   :  { %6214 = vmatprep.subr.bf16.mxu1 %v6750_v19 }
 0x59c   :  { %6195 = vmatpush3.bf16.msra.mxu0 %v6749_v27  ;;  %3042 = vmax.xlane.f32.xlu1 %v3041_v46 }
 0x59d   :  { %6196 = vmatprep.subr.bf16.mxu0 %v6752_v30 }
 0x59e   :  { %6215 = vmatpush3.bf16.msra.mxu1 %v6751_v44 }
 0x59f   :  { %6216 = vmatprep.subr.bf16.mxu1 %v6754_v47 }
 0x5a0   :  { %6197 = vmatpush3.bf16.msra.mxu0 %v6753_v16 }
 0x5a1   :  { %6198 = vmatprep.subr.bf16.mxu0 %v6756_v29 }
 0x5a2   :  { %6217 = vmatpush3.bf16.msra.mxu1 %v6755_v48 }
 0x5a3   :  { %6218 = vmatprep.subr.bf16.mxu1 %v6758_v49 }
 0x5a4   :  { %6199 = vmatpush3.bf16.msra.mxu0 %v6757_v50 }
 0x5a5   :  { %6534 = vmatprep.subr.bf16.mxu0 %v6533_v40 }
 0x5a6   :  { %6219 = vmatpush3.bf16.msra.mxu1 %v6759_v51 }
 0x5a7   :  { %6220 = vmatprep.subr.bf16.mxu1 %v6760_v53 }
 0x5aa   :  { %6221 = vmatpush3.bf16.msra.mxu1 %v6761_v54 }
 0x5ab   :  { %6530 = vmatprep.subr.bf16.mxu1 %v6529_v35 }
 0x61f   :  { %v3040_v57 = vpop.xlane.xlu0 %3039 }
 0x620   :  { %v3044_v58 = vsub.f32 %v8106_v1, %v3040_v57 }
 0x621   :  { %v2709_v59 = vpop.xlane.xlu1 %2708 }
 0x622   :  { %v3046_v60 = vmul.f32 1.442695, %v3044_v58  ;;  %v2713_v61 = vsub.f32 %v2705_v13, %v2709_v59 }
 0x624   :  { %v2715_v62 = vmul.f32 1.442695, %v2713_v61  ;;  %6994 = vpow2.f32 %v3046_v60 }
 0x625   :  { %v2712_v32 = vpop.xlane.xlu1 %2711 }
 0x626   :  { %6996 = vpow2.f32 %v2715_v62  ;;  %v2714_v36 = vsub.f32 %v2706_v43, %v2712_v32 }
 0x628   :  { %v2717_v40 = vmul.f32 1.442695, %v2714_v36 }
 0x629   :  { %v3043_v63 = vpop.xlane.xlu1 %3042 }
 0x62a   :  { %6998 = vpow2.f32 %v2717_v40  ;;  %v3045_v2 = vsub.f32 %v3037_v28, %v3043_v63 }
 0x62c   :  { %v3048_v3 = vmul.f32 1.442695, %v3045_v2 }
 0x62e   :  { %7000 = vpow2.f32 %v3048_v3  ;;  %v6995_v4 = vpop.eup %6994 }
 0x62f   :  { %v8202_v1 = vsel %vm906_vm1, %v6995_v4, 0.0 }
 0x630   :  { %v6997_v18 = vpop.eup %6996  ;;  %v3052_v42 = vsel %vm2048_vm3, %v8202_v1, 0.0 }
 0x631   :  { %v8196_v39 = vsel %vm906_vm1, %v6997_v18, 0.0 }
 0x632   :  { %v2721_v35 = vsel %vm2048_vm3, %v8196_v39, 0.0 }
 0x633   :  { %2722 = vadd.xlane.f32.xlu1 %v2721_v35 }
 0x634   :  { %v6999_v5 = vpop.eup %6998 }
 0x635   :  { %v8206_v6 = vsel %vm907_vm6, %v6999_v5, 0.0 }
 0x636   :  { %v2724_v7 = vsel %vm2048_vm3, %v8206_v6, 0.0 }
 0x637   :  { %3053 = vadd.xlane.f32.xlu1 %v3052_v42  ;;  %2725 = vadd.xlane.f32.xlu0 %v2724_v7 }
 0x638   :  { %v7001_v10 = vpop.eup %7000 }
 0x639   :  { %v8214_v11 = vsel %vm907_vm6, %v7001_v10, 0.0 }
 0x63a   :  { %v3055_v12 = vsel %vm2048_vm3, %v8214_v11, 0.0 }
 0x63b   :  { %3056 = vadd.xlane.f32.xlu1 %v3055_v12 }
 0x65a   :  { %v2145_v13 = vpop.f32.mrb[14].mxu0 }
 0x65b   :  { %v2147_v14 = vpop.f32.mrb[15].mxu0  ;;  %v2160_v17 = vmin.f32 %v2145_v13, 0.0  ;;  %vm2156_vm12 = vcmp.gt.f32.partialorder %v2145_v13, 0.0 }
 0x65c   :  { %v2161_v41 = vmin.f32 %v2147_v14, 0.0  ;;  %vm2157_vm13 = vcmp.gt.f32.partialorder %v2147_v14, 0.0 }
 0x65d   :  { %v2164_v43 = vmul.f32 1.442695, %v2160_v17 }
 0x65e   :  { %v2166_v24 = vmul.f32 1.442695, %v2161_v41 }
 0x65f   :  { %v2337_v20 = vpop.f32.mrb[20].mxu1  ;;  %7002 = vpow2.f32 %v2164_v43 }
 0x660   :  { %v2352_v21 = vmin.f32 %v2337_v20, 0.0  ;;  %v2339_v45 = vpop.f32.mrb[21].mxu1  ;;  %vm2348_vm14 = vcmp.gt.f32.partialorder %v2337_v20, 0.0 }
 0x661   :  { %v2353_v23 = vmin.f32 %v2339_v45, 0.0  ;;  %vm2349_vm15 = vcmp.gt.f32.partialorder %v2339_v45, 0.0 }
 0x662   :  { %v2356_v38 = vmul.f32 1.442695, %v2352_v21 }
 0x663   :  { %v2358_v25 = vmul.f32 1.442695, %v2353_v23 }
 0x664   :  { %v2151_v19 = vpop.f32.mrb[16].mxu0  ;;  %v2343_v26 = vpop.f32.mrb[22].mxu1  ;;  %7004 = vpow2.f32 %v2356_v38 }
 0x665   :  { %v2162_v27 = vmin.f32 %v2151_v19, 0.0  ;;  %v2153_v28 = vpop.f32.mrb[17].mxu0  ;;  %v2345_v30 = vpop.f32.mrb[23].mxu1  ;;  %v2354_v44 = vmin.f32 %v2343_v26, 0.0  ;;  %7006 = vpow2.f32 %v2166_v24  ;;  %vm2158_vm2 = vcmp.gt.f32.partialorder %v2151_v19, 0.0  ;;  %v6763_v24 = vld [vmem:[%s8904_s9 + $0x100] sm:$0xff]  }
 0x666   :  { %v2163_v46 = vmin.f32 %v2153_v28, 0.0  ;;  %v2355_v16 = vmin.f32 %v2345_v30, 0.0  ;;  %7008 = vpow2.f32 %v2358_v25  ;;  %vm2350_vm4 = vcmp.gt.f32.partialorder %v2343_v26, 0.0  ;;  %v6767_v25 = vld [vmem:[%s8904_s9 + $0x180] sm:$0xff]  }
 0x667   :  { %v2168_v47 = vmul.f32 1.442695, %v2162_v27  ;;  %v2360_v29 = vmul.f32 1.442695, %v2354_v44  ;;  %vm2159_vm5 = vcmp.gt.f32.partialorder %v2153_v28, 0.0  ;;  %vm2351_vm7 = vcmp.gt.f32.partialorder %v2345_v30, 0.0 }
 0x668   :  { %v2170_v48 = vmul.f32 1.442695, %v2163_v46  ;;  %v2362_v49 = vmul.f32 1.442695, %v2355_v16  ;;  %v6770_v27 = vld [vmem:[%s8904_s9 + $0x110] sm:$0xff]   ;;  %v6774_v46 = vld [vmem:[%s8904_s9 + $0x118] sm:$0xff]  }
 0x669   :  { %7010 = vpow2.f32 %v2168_v47  ;;  %v7003_v50 = vpop.eup %7002  ;;  %v6773_v44 = vld [vmem:[%s8904_s9 + $0x1d0] sm:$0xff]   ;;  %v6776_v16 = vld [vmem:[%s8904_s9 + $0x160] sm:$0xff]  }
 0x66a   :  { %7012 = vpow2.f32 %v2360_v29  ;;  %v5898_v57 = vadd.f32 -1.0, %v7003_v50  ;;  %v6775_v47 = vld [vmem:[%s8904_s9 + $0x190] sm:$0xff]   ;;  %v6777_v29 = vld [vmem:[%s8904_s9 + $0x1d8] sm:$0xff]   ;;  %v6780_v50 = vld [vmem:[%s8904_s9 + $0x168] sm:$0xff]  }
 0x66b   :  { %7014 = vpow2.f32 %v2170_v48  ;;  %v6778_v48 = vld [vmem:[%s8904_s9 + $0x120] sm:$0xff]  }
 0x66c   :  { %7016 = vpow2.f32 %v2362_v49  ;;  %v2176_v2 = vsel %vm2156_vm12, %v2145_v13, %v5898_v57  ;;  %v6779_v49 = vld [vmem:[%s8904_s9 + $0x198] sm:$0xff]   ;;  %v6784_v57 = vld [vmem:[%s8904_s9 + $0x170] sm:$0xff]  }
 0x66e   :  { %v7005_v51 = vpop.eup %7004 }
 0x66f   :  { %v7007_v53 = vpop.eup %7006  ;;  %v5906_v59 = vadd.f32 -1.0, %v7005_v51  ;;  %v6781_v51 = vld [vmem:[%s8904_s9 + $0x1e0] sm:$0xff]  }
 0x670   :  { %v7009_v54 = vpop.eup %7008  ;;  %v5899_v61 = vadd.f32 -1.0, %v7007_v53  ;;  %v6782_v53 = vld [vmem:[%s8904_s9 + $0x128] sm:$0xff]  }
 0x671   :  { %v5907_v36 = vadd.f32 -1.0, %v7009_v54  ;;  %v2368_v18 = vsel %vm2348_vm14, %v2337_v20, %v5906_v59  ;;  %v6783_v54 = vld [vmem:[%s8904_s9 + $0x1a0] sm:$0xff]   ;;  %v6786_v59 = vld [vmem:[%s8904_s9 + $0x130] sm:$0xff]  }
 0x672   :  { %v2177_v7 = vsel %vm2157_vm13, %v2147_v14, %v5899_v61  ;;  %v6788_v61 = vld [vmem:[%s8904_s9 + $0x178] sm:$0xff]  }
 0x673   :  { %v7011_v58 = vpop.eup %7010  ;;  %v2369_v17 = vsel %vm2349_vm15, %v2339_v45, %v5907_v36  ;;  %v6791_v36 = vld [vmem:[%s8904_s9 + $0x1b0] sm:$0xff]  }
 0x674   :  { %v7013_v60 = vpop.eup %7012  ;;  %v5900_v62 = vadd.f32 -1.0, %v7011_v58  ;;  %v6785_v58 = vld [vmem:[%s8904_s9 + $0x1e8] sm:$0xff]  }
 0x675   :  { %v7015_v32 = vpop.eup %7014  ;;  %v5908_v40 = vadd.f32 -1.0, %v7013_v60  ;;  %v6787_v60 = vld [vmem:[%s8904_s9 + $0x1a8] sm:$0xff]  }
 0x676   :  { %v7017_v63 = vpop.eup %7016  ;;  %v2178_v3 = vsel %vm2158_vm2, %v2151_v19, %v5900_v62  ;;  %v5901_v4 = vadd.f32 -1.0, %v7015_v32  ;;  %v6768_v19 = vld [vmem:[%s8904_s9 + $0x150] sm:$0xff]   ;;  %v6790_v32 = vld [vmem:[%s8904_s9 + $0x138] sm:$0xff]   ;;  %vm7160_vm2 = vmmov 0  }
 0x677   :  { %v2212_v35 = vpack.c.bf16 %v2178_v3, %v2176_v2  ;;  %v2370_v5 = vsel %vm2350_vm4, %v2343_v26, %v5908_v40  ;;  %v5909_v42 = vadd.f32 -1.0, %v7017_v63  ;;  %v6769_v26 = vld [vmem:[%s8904_s9 + $0x1c8] sm:$0xff]   ;;  %v6789_v62 = vld [vmem:[%s8904_s9 + $0x1f0] sm:$0xff]   ;;  %v6792_v40 = vld [vmem:[%s8904_s9 + $0x1f8] sm:$0xff]  }
 0x678   :  { %v2404_v10 = vpack.c.bf16 %v2370_v5, %v2368_v18  ;;  %v2179_v12 = vsel %vm2159_vm5, %v2153_v28, %v5901_v4  ;;  %v6771_v28 = vld [vmem:[%s8904_s9 + $0x188] sm:$0xff]   ;;  %v6793_v63 = vld [vmem:[%s8904_s9 + $0x1b8] sm:$0xff]  }
 0x679   :  { %v2371_v41 = vsel %vm2351_vm7, %v2345_v30, %v5909_v42  ;;  %v2213_v21 = vpack.c.bf16 %v2179_v12, %v2177_v7  ;;  %v6772_v30 = vld [vmem:[%s8904_s9 + $0x158] sm:$0xff]  }
 0x67a   :  { %v2405_v43 = vpack.c.bf16 %v2371_v41, %v2369_v17 }
 0x67b   :  { %2671 = vmatprep.mubr.bf16.mxu1 %v2213_v21 }
 0x67c   :  { %2534 = vmatprep.mubr.bf16.mxu0 %v2405_v43  ;;  %2672 = vmatmul.mubr.bf16.vlgmr.msra.gmra.mrb[24].mxu1 %v2212_v35 }
 0x67d   :  { %2535 = vmatmul.mubr.bf16.vlgmr.msra.gmra.mrb[20].mxu0 %v2404_v10  ;;  %6532 = vmatpush1.bf16.msra.mxu1 %v6531_v37 }
 0x67e   :  { %6536 = vmatpush1.bf16.msra.mxu0 %v6535_v34  ;;  %2801 = vmatprep.mubr.f32.mxu1 %v7158_v9 }
 0x67f   :  { %3132 = vmatprep.mubr.f32.mxu0 %v7158_v9 }
 0x6c0   :  { %v2723_v13 = vpop.xlane.xlu1 %2722 }
 0x6c1   :  { %7018 = vrcp.f32 %v2723_v13 }
 0x6c4   :  { %v2726_v14 = vpop.xlane.xlu0 %2725  ;;  %v3054_v20 = vpop.xlane.xlu1 %3053 }
 0x6c5   :  { %7020 = vrcp.f32 %v2726_v14 }
 0x6c6   :  { %7022 = vrcp.f32 %v3054_v20 }
 0x6c8   :  { %v3057_v45 = vpop.xlane.xlu1 %3056 }
 0x6c9   :  { %7024 = vrcp.f32 %v3057_v45 }
 0x6cb   :  { %v7019_v23 = vpop.eup %7018 }
 0x6cc   :  { %v2729_v15 = vmul.f32 %v7019_v23, %v8196_v39  ;;  %v6762_v39 = vld [vmem:[%s8904_s9 + $0x140] sm:$0xff]  }
 0x6cd   :  { %6228 = vmatprep.subr.bf16.mxu1 %v6762_v39 }
 0x6ce   :  { %5944 = vmatmul.mubr.msk.f32.vlgmr.msra.gmra.mrb[28].mxu1 %vm2048_vm3, %v2729_v15 }
 0x6cf   :  { %v7021_v22 = vpop.eup %7020  ;;  %2807 = vmatprep.mubr.f32.mxu1 %v7158_v9  ;;  %6229 = vmatpush3.bf16.msra.mxu1 %v6763_v24 }
 0x6d0   :  { %v7023_v37 = vpop.eup %7022  ;;  %v2730_v31 = vmul.f32 %v7021_v22, %v8206_v6  ;;  %v6765_v6 = vld [vmem:[%s8904_s9 + $0x1c0] sm:$0xff]  }
 0x6d1   :  { %v3060_v33 = vmul.f32 %v7023_v37, %v8202_v1  ;;  %v6764_v1 = vld [vmem:[%s8904_s9 + $0x148] sm:$0xff]   ;;  %6250 = vmatprep.subr.bf16.mxu0 %v6765_v6 }
 0x6d2   :  { %5945 = vmatmul.mubr.msk.f32.gmra.mrb[30].mxu1 %vm2048_vm3, %v2730_v31  ;;  %6230 = vmatprep.subr.bf16.mxu1 %v6764_v1 }
 0x6d3   :  { %v7025_v34 = vpop.eup %7024  ;;  %5968 = vmatmul.mubr.msk.f32.vlgmr.msra.gmra.mrb[18].mxu0 %vm2048_vm3, %v3060_v33 }
 0x6d4   :  { %3138 = vmatprep.mubr.f32.mxu0 %v7158_v9  ;;  %v3061_v38 = vmul.f32 %v7025_v34, %v8214_v11  ;;  %v6766_v11 = vld [vmem:[%s8904_s9 + $0x108] sm:$0xff]   ;;  %6251 = vmatpush3.bf16.msra.mxu0 %v6767_v25 }
 0x6d5   :  { %6231 = vmatpush3.bf16.msra.mxu1 %v6766_v11  ;;  %6252 = vmatprep.subr.bf16.mxu0 %v6769_v26 }
 0x6d6   :  { %6232 = vmatprep.subr.bf16.mxu1 %v6768_v19 }
 0x6d7   :  { %5969 = vmatmul.mubr.msk.f32.gmra.mrb[24].mxu0 %vm2048_vm3, %v3061_v38 }
 0x6d8   :  { %6253 = vmatpush3.bf16.msra.mxu0 %v6771_v28 }
 0x6d9   :  { %6233 = vmatpush3.bf16.msra.mxu1 %v6770_v27  ;;  %6254 = vmatprep.subr.bf16.mxu0 %v6773_v44 }
 0x6da   :  { %6234 = vmatprep.subr.bf16.mxu1 %v6772_v30 }
 0x6dc   :  { %6255 = vmatpush3.bf16.msra.mxu0 %v6775_v47 }
 0x6dd   :  { %6235 = vmatpush3.bf16.msra.mxu1 %v6774_v46  ;;  %6256 = vmatprep.subr.bf16.mxu0 %v6777_v29 }
 0x6de   :  { %6236 = vmatprep.subr.bf16.mxu1 %v6776_v16 }
 0x6e0   :  { %6257 = vmatpush3.bf16.msra.mxu0 %v6779_v49 }
 0x6e1   :  { %6237 = vmatpush3.bf16.msra.mxu1 %v6778_v48  ;;  %6258 = vmatprep.subr.bf16.mxu0 %v6781_v51 }
 0x6e2   :  { %6238 = vmatprep.subr.bf16.mxu1 %v6780_v50 }
 0x6e4   :  { %6259 = vmatpush3.bf16.msra.mxu0 %v6783_v54 }
 0x6e5   :  { %6239 = vmatpush3.bf16.msra.mxu1 %v6782_v53  ;;  %6260 = vmatprep.subr.bf16.mxu0 %v6785_v58 }
 0x6e6   :  { %6240 = vmatprep.subr.bf16.mxu1 %v6784_v57 }
 0x6e8   :  { %6261 = vmatpush3.bf16.msra.mxu0 %v6787_v60 }
 0x6e9   :  { %6241 = vmatpush3.bf16.msra.mxu1 %v6786_v59  ;;  %6262 = vmatprep.subr.bf16.mxu0 %v6789_v62 }
 0x6ea   :  { %6242 = vmatprep.subr.bf16.mxu1 %v6788_v61 }
 0x6ec   :  { %6263 = vmatpush3.bf16.msra.mxu0 %v6791_v36 }
 0x6ed   :  { %6243 = vmatpush3.bf16.msra.mxu1 %v6790_v32  ;;  %6264 = vmatprep.subr.bf16.mxu0 %v6792_v40 }
 0x6f0   :  { %6265 = vmatpush3.bf16.msra.mxu0 %v6793_v63 }
 0x6f1   :  { %6295 = vmatprep.subr.bf16.mxu0 %v6795_v8  ;;  %v6861_v8 = vld [vmem:[%s8906_s11 + $0x210] sm:$0xff]  }
 0x74f   :  { %v6222_v2 = vpop.f32.mrb[24].mxu1 }
 0x750   :  { %v6200_v3 = vpop.f32.mrb[20].mxu0  ;;  %v6223_v4 = vpop.f32.mrb[25].mxu1 }
 0x751   :  { %v6201_v18 = vpop.f32.mrb[21].mxu0  ;;  %v6224_v35 = vadd.f32 %v6223_v4, %v6222_v2  ;;  %v6225_v5 = vpop.f32.mrb[26].mxu1 }
 0x752   :  { %v6202_v42 = vadd.f32 %v6201_v18, %v6200_v3  ;;  %v6203_v7 = vpop.f32.mrb[22].mxu0  ;;  %v6226_v10 = vpop.f32.mrb[27].mxu1 }
 0x753   :  { %v6204_v12 = vpop.f32.mrb[23].mxu0  ;;  %v6227_v17 = vadd.f32 %v6226_v10, %v6225_v5  ;;  %v7159_v10 = vmov 0.0|0.0  }
 0x754   :  { %v8334_v41 = vadd.f32 %v6224_v35, %v6202_v42  ;;  %v6205_v21 = vadd.f32 %v6204_v12, %v6203_v7  ;;  %6537 = vmatprep.subr.bf16.mxu1 %v7159_v10 }
 0x756   :  { %v8336_v43 = vadd.f32 %v6227_v17, %v6205_v21 }
 0x7a1   :  { %v2803_v13 = vpop.f32.mrb[28].mxu1 }
 0x7a2   :  { %v2818_v14 = vmin.f32 %v2803_v13, 0.0  ;;  %v2805_v20 = vpop.f32.mrb[29].mxu1  ;;  %vm2814_vm8 = vcmp.gt.f32.partialorder %v2803_v13, 0.0 }
 0x7a3   :  { %v2819_v45 = vmin.f32 %v2805_v20, 0.0  ;;  %vm2815_vm10 = vcmp.gt.f32.partialorder %v2805_v20, 0.0 }
 0x7a4   :  { %v2822_v23 = vmul.f32 1.442695, %v2818_v14 }
 0x7a5   :  { %v2824_v15 = vmul.f32 1.442695, %v2819_v45  ;;  %v2809_v22 = vpop.f32.mrb[30].mxu1 }
 0x7a6   :  { %7026 = vpow2.f32 %v2822_v23  ;;  %v2820_v37 = vmin.f32 %v2809_v22, 0.0  ;;  %v3134_v31 = vpop.f32.mrb[18].mxu0  ;;  %v2811_v33 = vpop.f32.mrb[31].mxu1  ;;  %vm2816_vm9 = vcmp.gt.f32.partialorder %v2809_v22, 0.0 }
 0x7a7   :  { %v3149_v34 = vmin.f32 %v3134_v31, 0.0  ;;  %v3136_v38 = vpop.f32.mrb[19].mxu0  ;;  %7028 = vpow2.f32 %v2824_v15  ;;  %v2821_v24 = vmin.f32 %v2811_v33, 0.0  ;;  %vm2817_vm11 = vcmp.gt.f32.partialorder %v2811_v33, 0.0 }
 0x7a8   :  { %v2826_v39 = vmul.f32 1.442695, %v2820_v37  ;;  %v3150_v1 = vmin.f32 %v3136_v38, 0.0  ;;  %vm3145_vm12 = vcmp.gt.f32.partialorder %v3134_v31, 0.0  ;;  %vm3146_vm14 = vcmp.gt.f32.partialorder %v3136_v38, 0.0 }
 0x7a9   :  { %v3153_v6 = vmul.f32 1.442695, %v3149_v34  ;;  %v2828_v11 = vmul.f32 1.442695, %v2821_v24  ;;  %v3343_v34 = vld [vmem:[%s8909_s14 + $0x27] ss:$0 sm:$0xff] }
 0x7aa   :  { %7030 = vpow2.f32 %v2826_v39  ;;  %v3155_v25 = vmul.f32 1.442695, %v3150_v1  ;;  %v3140_v19 = vpop.f32.mrb[24].mxu0 }
 0x7ab   :  { %7032 = vpow2.f32 %v3153_v6  ;;  %v3151_v26 = vmin.f32 %v3140_v19, 0.0  ;;  %v3142_v27 = vpop.f32.mrb[25].mxu0  ;;  %vm3147_vm13 = vcmp.gt.f32.partialorder %v3140_v19, 0.0 }
 0x7ac   :  { %7034 = vpow2.f32 %v2828_v11  ;;  %v3152_v28 = vmin.f32 %v3142_v27, 0.0  ;;  %vm3148_vm15 = vcmp.gt.f32.partialorder %v3142_v27, 0.0 }
 0x7ad   :  { %7036 = vpow2.f32 %v3155_v25  ;;  %v3157_v30 = vmul.f32 1.442695, %v3151_v26 }
 0x7ae   :  { %v3159_v44 = vmul.f32 1.442695, %v3152_v28  ;;  %v5990_v28 = vld [vmem:[%s8897_s2 + $0x40] sm:$0xff] }
 0x7af   :  { %7038 = vpow2.f32 %v3157_v30  ;;  %v5991_v30 = vld [vmem:[%s8897_s2 + $0x48] sm:$0xff] }
 0x7b0   :  { %v7027_v46 = vpop.eup %7026  ;;  %7040 = vpow2.f32 %v3159_v44 }
 0x7b1   :  { %v7029_v47 = vpop.eup %7028  ;;  %v5946_v16 = vadd.f32 -1.0, %v7027_v46 }
 0x7b2   :  { %v5947_v49 = vadd.f32 -1.0, %v7029_v47 }
 0x7b3   :  { %v2834_v54 = vsel %vm2814_vm8, %v2803_v13, %v5946_v16 }
 0x7b4   :  { %v7031_v29 = vpop.eup %7030  ;;  %v2835_v62 = vsel %vm2815_vm10, %v2805_v20, %v5947_v49 }
 0x7b5   :  { %v7033_v48 = vpop.eup %7032  ;;  %v5948_v50 = vadd.f32 -1.0, %v7031_v29 }
 0x7b6   :  { %v7035_v51 = vpop.eup %7034  ;;  %v5970_v60 = vadd.f32 -1.0, %v7033_v48 }
 0x7b7   :  { %v7037_v53 = vpop.eup %7036  ;;  %v2836_v57 = vsel %vm2816_vm9, %v2809_v22, %v5948_v50  ;;  %v5949_v58 = vadd.f32 -1.0, %v7035_v51 }
 0x7b8   :  { %v2870_v59 = vpack.c.bf16 %v2836_v57, %v2834_v54  ;;  %v5971_v36 = vadd.f32 -1.0, %v7037_v53  ;;  %v3165_v4 = vsel %vm3145_vm12, %v3134_v31, %v5970_v60 }
 0x7b9   :  { %v7039_v61 = vpop.eup %7038  ;;  %v2837_v32 = vsel %vm2817_vm11, %v2811_v33, %v5949_v58 }
 0x7ba   :  { %v7041_v40 = vpop.eup %7040  ;;  %v5972_v63 = vadd.f32 -1.0, %v7039_v61  ;;  %v2871_v2 = vpack.c.bf16 %v2837_v32, %v2835_v62  ;;  %v3166_v35 = vsel %vm3146_vm14, %v3136_v38, %v5971_v36 }
 0x7bb   :  { %v5973_v3 = vadd.f32 -1.0, %v7041_v40 }
 0x7bc   :  { %v3167_v18 = vsel %vm3147_vm13, %v3140_v19, %v5972_v63  ;;  %3000 = vmatprep.mubr.bf16.mxu1 %v2871_v2 }
 0x7bd   :  { %v3201_v5 = vpack.c.bf16 %v3167_v18, %v3165_v4  ;;  %v3168_v42 = vsel %vm3148_vm15, %v3142_v27, %v5973_v3  ;;  %3001 = vmatmul.mubr.bf16.vlgmr.msra.gmra.mrb[32].mxu1 %v2870_v59 }
 0x7be   :  { %v3202_v7 = vpack.c.bf16 %v3168_v42, %v3166_v35  ;;  %6475 = vmatprep.mubr.msk.f32.mxu1 %vm7160_vm2, %v7158_v9 }
 0x7c0   :  { %3331 = vmatprep.mubr.bf16.mxu0 %v3202_v7 }
 0x7c1   :  { %3332 = vmatmul.mubr.bf16.vlgmr.msra.gmra.mrb[28].mxu0 %v3201_v5 }
 0x890   :  { %v6244_v12 = vpop.f32.mrb[32].mxu1 }
 0x891   :  { %v6245_v17 = vpop.f32.mrb[33].mxu1 }
 0x892   :  { %v6246_v21 = vadd.f32 %v6245_v17, %v6244_v12  ;;  %v6247_v13 = vpop.f32.mrb[34].mxu1  ;;  %v6796_v12 = vld [vmem:[%s8906_s11] sm:$0xff]   ;;  %v6798_v17 = vld [vmem:[%s8906_s11 + $0x48] sm:$0xff]  }
 0x893   :  { %v6248_v14 = vpop.f32.mrb[35].mxu1  ;;  %6296 = vmatpush3.bf16.msra.mxu0 %v6796_v12  ;;  %v6864_v12 = vld [vmem:[%s8906_s11 + $0x258] sm:$0xff]  }
 0x894   :  { %v3009_v20 = vadd.f32 %v6246_v21, %v8334_v41  ;;  %v6249_v45 = vadd.f32 %v6248_v14, %v6247_v13  ;;  %v6266_v23 = vpop.f32.mrb[28].mxu0  ;;  %v3342_v41 = vld [vmem:[%s8909_s14 + $0x26] ss:$0 sm:$0xff]  ;;  %v6799_v21 = vld [vmem:[%s8906_s11 + $0x8] sm:$0xff]   ;;  %6297 = vmatprep.subr.bf16.mxu0 %v6798_v17  ;;  %v6801_v13 = vld [vmem:[%s8906_s11 + $0x50] sm:$0xff]  }
 0x895   :  { %v6267_v15 = vpop.f32.mrb[29].mxu0  ;;  %v6802_v14 = vld [vmem:[%s8906_s11 + $0x10] sm:$0xff]   ;;  %v6865_v17 = vld [vmem:[%s8906_s11 + $0x218] sm:$0xff]  }
 0x896   :  { %v3010_v22 = vadd.f32 %v6249_v45, %v8336_v43  ;;  %v6268_v37 = vadd.f32 %v6267_v15, %v6266_v23  ;;  %v6269_v31 = vpop.f32.mrb[30].mxu0  ;;  %v6805_v45 = vld [vmem:[%s8906_s11 + $0x18] sm:$0xff]   ;;  %v6807_v23 = vld [vmem:[%s8906_s11 + $0x60] sm:$0xff]  }
 0x897   :  { %v6270_v33 = vpop.f32.mrb[31].mxu0  ;;  %6298 = vmatpush3.bf16.msra.mxu0 %v6799_v21  ;;  %v6808_v15 = vld [vmem:[%s8906_s11 + $0x20] sm:$0xff]  }
 0x898   :  { %v3340_v38 = vadd.f32 %v6268_v37, %v3009_v20  ;;  %v6271_v39 = vadd.f32 %v6270_v33, %v6269_v31  ;;  %6299 = vmatprep.subr.bf16.mxu0 %v6801_v13  ;;  %v6804_v20 = vld [vmem:[%s8906_s11 + $0x58] sm:$0xff]   ;;  %v6811_v37 = vld [vmem:[%s8906_s11 + $0x28] sm:$0xff]   ;;  %v6813_v31 = vld [vmem:[%s8906_s11 + $0x70] sm:$0xff]  }
 0x899   :  { %v6814_v33 = vld [vmem:[%s8906_s11 + $0x30] sm:$0xff]   ;;  %v6868_v21 = vld [vmem:[%s8906_s11 + $0x260] sm:$0xff]  }
 0x89a   :  { %v3341_v24 = vadd.f32 %v6271_v39, %v3010_v22  ;;  %v3414_v1 = vmul.f32 %v3343_v34, %v3340_v38  ;;  %v6810_v22 = vld [vmem:[%s8906_s11 + $0x68] sm:$0xff]   ;;  %v6869_v13 = vld [vmem:[%s8906_s11 + $0x220] sm:$0xff]  }
 0x89b   :  { %6300 = vmatpush3.bf16.msra.mxu0 %v6802_v14  ;;  %v6872_v14 = vld [vmem:[%s8906_s11 + $0x268] sm:$0xff]  }
 0x89c   :  { %v6538_v6 = vpack.c.bf16 %v3341_v24, %v3340_v38  ;;  %3416 = vadd.xlane.f32.xlu0 %v3414_v1  ;;  %v3415_v11 = vmul.f32 %v3343_v34, %v3341_v24  ;;  %6301 = vmatprep.subr.bf16.mxu0 %v6804_v20  ;;  %v3646_v24 = vld [vmem:[%s8909_s14 + $0x40] sm:$0x3]  ;;  %v3545_v1 = vld [vmem:[%s8898_s3 + $0x8] sm:$0xff] }
 0x89d   :  { %v6873_v20 = vld [vmem:[%s8906_s11 + $0x228] sm:$0xff]  }
 0x89e   :  { %3418 = vadd.xlane.f32.xlu1 %v3415_v11  ;;  %6539 = vmatpush3.bf16.xpose.msra.mxu1 %v6538_v6  ;;  %v3645_v11 = vld [vmem:[%s8899_s4 + $0x8] sm:$0xff] }
 0x89f   :  { %6541 = vmatprep.subr.bf16.mxu1 %v6538_v6  ;;  %6302 = vmatpush3.bf16.msra.mxu0 %v6805_v45  ;;  %v6876_v45 = vld [vmem:[%s8906_s11 + $0x270] sm:$0xff]  }
 0x8a0   :  { %6303 = vmatprep.subr.bf16.mxu0 %v6807_v23  ;;  %v6877_v23 = vld [vmem:[%s8906_s11 + $0x230] sm:$0xff]  }
 0x8a3   :  { %6304 = vmatpush3.bf16.msra.mxu0 %v6808_v15  ;;  %v6880_v15 = vld [vmem:[%s8906_s11 + $0x278] sm:$0xff]  }
 0x8a4   :  { %6305 = vmatprep.subr.bf16.mxu0 %v6810_v22  ;;  %v6881_v22 = vld [vmem:[%s8906_s11 + $0x238] sm:$0xff]  }
 0x8a5   :  { %6476 = vmatmul.mubr.f32.vlgmr.msra.gmra.mrb[36].mxu1 %v3342_v41  ;;  %v6794_v41 = vld [vmem:[#allocation4] sm:$0xff]  }
 0x8a6   :  { %6543 = vmatpush3.bf16.msra.mxu1 %v6538_v6  ;;  %v3644_v6 = vld [vmem:[%s8899_s4] sm:$0xff] }
 0x8a7   :  { %6306 = vmatpush3.bf16.msra.mxu0 %v6811_v37  ;;  %v3830_v37 = vld [vmem:[%s8900_s5 + $0x20] sm:$0xff] }
 0x8a8   :  { %6307 = vmatprep.subr.bf16.mxu0 %v6813_v31  ;;  %v3838_v31 = vld [vmem:[%s8900_s5 + $0x60] sm:$0xff] }
 0x8ab   :  { %6308 = vmatpush3.bf16.msra.mxu0 %v6814_v33  ;;  %v6015_v33 = vcombine.low %v3830_v37, %v3838_v31 }
 0x929   :  { %v3417_v26 = vpop.xlane.xlu0 %3416 }
 0x92b   :  { %v3419_v27 = vpop.xlane.xlu1 %3418 }
 0x978   :  { %v3410_v43 = vpop.f32.mrb[36].mxu1 }
 0x979   :  { %v3423_v25 = vrot.slane %v3410_v43, %v7467_v52  ;;  %v6477_v19 = vpop.f32.mrb[37].mxu1  ;;  %v6797_v43 = vld [vmem:[#allocation4 + $0x8] sm:$0xff]  }
 0x97a   :  { %v6803_v19 = vld [vmem:[#allocation4 + $0x18] sm:$0xff]  }
 0x97b   :  { %v3424_v44 = vadd.f32 %v3423_v25, %v3417_v26  ;;  %v3425_v46 = vadd.f32 %v3423_v25, %v3419_v27  ;;  %v6800_v25 = vld [vmem:[#allocation4 + $0x10] sm:$0xff]   ;;  %v6806_v26 = vld [vmem:[#allocation4 + $0x20] sm:$0xff]   ;;  %v6809_v27 = vld [vmem:[#allocation4 + $0x28] sm:$0xff]  }
 0x97d   :  { %v3429_v47 = vadd.f32 %v5990_v28, %v3424_v44  ;;  %v3430_v16 = vadd.f32 %v5991_v30, %v3425_v46  ;;  %v6812_v28 = vld [vmem:[#allocation4 + $0x30] sm:$0xff]   ;;  %v6815_v30 = vld [vmem:[#allocation4 + $0x38] sm:$0xff]  }
 0x97e   :  { %v6816_v44 = vld [vmem:[%s8906_s11 + $0x78] sm:$0xff]  }
 0x97f   :  { %vm3432_vm4 = vcmp.gt.f32.partialorder %v3430_v16, 0.0  ;;  %v3434_v29 = vmul.f32 0.2, %v3430_v16  ;;  %vm3431_vm5 = vcmp.gt.f32.partialorder %v3429_v47, 0.0  ;;  %v3433_v48 = vmul.f32 0.2, %v3429_v47  ;;  %6309 = vmatprep.subr.bf16.mxu0 %v6816_v44 }
 0x980   :  { %v6817_v46 = vld [vmem:[%s8906_s11 + $0x38] sm:$0xff]  }
 0x981   :  { %v3436_v49 = vsel %vm3432_vm4, %v3430_v16, %v3434_v29  ;;  %v3435_v50 = vsel %vm3431_vm5, %v3429_v47, %v3433_v48  ;;  %v6818_v47 = vld [vmem:[%s8906_s11 + $0xc0] sm:$0xff]   ;;  %6310 = vmatpush3.bf16.msra.mxu0 %v6817_v46  ;;  %v6912_v44 = vld [vmem:[%s8906_s11 + $0x378] sm:$0xff]  }
 0x982   :  { %v3438_v51 = vsel %vm907_vm6, %v3436_v49, -1e+30  ;;  %v3437_v53 = vsel %vm906_vm1, %v3435_v50, -1e+30  ;;  %v3834_v16 = vld [vmem:[%s8900_s5 + $0x40] sm:$0xff]  ;;  %v6913_v46 = vld [vmem:[%s8906_s11 + $0x338] sm:$0xff]  }
 0x983   :  { %v3442_v54 = vsel %vm2048_vm3, %v3438_v51, -inf  ;;  %v3439_v57 = vsel %vm2048_vm3, %v3437_v53, -inf  ;;  %v6820_v49 = vld [vmem:[%s8906_s11 + $0x140] sm:$0xff]  }
 0x984   :  { %3443 = vmax.xlane.f32.xlu1 %v3442_v54  ;;  %3440 = vmax.xlane.f32.xlu0 %v3439_v57  ;;  %v6821_v50 = vld [vmem:[%s8906_s11 + $0x100] sm:$0xff]   ;;  %v6828_v54 = vld [vmem:[%s8906_s11 + $0x150] sm:$0xff]  }
 0x985   :  { %6339 = vmatprep.subr.bf16.mxu0 %v6820_v49  ;;  %v6829_v57 = vld [vmem:[%s8906_s11 + $0x110] sm:$0xff]   ;;  %v3835_v49 = vld [vmem:[%s8900_s5 + $0x48] sm:$0xff] }
 0xa11   :  { %v3444_v58 = vpop.xlane.xlu1 %3443  ;;  %v3441_v59 = vpop.xlane.xlu0 %3440 }
 0xa12   :  { %v3446_v60 = vsub.f32 %v3438_v51, %v3444_v58  ;;  %v3445_v61 = vsub.f32 %v3437_v53, %v3441_v59  ;;  %v6824_v51 = vld [vmem:[%s8906_s11 + $0x148] sm:$0xff]   ;;  %v6832_v58 = vld [vmem:[%s8906_s11 + $0x158] sm:$0xff]  }
 0xa13   :  { %v6825_v53 = vld [vmem:[%s8906_s11 + $0x108] sm:$0xff]   ;;  %v6833_v59 = vld [vmem:[%s8906_s11 + $0x118] sm:$0xff]  }
 0xa14   :  { %v3449_v62 = vmul.f32 1.442695, %v3446_v60  ;;  %v3447_v32 = vmul.f32 1.442695, %v3445_v61  ;;  %v6836_v60 = vld [vmem:[%s8906_s11 + $0x160] sm:$0xff]  }
 0xa15   :  { %v6837_v61 = vld [vmem:[%s8906_s11 + $0x120] sm:$0xff]  }
 0xa16   :  { %7042 = vpow2.f32 %v3449_v62  ;;  %v6840_v62 = vld [vmem:[%s8906_s11 + $0x168] sm:$0xff]  }
 0xa17   :  { %7044 = vpow2.f32 %v3447_v32  ;;  %v6841_v32 = vld [vmem:[%s8906_s11 + $0x128] sm:$0xff]  }
 0xa20   :  { %v7043_v36 = vpop.eup %7042 }
 0xa21   :  { %v7045_v40 = vpop.eup %7044  ;;  %v3452_v63 = vsel %vm907_vm6, %v7043_v36, 0.0  ;;  %v6844_v36 = vld [vmem:[%s8906_s11 + $0x170] sm:$0xff]  }
 0xa22   :  { %v3456_v2 = vsel %vm2048_vm3, %v3452_v63, 0.0  ;;  %v3451_v3 = vsel %vm906_vm1, %v7045_v40, 0.0  ;;  %vm3647_vm1 = vcmask 15360   ;;  %v6845_v40 = vld [vmem:[%s8906_s11 + $0x130] sm:$0xff]  }
 0xa23   :  { %3457 = vadd.xlane.f32.xlu1 %v3456_v2  ;;  %v3453_v4 = vsel %vm2048_vm3, %v3451_v3, 0.0  ;;  %v6849_v2 = vld [vmem:[%s8906_s11 + $0x138] sm:$0xff]  }
 0xa24   :  { %3454 = vadd.xlane.f32.xlu0 %v3453_v4  ;;  %v3836_v4 = vld [vmem:[%s8900_s5 + $0x50] sm:$0xff] }
 0xab0   :  { %v3458_v18 = vpop.xlane.xlu1 %3457 }
 0xab1   :  { %7046 = vrcp.f32 %v3458_v18  ;;  %v3455_v35 = vpop.xlane.xlu0 %3454 }
 0xab2   :  { %7048 = vrcp.f32 %v3455_v35 }
 0xabb   :  { %v7047_v5 = vpop.eup %7046 }
 0xabc   :  { %v7049_v42 = vpop.eup %7048  ;;  %v3462_v7 = vmul.f32 %v7047_v5, %v3452_v63  ;;  %v6848_v63 = vld [vmem:[%s8906_s11 + $0x178] sm:$0xff]   ;;  %v6852_v5 = vld [vmem:[%s8906_s11 + $0x240] sm:$0xff]  }
 0xabd   :  { %v3461_v10 = vmul.f32 %v7049_v42, %v3451_v3  ;;  %v3828_v3 = vld [vmem:[%s8900_s5 + $0x10] sm:$0xff]  ;;  %v6853_v42 = vld [vmem:[%s8906_s11 + $0x200] sm:$0xff]  }
 0xabe   :  { %v6012_v18 = vcombine.high %v3828_v3, %v3836_v4  ;;  %v6011_v35 = vcombine.low %v3828_v3, %v3836_v4  ;;  %v6838_v3 = vld [vmem:[%s8906_s11 + $0xe8] sm:$0xff]  }
 0xabf   :  { %6482 = vmatprep.mubr.msk.f32.mxu1 %vm2048_vm3, %v3461_v10  ;;  %v6857_v10 = vld [vmem:[%s8906_s11 + $0x208] sm:$0xff]  }
 0xac0   :  { %6483 = vmatmul.mubr.msk.f32.vlgmr.msra.gmra.mrb[38].mxu1 %vm2048_vm3, %v3462_v7  ;;  %v6856_v7 = vld [vmem:[%s8906_s11 + $0x248] sm:$0xff]  }
 0xac1   :  { %6489 = vmatprep.mubr.msk.f32.mxu1 %vm2048_vm3, %v3544_v55  ;;  %v6860_v55 = vld [vmem:[%s8906_s11 + $0x250] sm:$0xff]   ;;  %v6839_v4 = vld [vmem:[%s8906_s11 + $0xa8] sm:$0xff]  }
 0xb93   :  { %v6484_v34 = vpop.f32.mrb[38].mxu1 }
 0xb94   :  { %v3535_v38 = vpop.f32.mrb[39].mxu1 }
 0xb95   :  { %v6544_v39 = vpack.c.bf16 %v6484_v34, %v3535_v38  ;;  %v6016_v34 = vcombine.high %v3830_v37, %v3838_v31  ;;  %v6884_v38 = vld [vmem:[%s8906_s11 + $0x340] sm:$0xff]   ;;  %v6870_v37 = vld [vmem:[%s8906_s11 + $0x1e8] sm:$0xff]  }
 0xb96   :  { %v6871_v31 = vld [vmem:[%s8906_s11 + $0x1a8] sm:$0xff]  }
 0xb97   :  { %6545 = vmatprep.subr.bf16.mxu1 %v6544_v39 }
 0xb98   :  { %6547 = vmatpush3.bf16.msra.mxu1 %v6544_v39  ;;  %v6885_v39 = vld [vmem:[%s8906_s11 + $0x300] sm:$0xff]  }
 0xb99   :  { %6492 = vmatprep.subr.msk.mxu1 %vm1860_vm0, %v3646_v24 }
 0xb9b   :  { %6490 = vmatmul.mubr.msk.f32.vlgmr.msra.gmra.mrb[40].mxu1 %vm2048_vm3, %v3545_v1  ;;  %v6889_v1 = vld [vmem:[%s8906_s11 + $0x308] sm:$0xff]  }
 0xb9c   :  { %6493 = vmatpush3.msk.msra.mxu1 %vm1860_vm0, %v3646_v24  ;;  %6494 = vmatprep.mubr.msk.f32.mxu1 %vm3647_vm1, %v3644_v6  ;;  %v6888_v24 = vld [vmem:[%s8906_s11 + $0x348] sm:$0xff]   ;;  %v6892_v6 = vld [vmem:[%s8906_s11 + $0x350] sm:$0xff]  }
 0xb9d   :  { %6497 = vmatprep.subr.bf16.mxu1 %v7158_v9 }
 0xb9f   :  { %6495 = vmatmul.mubr.msk.f32.vlgmr.msra.gmra.mrb[42].mxu1 %vm3647_vm1, %v3645_v11  ;;  %v6893_v11 = vld [vmem:[%s8906_s11 + $0x310] sm:$0xff]  }
 0xba0   :  { %6498 = vmatpush3.bf16.msra.mxu1 %v6794_v41  ;;  %6513 = vmatprep.mubr.msk.bf16.mxu1 %vm7160_vm2, %v7158_v9  ;;  %v6896_v41 = vld [vmem:[%s8906_s11 + $0x358] sm:$0xff]  }
 0xba1   :  { %6499 = vmatprep.subr.bf16.mxu1 %v7158_v9 }
 0xba4   :  { %6500 = vmatpush3.bf16.msra.mxu1 %v6797_v43  ;;  %v6897_v43 = vld [vmem:[%s8906_s11 + $0x318] sm:$0xff]  }
 0xba5   :  { %6501 = vmatprep.subr.bf16.mxu1 %v7158_v9 }
 0xba8   :  { %6502 = vmatpush3.bf16.msra.mxu1 %v6800_v25  ;;  %v6900_v25 = vld [vmem:[%s8906_s11 + $0x360] sm:$0xff]  }
 0xba9   :  { %6503 = vmatprep.subr.bf16.mxu1 %v7158_v9 }
 0xbac   :  { %6504 = vmatpush3.bf16.msra.mxu1 %v6803_v19  ;;  %v6901_v19 = vld [vmem:[%s8906_s11 + $0x320] sm:$0xff]  }
 0xbad   :  { %6505 = vmatprep.subr.bf16.mxu1 %v7158_v9 }
 0xbb0   :  { %6506 = vmatpush3.bf16.msra.mxu1 %v6806_v26  ;;  %v6904_v26 = vld [vmem:[%s8906_s11 + $0x368] sm:$0xff]  }
 0xbb1   :  { %6507 = vmatprep.subr.bf16.mxu1 %v7158_v9 }
 0xbb4   :  { %6508 = vmatpush3.bf16.msra.mxu1 %v6809_v27  ;;  %v6905_v27 = vld [vmem:[%s8906_s11 + $0x328] sm:$0xff]  }
 0xbb5   :  { %6509 = vmatprep.subr.bf16.mxu1 %v7158_v9 }
 0xbb8   :  { %6510 = vmatpush3.bf16.msra.mxu1 %v6812_v28  ;;  %v6908_v28 = vld [vmem:[%s8906_s11 + $0x370] sm:$0xff]  }
 0xbb9   :  { %6511 = vmatprep.subr.bf16.mxu1 %v7158_v9  ;;  %v3826_v9 = vld [vmem:[%s8900_s5] sm:$0xff] }
 0xbba   :  { %v6007_v29 = vcombine.low %v3826_v9, %v3834_v16  ;;  %v6008_v48 = vcombine.high %v3826_v9, %v3834_v16  ;;  %v3840_v9 = vld [vmem:[%s8900_s5 + $0x70] sm:$0xff] }
 0xbbc   :  { %6512 = vmatpush3.bf16.msra.mxu1 %v6815_v30  ;;  %4979 = vmatprep.mubr.bf16.mxu0 %v6008_v48  ;;  %v6909_v30 = vld [vmem:[%s8906_s11 + $0x330] sm:$0xff]   ;;  %v3827_v48 = vld [vmem:[%s8900_s5 + $0x8] sm:$0xff] }
 0xbbd   :  { %6317 = vmatprep.subr.bf16.mxu1 %v6818_v47  ;;  %4980 = vmatmul.mubr.bf16.vlgmr.msra.gmra.mrb[32].mxu0 %v6007_v29  ;;  %v3832_v47 = vld [vmem:[%s8900_s5 + $0x30] sm:$0xff] }
 0xbbe   :  { %6340 = vmatpush3.bf16.msra.mxu0 %v6821_v50  ;;  %5061 = vmatprep.mubr.bf16.mxu0 %v6012_v18  ;;  %v6019_v16 = vcombine.low %v3832_v47, %v3840_v9  ;;  %v6020_v29 = vcombine.high %v3832_v47, %v3840_v9  ;;  %v6842_v18 = vld [vmem:[%s8906_s11 + $0xf0] sm:$0xff]   ;;  %v6902_v47 = vld [vmem:[%s8906_s11 + $0x2e8] sm:$0xff]  }
 0xbbf   :  { %6341 = vmatprep.subr.bf16.mxu0 %v6824_v51  ;;  %v6903_v9 = vld [vmem:[%s8906_s11 + $0x2a8] sm:$0xff]  }
 0xbc2   :  { %6342 = vmatpush3.bf16.msra.mxu0 %v6825_v53  ;;  %v6819_v53 = vld [vmem:[%s8906_s11 + $0x80] sm:$0xff]  }
 0xbc3   :  { %6343 = vmatprep.subr.bf16.mxu0 %v6828_v54  ;;  %v6010_v54 = vcombine.high %v3827_v48, %v3835_v49 }
 0xbc6   :  { %6344 = vmatpush3.bf16.msra.mxu0 %v6829_v57 }
 0xbc7   :  { %6345 = vmatprep.subr.bf16.mxu0 %v6832_v58  ;;  %v6822_v58 = vld [vmem:[%s8906_s11 + $0xc8] sm:$0xff]  }
 0xbca   :  { %6346 = vmatpush3.bf16.msra.mxu0 %v6833_v59 }
 0xbcb   :  { %6347 = vmatprep.subr.bf16.mxu0 %v6836_v60  ;;  %v6823_v60 = vld [vmem:[%s8906_s11 + $0x88] sm:$0xff]  }
 0xbce   :  { %6348 = vmatpush3.bf16.msra.mxu0 %v6837_v61 }
 0xbcf   :  { %6349 = vmatprep.subr.bf16.mxu0 %v6840_v62  ;;  %v6826_v62 = vld [vmem:[%s8906_s11 + $0xd0] sm:$0xff]  }
 0xbd2   :  { %6350 = vmatpush3.bf16.msra.mxu0 %v6841_v32  ;;  %v6827_v32 = vld [vmem:[%s8906_s11 + $0x90] sm:$0xff]  }
 0xbd3   :  { %6351 = vmatprep.subr.bf16.mxu0 %v6844_v36  ;;  %v6830_v36 = vld [vmem:[%s8906_s11 + $0xd8] sm:$0xff]  }
 0xbd6   :  { %6352 = vmatpush3.bf16.msra.mxu0 %v6845_v40  ;;  %v6831_v40 = vld [vmem:[%s8906_s11 + $0x98] sm:$0xff]  }
 0xbd7   :  { %6353 = vmatprep.subr.bf16.mxu0 %v6848_v63  ;;  %v6834_v63 = vld [vmem:[%s8906_s11 + $0xe0] sm:$0xff]  }
 0xbda   :  { %6354 = vmatpush3.bf16.msra.mxu0 %v6849_v2  ;;  %v6835_v2 = vld [vmem:[%s8906_s11 + $0xa0] sm:$0xff]  }
 0xbdb   :  { %6383 = vmatprep.subr.bf16.mxu0 %v6852_v5  ;;  %v6846_v5 = vld [vmem:[%s8906_s11 + $0xf8] sm:$0xff]  }
 0xbdd   :  { %5062 = vmatmul.mubr.bf16.vlgmr.msra.gmra.mrb[36].mxu0 %v6011_v35  ;;  %v6843_v35 = vld [vmem:[%s8906_s11 + $0xb0] sm:$0xff]  }
 0xbde   :  { %6384 = vmatpush3.bf16.msra.mxu0 %v6853_v42  ;;  %5143 = vmatprep.mubr.bf16.mxu0 %v6016_v34  ;;  %v6847_v42 = vld [vmem:[%s8906_s11 + $0xb8] sm:$0xff]   ;;  %v6875_v34 = vld [vmem:[%s8906_s11 + $0x1b0] sm:$0xff]  }
 0xbdf   :  { %6385 = vmatprep.subr.bf16.mxu0 %v6856_v7  ;;  %v6850_v7 = vld [vmem:[%s8906_s11 + $0x1c0] sm:$0xff]  }
 0xbe2   :  { %6386 = vmatpush3.bf16.msra.mxu0 %v6857_v10  ;;  %v3829_v10 = vld [vmem:[%s8900_s5 + $0x18] sm:$0xff] }
 0xbe3   :  { %6387 = vmatprep.subr.bf16.mxu0 %v6860_v55  ;;  %v3837_v55 = vld [vmem:[%s8900_s5 + $0x58] sm:$0xff] }
 0xbe6   :  { %6388 = vmatpush3.bf16.msra.mxu0 %v6861_v8  ;;  %v6009_v8 = vcombine.low %v3827_v48, %v3835_v49  ;;  %v6910_v48 = vld [vmem:[%s8906_s11 + $0x2f8] sm:$0xff]  }
 0xbe7   :  { %6389 = vmatprep.subr.bf16.mxu0 %v6864_v12  ;;  %v6851_v12 = vld [vmem:[%s8906_s11 + $0x180] sm:$0xff]   ;;  %v6911_v49 = vld [vmem:[%s8906_s11 + $0x2b8] sm:$0xff]  }
 0xbea   :  { %6390 = vmatpush3.bf16.msra.mxu0 %v6865_v17  ;;  %v6014_v17 = vcombine.high %v3829_v10, %v3837_v55 }
 0xbeb   :  { %6391 = vmatprep.subr.bf16.mxu0 %v6868_v21  ;;  %v6854_v21 = vld [vmem:[%s8906_s11 + $0x1c8] sm:$0xff]  }
 0xbee   :  { %6392 = vmatpush3.bf16.msra.mxu0 %v6869_v13  ;;  %v6855_v13 = vld [vmem:[%s8906_s11 + $0x188] sm:$0xff]  }
 0xbef   :  { %6393 = vmatprep.subr.bf16.mxu0 %v6872_v14  ;;  %v6858_v14 = vld [vmem:[%s8906_s11 + $0x1d0] sm:$0xff]  }
 0xbf2   :  { %6394 = vmatpush3.bf16.msra.mxu0 %v6873_v20  ;;  %v6859_v20 = vld [vmem:[%s8906_s11 + $0x190] sm:$0xff]  }
 0xbf3   :  { %6395 = vmatprep.subr.bf16.mxu0 %v6876_v45  ;;  %v6862_v45 = vld [vmem:[%s8906_s11 + $0x1d8] sm:$0xff]  }
 0xbf6   :  { %6396 = vmatpush3.bf16.msra.mxu0 %v6877_v23  ;;  %v6863_v23 = vld [vmem:[%s8906_s11 + $0x198] sm:$0xff]  }
 0xbf7   :  { %6397 = vmatprep.subr.bf16.mxu0 %v6880_v15  ;;  %v6866_v15 = vld [vmem:[%s8906_s11 + $0x1e0] sm:$0xff]  }
 0xbfa   :  { %6398 = vmatpush3.bf16.msra.mxu0 %v6881_v22  ;;  %v6867_v22 = vld [vmem:[%s8906_s11 + $0x1a0] sm:$0xff]  }
 0xbfb   :  { %6427 = vmatprep.subr.bf16.mxu0 %v6884_v38  ;;  %v6878_v38 = vld [vmem:[%s8906_s11 + $0x1f8] sm:$0xff]  }
 0xbfd   :  { %5144 = vmatmul.mubr.bf16.vlgmr.msra.gmra.mrb[40].mxu0 %v6015_v33  ;;  %v6874_v33 = vld [vmem:[%s8906_s11 + $0x1f0] sm:$0xff]  }
 0xbfe   :  { %6428 = vmatpush3.bf16.msra.mxu0 %v6885_v39  ;;  %5225 = vmatprep.mubr.bf16.mxu0 %v6020_v29  ;;  %v6879_v39 = vld [vmem:[%s8906_s11 + $0x1b8] sm:$0xff]   ;;  %v6907_v29 = vld [vmem:[%s8906_s11 + $0x2b0] sm:$0xff]  }
 0xbff   :  { %6429 = vmatprep.subr.bf16.mxu0 %v6888_v24  ;;  %v6882_v24 = vld [vmem:[%s8906_s11 + $0x2c0] sm:$0xff]  }
 0xc02   :  { %6430 = vmatpush3.bf16.msra.mxu0 %v6889_v1  ;;  %v3831_v1 = vld [vmem:[%s8900_s5 + $0x28] sm:$0xff] }
 0xc03   :  { %6431 = vmatprep.subr.bf16.mxu0 %v6892_v6  ;;  %v3839_v6 = vld [vmem:[%s8900_s5 + $0x68] sm:$0xff] }
 0xc06   :  { %6432 = vmatpush3.bf16.msra.mxu0 %v6893_v11  ;;  %v6013_v11 = vcombine.low %v3829_v10, %v3837_v55  ;;  %v6926_v10 = vld [vmem:[%s8906_s11 + $0x3f0] sm:$0xff]  }
 0xc07   :  { %6433 = vmatprep.subr.bf16.mxu0 %v6896_v41  ;;  %v6883_v41 = vld [vmem:[%s8906_s11 + $0x280] sm:$0xff]  }
 0xc0a   :  { %6434 = vmatpush3.bf16.msra.mxu0 %v6897_v43  ;;  %v6018_v43 = vcombine.high %v3831_v1, %v3839_v6 }
 0xc0b   :  { %6435 = vmatprep.subr.bf16.mxu0 %v6900_v25  ;;  %v6886_v25 = vld [vmem:[%s8906_s11 + $0x2c8] sm:$0xff]  }
 0xc0e   :  { %6436 = vmatpush3.bf16.msra.mxu0 %v6901_v19  ;;  %v6887_v19 = vld [vmem:[%s8906_s11 + $0x288] sm:$0xff]  }
 0xc0f   :  { %6437 = vmatprep.subr.bf16.mxu0 %v6904_v26  ;;  %v6890_v26 = vld [vmem:[%s8906_s11 + $0x2d0] sm:$0xff]  }
 0xc12   :  { %6438 = vmatpush3.bf16.msra.mxu0 %v6905_v27  ;;  %v6891_v27 = vld [vmem:[%s8906_s11 + $0x290] sm:$0xff]  }
 0xc13   :  { %6439 = vmatprep.subr.bf16.mxu0 %v6908_v28  ;;  %v6894_v28 = vld [vmem:[%s8906_s11 + $0x2d8] sm:$0xff]  }
 0xc16   :  { %6440 = vmatpush3.bf16.msra.mxu0 %v6909_v30  ;;  %v6895_v30 = vld [vmem:[%s8906_s11 + $0x298] sm:$0xff]  }
 0xc17   :  { %6441 = vmatprep.subr.bf16.mxu0 %v6912_v44  ;;  %v6898_v44 = vld [vmem:[%s8906_s11 + $0x2e0] sm:$0xff]  }
 0xc1a   :  { %6442 = vmatpush3.bf16.msra.mxu0 %v6913_v46  ;;  %v6899_v46 = vld [vmem:[%s8906_s11 + $0x2a0] sm:$0xff]  }
 0xc1d   :  { %5226 = vmatmul.mubr.bf16.vlgmr.msra.gmra.mrb[44].mxu0 %v6019_v16  ;;  %v6906_v16 = vld [vmem:[%s8906_s11 + $0x2f0] sm:$0xff]  }
 0xc1e   :  { %5423 = vmatprep.mubr.bf16.mxu0 %v7154_v0 }
 0xc6e   :  { %v6491_v50 = vpop.f32.mrb[40].mxu1 }
 0xc6f   :  { %v3618_v51 = vpop.f32.mrb[41].mxu1 }
 0xc70   :  { %v3627_v57 = vpack.c.bf16 %v6491_v50, %v3618_v51  ;;  %v6914_v50 = vld [vmem:[%s8906_s11 + $0x3c0] sm:$0xff]   ;;  %v3833_v51 = vld [vmem:[%s8900_s5 + $0x38] sm:$0xff] }
 0xc72   :  { %6514 = vmatmul.mubr.bf16.vlgmr.msra.gmra.mrb[44].mxu1 %v3627_v57  ;;  %v8632_v59 = vpop.f32.mrb[42].mxu1 }
 0xc73   :  { %6318 = vmatpush3.bf16.msra.mxu1 %v6819_v53  ;;  %5020 = vmatprep.mubr.bf16.mxu1 %v6010_v54  ;;  %v8637_v61 = vpop.f32.mrb[43].mxu1  ;;  %v3841_v53 = vld [vmem:[%s8900_s5 + $0x78] sm:$0xff]  ;;  %v6017_v54 = vcombine.low %v3831_v1, %v3839_v6 }
 0xc74   :  { %6319 = vmatprep.subr.bf16.mxu1 %v6822_v58  ;;  %v6915_v58 = vld [vmem:[%s8906_s11 + $0x380] sm:$0xff]  }
 0xc77   :  { %6320 = vmatpush3.bf16.msra.mxu1 %v6823_v60  ;;  %v6022_v60 = vcombine.high %v3833_v51, %v3841_v53 }
 0xc78   :  { %6321 = vmatprep.subr.bf16.mxu1 %v6826_v62 }
 0xc7b   :  { %6322 = vmatpush3.bf16.msra.mxu1 %v6827_v32  ;;  %v6916_v32 = vld [vmem:[%s8906_s11 + $0x3c8] sm:$0xff]  }
 0xc7c   :  { %6323 = vmatprep.subr.bf16.mxu1 %v6830_v36 }
 0xc7f   :  { %6324 = vmatpush3.bf16.msra.mxu1 %v6831_v40 }
 0xc80   :  { %6325 = vmatprep.subr.bf16.mxu1 %v6834_v63  ;;  %v6917_v63 = vld [vmem:[%s8906_s11 + $0x388] sm:$0xff]  }
 0xc83   :  { %6326 = vmatpush3.bf16.msra.mxu1 %v6835_v2  ;;  %v6918_v2 = vld [vmem:[%s8906_s11 + $0x3d0] sm:$0xff]  }
 0xc84   :  { %6327 = vmatprep.subr.bf16.mxu1 %v6838_v3  ;;  %v6919_v3 = vld [vmem:[%s8906_s11 + $0x390] sm:$0xff]  }
 0xc87   :  { %6328 = vmatpush3.bf16.msra.mxu1 %v6839_v4  ;;  %v6920_v4 = vld [vmem:[%s8906_s11 + $0x3d8] sm:$0xff]  }
 0xc88   :  { %6329 = vmatprep.subr.bf16.mxu1 %v6842_v18  ;;  %v6921_v18 = vld [vmem:[%s8906_s11 + $0x398] sm:$0xff]  }
 0xc8b   :  { %6330 = vmatpush3.bf16.msra.mxu1 %v6843_v35  ;;  %v6922_v35 = vld [vmem:[%s8906_s11 + $0x3e0] sm:$0xff]  }
 0xc8c   :  { %6331 = vmatprep.subr.bf16.mxu1 %v6846_v5  ;;  %v6923_v5 = vld [vmem:[%s8906_s11 + $0x3a0] sm:$0xff]  }
 0xc8f   :  { %6332 = vmatpush3.bf16.msra.mxu1 %v6847_v42  ;;  %v6924_v42 = vld [vmem:[%s8906_s11 + $0x3e8] sm:$0xff]  }
 0xc90   :  { %6361 = vmatprep.subr.bf16.mxu1 %v6850_v7  ;;  %v6311_v57 = vpop.f32.mrb[32].mxu0  ;;  %v6925_v7 = vld [vmem:[%s8906_s11 + $0x3a8] sm:$0xff]  }
 0xc91   :  { %v6312_v62 = vpop.f32.mrb[33].mxu0 }
 0xc92   :  { %5021 = vmatmul.mubr.bf16.vlgmr.msra.gmra.mrb[48].mxu1 %v6009_v8  ;;  %v8798_v36 = vadd.f32 %v6312_v62, %v6311_v57  ;;  %v6314_v40 = vpop.f32.mrb[34].mxu0  ;;  %v6948_v62 = vld [vmem:[#allocation7 + $0x60] ss:$8 sps:$4 sm:$0xff]  }
 0xc93   :  { %6362 = vmatpush3.bf16.msra.mxu1 %v6851_v12  ;;  %5102 = vmatprep.mubr.bf16.mxu1 %v6014_v17  ;;  %v6315_v55 = vpop.f32.mrb[35].mxu0  ;;  %v6927_v12 = vld [vmem:[%s8906_s11 + $0x3b0] sm:$0xff]   ;;  %v6928_v17 = vld [vmem:[%s8906_s11 + $0x3f8] sm:$0xff]  }
 0xc94   :  { %6363 = vmatprep.subr.bf16.mxu1 %v6854_v21  ;;  %v8830_v8 = vadd.f32 %v6315_v55, %v6314_v40  ;;  %v6953_v40 = vld [vmem:[#allocation7 + $0x74] ss:$8 sps:$4 sm:$0xff]  }
 0xc97   :  { %6364 = vmatpush3.bf16.msra.mxu1 %v6855_v13 }
 0xc98   :  { %6365 = vmatprep.subr.bf16.mxu1 %v6858_v14  ;;  %v6929_v14 = vld [vmem:[%s8906_s11 + $0x3b8] sm:$0xff]  }
 0xc9b   :  { %6366 = vmatpush3.bf16.msra.mxu1 %v6859_v20 }
 0xc9c   :  { %6367 = vmatprep.subr.bf16.mxu1 %v6862_v45 }
 0xc9f   :  { %6368 = vmatpush3.bf16.msra.mxu1 %v6863_v23 }
 0xca0   :  { %6369 = vmatprep.subr.bf16.mxu1 %v6866_v15 }
 0xca3   :  { %6370 = vmatpush3.bf16.msra.mxu1 %v6867_v22  ;;  %v6021_v22 = vcombine.low %v3833_v51, %v3841_v53 }
 0xca4   :  { %6371 = vmatprep.subr.bf16.mxu1 %v6870_v37 }
 0xca7   :  { %6372 = vmatpush3.bf16.msra.mxu1 %v6871_v31 }
 0xca8   :  { %6373 = vmatprep.subr.bf16.mxu1 %v6874_v33 }
 0xcab   :  { %6374 = vmatpush3.bf16.msra.mxu1 %v6875_v34 }
 0xcac   :  { %6375 = vmatprep.subr.bf16.mxu1 %v6878_v38 }
 0xcaf   :  { %6376 = vmatpush3.bf16.msra.mxu1 %v6879_v39 }
 0xcb0   :  { %6405 = vmatprep.subr.bf16.mxu1 %v6882_v24  ;;  %v6355_v21 = vpop.f32.mrb[36].mxu0 }
 0xcb1   :  { %v6356_v13 = vpop.f32.mrb[37].mxu0 }
 0xcb2   :  { %5103 = vmatmul.mubr.bf16.vlgmr.msra.gmra.mrb[52].mxu1 %v6013_v11  ;;  %v8841_v20 = vadd.f32 %v6356_v13, %v6355_v21  ;;  %v6358_v45 = vpop.f32.mrb[38].mxu0 }
 0xcb3   :  { %6406 = vmatpush3.bf16.msra.mxu1 %v6883_v41  ;;  %5184 = vmatprep.mubr.bf16.mxu1 %v6018_v43  ;;  %v6359_v23 = vpop.f32.mrb[39].mxu0 }
 0xcb4   :  { %6407 = vmatprep.subr.bf16.mxu1 %v6886_v25  ;;  %v8843_v15 = vadd.f32 %v6359_v23, %v6358_v45  ;;  %v6930_v25 = vld [vmem:[#allocation7] ss:$8 sps:$4 sm:$0xff]  }
 0xcb7   :  { %6408 = vmatpush3.bf16.msra.mxu1 %v6887_v19  ;;  %v6932_v19 = vld [vmem:[#allocation7 + $0x4] ss:$8 sps:$4 sm:$0xff]  }
 0xcb8   :  { %6409 = vmatprep.subr.bf16.mxu1 %v6890_v26  ;;  %v6935_v26 = vld [vmem:[#allocation7 + $0x14] ss:$8 sps:$4 sm:$0xff]   ;;  %5391 = vmatprep.subr.bf16.mxu0 %v6932_v19 }
 0xcb9   :  { %5392 = vmatpush1.bf16.msra.mxu0 %v6930_v25 }
 0xcba   :  { %5393 = vmatprep.subr.bf16.mxu0 %v6935_v26 }
 0xcbb   :  { %6410 = vmatpush3.bf16.msra.mxu1 %v6891_v27  ;;  %v6933_v27 = vld [vmem:[#allocation7 + $0x10] ss:$8 sps:$4 sm:$0xff]  }
 0xcbc   :  { %6411 = vmatprep.subr.bf16.mxu1 %v6894_v28  ;;  %v6938_v28 = vld [vmem:[#allocation7 + $0x24] ss:$8 sps:$4 sm:$0xff]  }
 0xcbd   :  { %5394 = vmatpush1.bf16.msra.mxu0 %v6933_v27 }
 0xcbe   :  { %5395 = vmatprep.subr.bf16.mxu0 %v6938_v28 }
 0xcbf   :  { %6412 = vmatpush3.bf16.msra.mxu1 %v6895_v30  ;;  %v6936_v30 = vld [vmem:[#allocation7 + $0x20] ss:$8 sps:$4 sm:$0xff]  }
 0xcc0   :  { %6413 = vmatprep.subr.bf16.mxu1 %v6898_v44  ;;  %v6941_v44 = vld [vmem:[#allocation7 + $0x34] ss:$8 sps:$4 sm:$0xff]  }
 0xcc1   :  { %5396 = vmatpush1.bf16.msra.mxu0 %v6936_v30 }
 0xcc2   :  { %5397 = vmatprep.subr.bf16.mxu0 %v6941_v44 }
 0xcc3   :  { %6414 = vmatpush3.bf16.msra.mxu1 %v6899_v46  ;;  %v6939_v46 = vld [vmem:[#allocation7 + $0x30] ss:$8 sps:$4 sm:$0xff]  }
 0xcc4   :  { %6415 = vmatprep.subr.bf16.mxu1 %v6902_v47  ;;  %v6944_v47 = vld [vmem:[#allocation7 + $0x44] ss:$8 sps:$4 sm:$0xff]  }
 0xcc5   :  { %5398 = vmatpush1.bf16.msra.mxu0 %v6939_v46 }
 0xcc6   :  { %5399 = vmatprep.subr.bf16.mxu0 %v6944_v47 }
 0xcc7   :  { %6416 = vmatpush3.bf16.msra.mxu1 %v6903_v9  ;;  %v6942_v9 = vld [vmem:[#allocation7 + $0x40] ss:$8 sps:$4 sm:$0xff]  }
 0xcc8   :  { %6417 = vmatprep.subr.bf16.mxu1 %v6906_v16  ;;  %v6947_v16 = vld [vmem:[#allocation7 + $0x54] ss:$8 sps:$4 sm:$0xff]  }
 0xcc9   :  { %5400 = vmatpush1.bf16.msra.mxu0 %v6942_v9 }
 0xcca   :  { %5401 = vmatprep.subr.bf16.mxu0 %v6947_v16 }
 0xccb   :  { %6418 = vmatpush3.bf16.msra.mxu1 %v6907_v29  ;;  %v6945_v29 = vld [vmem:[#allocation7 + $0x50] ss:$8 sps:$4 sm:$0xff]  }
 0xccc   :  { %6419 = vmatprep.subr.bf16.mxu1 %v6910_v48 }
 0xccd   :  { %5402 = vmatpush1.bf16.msra.mxu0 %v6945_v29 }
 0xccf   :  { %6420 = vmatpush3.bf16.msra.mxu1 %v6911_v49  ;;  %v3821_v49 = vld [vmem:[%s8909_s14 + $0x2] ss:$0 sm:$0xff] }
 0xcd0   :  { %6449 = vmatprep.subr.bf16.mxu1 %v6914_v50  ;;  %v6399_v37 = vpop.f32.mrb[40].mxu0 }
 0xcd1   :  { %v6400_v31 = vpop.f32.mrb[41].mxu0 }
 0xcd2   :  { %5185 = vmatmul.mubr.bf16.vlgmr.msra.gmra.mrb[56].mxu1 %v6017_v54  ;;  %v8845_v33 = vadd.f32 %v6400_v31, %v6399_v37  ;;  %v6402_v34 = vpop.f32.mrb[42].mxu0  ;;  %v6950_v54 = vld [vmem:[#allocation7 + $0x64] ss:$8 sps:$4 sm:$0xff]  }
 0xcd3   :  { %6450 = vmatpush3.bf16.msra.mxu1 %v6915_v58  ;;  %5266 = vmatprep.mubr.bf16.mxu1 %v6022_v60  ;;  %v6403_v38 = vpop.f32.mrb[43].mxu0 }
 0xcd4   :  { %6451 = vmatprep.subr.bf16.mxu1 %v6916_v32  ;;  %v8847_v39 = vadd.f32 %v6403_v38, %v6402_v34  ;;  %5403 = vmatprep.subr.bf16.mxu0 %v6950_v54  ;;  %v6965_v54 = vld [vmem:[#allocation6 + $0x34] ss:$8 sps:$4 sm:$0xff]  }
 0xcd5   :  { %5404 = vmatpush1.bf16.msra.mxu0 %v6948_v62  ;;  %v6971_v62 = vld [vmem:[#allocation6 + $0x54] ss:$8 sps:$4 sm:$0xff]  }
 0xcd6   :  { %5405 = vmatprep.subr.bf16.mxu0 %v6953_v40  ;;  %v6974_v40 = vld [vmem:[#allocation6 + $0x64] ss:$8 sps:$4 sm:$0xff]  }
 0xcd7   :  { %6452 = vmatpush3.bf16.msra.mxu1 %v6917_v63 }
 0xcd8   :  { %6453 = vmatprep.subr.bf16.mxu1 %v6918_v2 }
 0xcdb   :  { %6454 = vmatpush3.bf16.msra.mxu1 %v6919_v3  ;;  %v6951_v3 = vld [vmem:[#allocation7 + $0x70] ss:$8 sps:$4 sm:$0xff]  }
 0xcdc   :  { %6455 = vmatprep.subr.bf16.mxu1 %v6920_v4  ;;  %5406 = vmatpush1.bf16.msra.mxu0 %v6951_v3  ;;  %v5579_v3 = vld [vmem:[%s8909_s14 + $0x48] sm:$0xc] }
 0xcdf   :  { %6456 = vmatpush3.bf16.msra.mxu1 %v6921_v18  ;;  %v4098_v18 = vld [vmem:[%s8909_s14 + $0x3] ss:$0 sm:$0xff] }
 0xce0   :  { %6457 = vmatprep.subr.bf16.mxu1 %v6922_v35  ;;  %v4985_v55 = vadd.f32 %v8830_v8, %v4098_v18 }
 0xce3   :  { %6458 = vmatpush3.bf16.msra.mxu1 %v6923_v5 }
 0xce4   :  { %6459 = vmatprep.subr.bf16.mxu1 %v6924_v42 }
 0xce7   :  { %6460 = vmatpush3.bf16.msra.mxu1 %v6925_v7 }
 0xce8   :  { %6461 = vmatprep.subr.bf16.mxu1 %v6926_v10 }
 0xceb   :  { %6462 = vmatpush3.bf16.msra.mxu1 %v6927_v12 }
 0xcec   :  { %6463 = vmatprep.subr.bf16.mxu1 %v6928_v17 }
 0xcef   :  { %6464 = vmatpush3.bf16.msra.mxu1 %v6929_v14 }
 0xcf0   :  { %v6443_v24 = vpop.f32.mrb[44].mxu0 }
 0xcf1   :  { %v6444_v1 = vpop.f32.mrb[45].mxu0 }
 0xcf2   :  { %5267 = vmatmul.mubr.bf16.vlgmr.msra.gmra.mrb[60].mxu1 %v6021_v22  ;;  %v8849_v6 = vadd.f32 %v6444_v1, %v6443_v24  ;;  %v6446_v11 = vpop.f32.mrb[46].mxu0 }
 0xcf3   :  { %v6447_v41 = vpop.f32.mrb[47].mxu0 }
 0xcf4   :  { %v8851_v43 = vadd.f32 %v6447_v41, %v6446_v11 }
 0xd45   :  { %v3814_v48 = vpop.f32.mrb[44].mxu1 }
 0xd46   :  { %v3815_v50 = vadd.f32 %v3814_v48, %v8637_v61  ;;  %v6515_v51 = vpop.f32.mrb[45].mxu1  ;;  %v6956_v61 = vld [vmem:[#allocation6 + $0x4] ss:$8 sps:$4 sm:$0xff]  }
 0xd47   :  { %v3817_v53 = vpop.f32.mrb[46].mxu1  ;;  %5514 = vmatprep.subr.bf16.mxu0 %v6956_v61  ;;  %v6959_v51 = vld [vmem:[#allocation6 + $0x14] ss:$8 sps:$4 sm:$0xff]   ;;  %v5584_v61 = vrot.slane %v5579_v3, 2 }
 0xd48   :  { %v3822_v57 = vadd.f32 %v3821_v49, %v3815_v50  ;;  %v3818_v58 = vadd.f32 %v8632_v59, %v3817_v53  ;;  %v6516_v60 = vpop.f32.mrb[47].mxu1  ;;  %v4982_v59 = vadd.f32 %v8798_v36, %v4098_v18  ;;  %v6957_v53 = vld [vmem:[#allocation6 + $0x10] ss:$8 sps:$4 sm:$0xff]   ;;  %v5578_v18 = vld [vmem:[%s8909_s14 + $0x40] sm:$0xc] }
 0xd49   :  { %v6966_v60 = vld [vmem:[#allocation6 + $0x40] ss:$8 sps:$4 sm:$0xff]   ;;  %5587 = vmatprep.subr.mxu1 %v5584_v61 }
 0xd4a   :  { %v3823_v32 = vadd.f32 %v3821_v49, %v3818_v58  ;;  %v3824_v63 = vmax.f32 %v3822_v57, 0.0  ;;  %v6954_v49 = vld [vmem:[#allocation6] ss:$8 sps:$4 sm:$0xff]   ;;  %v6963_v57 = vld [vmem:[#allocation6 + $0x30] ss:$8 sps:$4 sm:$0xff]  }
 0xd4b   :  { %v6968_v58 = vld [vmem:[#allocation6 + $0x44] ss:$8 sps:$4 sm:$0xff]  }
 0xd4c   :  { %v3825_v2 = vmax.f32 %v3823_v32, 0.0  ;;  %v6969_v32 = vld [vmem:[#allocation6 + $0x50] ss:$8 sps:$4 sm:$0xff]  }
 0xd4e   :  { %v8858_v4 = vpack.c.bf16 %v3825_v2, %v3824_v63  ;;  %v6977_v63 = vld [vmem:[#allocation6 + $0x74] ss:$8 sps:$4 sm:$0xff]   ;;  %v6975_v2 = vld [vmem:[#allocation6 + $0x70] ss:$8 sps:$4 sm:$0xff]  }
 0xd65   :  { %v6333_v35 = vpop.f32.mrb[48].mxu1 }
 0xd66   :  { %v6334_v5 = vpop.f32.mrb[49].mxu1 }
 0xd67   :  { %v6335_v42 = vadd.f32 %v6334_v5, %v6333_v35  ;;  %v6336_v7 = vpop.f32.mrb[50].mxu1  ;;  %v6183_v35 = vld [vmem:[%s8909_s14 + $0x4] ss:$8 sm:$0x3] }
 0xd68   :  { %v6337_v10 = vpop.f32.mrb[51].mxu1  ;;  %v5563_v5 = vrot.slane %v6183_v35, %v7467_v52  ;;  %v5580_v52 = vld [vmem:[%s8909_s14 + $0x5] ss:$0 sm:$0xff] }
 0xd69   :  { %v5023_v12 = vadd.f32 %v6335_v42, %v4982_v59  ;;  %v6338_v17 = vadd.f32 %v6337_v10, %v6336_v7  ;;  %v5583_v59 = vrot.slane %v5578_v18, 2 }
 0xd6b   :  { %v5026_v21 = vadd.f32 %v6338_v17, %v4985_v55  ;;  %v5064_v13 = vadd.f32 %v8841_v20, %v5023_v12  ;;  %5588 = vmatpush1.xpose.msra.mxu1 %v5583_v59 }
 0xd6d   :  { %v5067_v14 = vadd.f32 %v8843_v15, %v5026_v21 }
 0xd85   :  { %v6377_v45 = vpop.f32.mrb[52].mxu1 }
 0xd86   :  { %v6378_v23 = vpop.f32.mrb[53].mxu1 }
 0xd87   :  { %v6379_v22 = vadd.f32 %v6378_v23, %v6377_v45  ;;  %v6380_v37 = vpop.f32.mrb[54].mxu1 }
 0xd88   :  { %v6381_v31 = vpop.f32.mrb[55].mxu1 }
 0xd89   :  { %v5105_v36 = vadd.f32 %v6379_v22, %v5064_v13  ;;  %v6382_v34 = vadd.f32 %v6381_v31, %v6380_v37 }
 0xd8b   :  { %v5108_v38 = vadd.f32 %v6382_v34, %v5067_v14  ;;  %v5146_v24 = vadd.f32 %v8845_v33, %v5105_v36 }
 0xd8d   :  { %v5149_v1 = vadd.f32 %v8847_v39, %v5108_v38 }
 0xda5   :  { %v6421_v8 = vpop.f32.mrb[56].mxu1 }
 0xda6   :  { %v6422_v11 = vpop.f32.mrb[57].mxu1 }
 0xda7   :  { %v6423_v41 = vadd.f32 %v6422_v11, %v6421_v8  ;;  %v6424_v25 = vpop.f32.mrb[58].mxu1 }
 0xda8   :  { %v6425_v19 = vpop.f32.mrb[59].mxu1 }
 0xda9   :  { %v5187_v20 = vadd.f32 %v6423_v41, %v5146_v24  ;;  %v6426_v26 = vadd.f32 %v6425_v19, %v6424_v25 }
 0xdab   :  { %v5190_v15 = vadd.f32 %v6426_v26, %v5149_v1  ;;  %v5228_v27 = vadd.f32 %v8849_v6, %v5187_v20  ;;  %v6962_v6 = vld [vmem:[#allocation6 + $0x24] ss:$8 sps:$4 sm:$0xff]  }
 0xdad   :  { %v5231_v28 = vadd.f32 %v8851_v43, %v5190_v15  ;;  %v6960_v43 = vld [vmem:[#allocation6 + $0x20] ss:$8 sps:$4 sm:$0xff]  }
 0xdc5   :  { %v6465_v30 = vpop.f32.mrb[60].mxu1 }
 0xdc6   :  { %v6466_v44 = vpop.f32.mrb[61].mxu1 }
 0xdc7   :  { %v6467_v46 = vadd.f32 %v6466_v44, %v6465_v30  ;;  %v6468_v47 = vpop.f32.mrb[62].mxu1 }
 0xdc8   :  { %v6469_v9 = vpop.f32.mrb[63].mxu1 }
 0xdc9   :  { %v5269_v33 = vadd.f32 %v6467_v46, %v5228_v27  ;;  %v6470_v16 = vadd.f32 %v6469_v9, %v6468_v47 }
 0xdcb   :  { %v5272_v39 = vadd.f32 %v6470_v16, %v5231_v28  ;;  %v5275_v29 = vmax.f32 %v5269_v33, 0.0 }
 0xdcd   :  { %v5276_v48 = vmax.f32 %v5272_v39, 0.0 }
 0xdcf   :  { %v5294_v50 = vpack.c.bf16 %v5276_v48, %v5275_v29 }
 0xdd1   :  { %5424 = vmatmul.mubr.bf16.vlgmr.msra.gmra.mrb[48].mxu0 %v5294_v50 }
 0xdd2   :  { %5515 = vmatpush1.bf16.msra.mxu0 %v6954_v49  ;;  %5546 = vmatprep.mubr.bf16.mxu0 %v7154_v0  ;;  %v6972_v0 = vld [vmem:[#allocation6 + $0x60] ss:$8 sps:$4 sm:$0xff]  }
 0xdd3   :  { %5516 = vmatprep.subr.bf16.mxu0 %v6959_v51 }
 0xdd6   :  { %5517 = vmatpush1.bf16.msra.mxu0 %v6957_v53 }
 0xdd7   :  { %5518 = vmatprep.subr.bf16.mxu0 %v6962_v6 }
 0xdda   :  { %5519 = vmatpush1.bf16.msra.mxu0 %v6960_v43 }
 0xddb   :  { %5520 = vmatprep.subr.bf16.mxu0 %v6965_v54 }
 0xdde   :  { %5521 = vmatpush1.bf16.msra.mxu0 %v6963_v57 }
 0xddf   :  { %5522 = vmatprep.subr.bf16.mxu0 %v6968_v58 }
 0xde2   :  { %5523 = vmatpush1.bf16.msra.mxu0 %v6966_v60 }
 0xde3   :  { %5524 = vmatprep.subr.bf16.mxu0 %v6971_v62 }
 0xde6   :  { %5525 = vmatpush1.bf16.msra.mxu0 %v6969_v32 }
 0xde7   :  { %5526 = vmatprep.subr.bf16.mxu0 %v6974_v40 }
 0xdea   :  { %5527 = vmatpush1.bf16.msra.mxu0 %v6972_v0 }
 0xdeb   :  { %5528 = vmatprep.subr.bf16.mxu0 %v6977_v63 }
 0xdee   :  { %5529 = vmatpush1.bf16.msra.mxu0 %v6975_v2 }
 0xdf1   :  { %5547 = vmatmul.mubr.bf16.vlgmr.msra.gmra.mrb[48].mxu0 %v8858_v4  ;;  %v5567_v4 = vrot.slane %v6183_v35, %v7479_v56 }
 0xec4   :  { %v5548_v42 = vpop.f32.mrb[48].mxu0 }
 0xec5   :  { %v5570_v7 = vadd.f32 %v5563_v5, %v5548_v42  ;;  %v5550_v10 = vpop.f32.mrb[49].mxu0 }
 0xec6   :  { %v5571_v55 = vadd.f32 %v5567_v4, %v5550_v10  ;;  %v5552_v12 = vpop.f32.mrb[50].mxu0 }
 0xec7   :  { %v5554_v17 = vpop.f32.mrb[51].mxu0  ;;  %v5574_v14 = vmax.f32 %v5570_v7, 0.0  ;;  %v5572_v45 = vadd.f32 %v5563_v5, %v5552_v12 }
 0xec8   :  { %v5575_v21 = vmax.f32 %v5571_v55, 0.0  ;;  %v5573_v13 = vadd.f32 %v5567_v4, %v5554_v17 }
 0xec9   :  { %v5576_v22 = vmax.f32 %v5572_v45, 0.0 }
 0xeca   :  { %v5577_v23 = vmax.f32 %v5573_v13, 0.0  ;;  %5651 = vmatprep.mubr.f32.mxu1 %v5575_v21 }
 0xecb   :  { %5652 = vmatmul.mubr.f32.vlgmr.msra.gmra.mrb[64].mxu1 %v5574_v14 }
 0xecc   :  { %5656 = vmatprep.mubr.f32.mxu1 %v5577_v23 }
 0xecf   :  { %5657 = vmatmul.mubr.f32.gmra.mrb[66].mxu1 %v5576_v22 }
 0xf9e   :  { %v5653_v56 = vpop.f32.mrb[64].mxu1 }
 0xf9f   :  { %v5654_v37 = vadd.f32 %v5653_v56, %v5580_v52  ;;  %v5655_v31 = vpop.f32.mrb[65].mxu1 }
 0xfa1   :  { %5662 = vst.msk [vmem:[%s8910_s15] sm:$0xff] %vm3647_vm1, %v5654_v37 }
 0xfa2   :  { %v5658_v36 = vpop.f32.mrb[66].mxu1 }
 0xfa3   :  { %v5659_v34 = vadd.f32 %v5658_v36, %v5580_v52  ;;  %v5660_v38 = vpop.f32.mrb[67].mxu1 }
 0xfa5   :  { %5663 = vst.msk [vmem:[%s8910_s15 + $0x8] sm:$0xff] %vm3647_vm1, %v5659_v34 }
 0xfa6   :  { %5668 = vsyncpa [#allocation3], 1 }
 0xfa7   :  { %5669 = vsyncpa [#allocation5], 1 }
 0xfa8   :  { %5670 = vsyncpa [#allocation8], 1 }

</bundles_post_ra>
